<compile_context>
chip_gen: v5e
topology: v5e:2x2
jax: 0.10.0
libtpu: 0.0.40
codegen_flags: <defaults>
</compile_context>

<pallas_src>
import jax
import jax.numpy as jnp
from jax.experimental import pallas as pl
from jax.experimental.pallas import tpu as pltpu

F_PAD = 8  # input feature dim 3 padded to a sublane-friendly 8


def _full_spec(shape):
    """BlockSpec covering the whole array (single grid point)."""
    zeros = (0,) * len(shape)
    return pl.BlockSpec(shape, lambda i, z=zeros: z)


# ---------------------------------------------------------------------------
# Fused kernel: 3x GCN layer + mean-pool + fc1 + ReLU + fc2 (lane-dense out)
# ---------------------------------------------------------------------------
def _fused_draggnn_kernel(adj_ref, x_ref, pool_ref,
                          w1_ref, b1_ref, w2_ref, b2_ref, w3_ref, b3_ref,
                          wf1_ref, bf1_ref, wf2_ref, bf2_ref,
                          o_ref):
    f32 = jnp.float32
    bf16 = jnp.bfloat16

    adj = adj_ref[...]  # (N, N) bf16 -- loaded once, reused by all 3 layers

    def gcn(h_bf16, w_ref, b_ref):
        # out = relu( A_hat @ (H @ W) + b ); bf16 operands, f32 accumulation.
        xw = jnp.dot(h_bf16, w_ref[...], preferred_element_type=f32)
        agg = jnp.dot(adj, xw.astype(bf16), preferred_element_type=f32)
        return jnp.maximum(agg + b_ref[...], 0.0).astype(bf16)

    h = gcn(x_ref[...], w1_ref, b1_ref)     # (N, 512)
    h = gcn(h, w2_ref, b2_ref)              # (N, 1024)
    h = gcn(h, w3_ref, b3_ref)              # (N, 512)

    pooled = jnp.dot(pool_ref[...], h, preferred_element_type=f32)          # (G, 512)
    g1 = jnp.dot(pooled.astype(bf16), wf1_ref[...], preferred_element_type=f32)
    g1 = jnp.maximum(g1 + bf1_ref[...], 0.0)                                # (G, 128)
    out = jnp.dot(g1.astype(bf16), wf2_ref[...], preferred_element_type=f32)
    o_ref[...] = out + bf2_ref[...]          # (G, 128) lane-dense; col 0 = fc2 result


def draggnn_forward(x_pad, adj, pool, p):
    """x_pad: (N, F_PAD) bf16; adj: (N, N) bf16; pool: (G, N) bf16."""
    n = adj.shape[0]
    g = pool.shape[0]
    args = (adj, x_pad, pool,
            p["w1"], p["b1"], p["w2"], p["b2"], p["w3"], p["b3"],
            p["wf1"], p["bf1"], p["wf2"], p["bf2"])

    flops = 2 * (n * x_pad.shape[1] * 512 + n * n * 512
                 + n * 512 * 1024 + n * n * 1024
                 + n * 1024 * 512 + n * n * 512
                 + g * n * 512 + g * 512 * 128 + g * 128 * 128)
    bytes_accessed = sum(int(a.size) * a.dtype.itemsize for a in args) + g * 128 * 4

    out = pl.pallas_call(
        _fused_draggnn_kernel,
        out_shape=jax.ShapeDtypeStruct((g, 128), jnp.float32),
        grid=(1,),
        in_specs=[_full_spec(a.shape) for a in args],
        out_specs=_full_spec((g, 128)),
        compiler_params=pltpu.CompilerParams(
            dimension_semantics=("arbitrary",),
            vmem_limit_bytes=64 << 20),
        cost_estimate=pl.CostEstimate(flops=flops, transcendentals=0,
                                      bytes_accessed=bytes_accessed),
    )(*args)
    return out[:, :1]  # slice the single drag-coefficient column outside the kernel


# ---------------------------------------------------------------------------
# Glue: normalized adjacency, pooling matrix, parameters.
# ---------------------------------------------------------------------------
def build_norm_adj(edge_index, num_nodes):
    """Dense PyG-style GCN normalization: D^-1/2 (A + I) D^-1/2 (f32)."""
    src, dst = edge_index[0], edge_index[1]
    a = jnp.zeros((num_nodes, num_nodes), jnp.float32)
    a = a.at[dst, src].set(1.0)
    a = a + jnp.eye(num_nodes, dtype=jnp.float32)
    deg = a.sum(axis=1)
    dinv = jnp.where(deg > 0, deg ** -0.5, 0.0)
    return dinv[:, None] * a * dinv[None, :]


def build_pool_matrix(batch, num_graphs):
    onehot = (batch[None, :] == jnp.arange(num_graphs)[:, None]).astype(jnp.float32)
    counts = jnp.maximum(onehot.sum(axis=1, keepdims=True), 1.0)
    return onehot / counts  # (G, N): rows average nodes of each graph


def init_params(key):
    """Deterministic synthetic weights (stored as (in, out), f32)."""
    ks = jax.random.split(key, 10)
    return {
        "w1": jax.random.normal(ks[0], (3, 512), jnp.float32) * 0.05,
        "b1": jax.random.normal(ks[1], (512,), jnp.float32) * 0.01,
        "w2": jax.random.normal(ks[2], (512, 1024), jnp.float32) * 0.02,
        "b2": jax.random.normal(ks[3], (1024,), jnp.float32) * 0.01,
        "w3": jax.random.normal(ks[4], (1024, 512), jnp.float32) * 0.02,
        "b3": jax.random.normal(ks[5], (512,), jnp.float32) * 0.01,
        "wf1": jax.random.normal(ks[6], (512, 128), jnp.float32) * 0.02,
        "bf1": jax.random.normal(ks[7], (128,), jnp.float32) * 0.01,
        "wf2": jax.random.normal(ks[8], (128, 1), jnp.float32) * 0.02,
        "bf2": jax.random.normal(ks[9], (1,), jnp.float32) * 0.01,
    }


def prepare_params(p):
    """One-time prep: pad w1 to F_PAD rows, lane-pad fc2 to 128 cols, cast
    weights to bf16, reshape biases to (1, F) f32."""
    bf16 = jnp.bfloat16
    w1_pad = jnp.zeros((F_PAD, 512), jnp.float32).at[:3, :].set(p["w1"])
    wf2_pad = jnp.zeros((128, 128), jnp.float32).at[:, :1].set(p["wf2"])
    bf2_pad = jnp.zeros((1, 128), jnp.float32).at[0, 0].set(p["bf2"][0])
    return {
        "w1": w1_pad.astype(bf16), "b1": p["b1"].reshape(1, -1),
        "w2": p["w2"].astype(bf16), "b2": p["b2"].reshape(1, -1),
        "w3": p["w3"].astype(bf16), "b3": p["b3"].reshape(1, -1),
        "wf1": p["wf1"].astype(bf16), "bf1": p["bf1"].reshape(1, -1),
        "wf2": wf2_pad.astype(bf16), "bf2": bf2_pad,
    }


def draggnn_reference(x_pad, adj, pool, pp):
    """Pure-JAX f32 reference using the same bf16-quantized inputs/weights."""
    f = lambda a: a.astype(jnp.float32)
    h = jnp.maximum(f(adj) @ (f(x_pad) @ f(pp["w1"])) + pp["b1"], 0.0)
    h = jnp.maximum(f(adj) @ (h @ f(pp["w2"])) + pp["b2"], 0.0)
    h = jnp.maximum(f(adj) @ (h @ f(pp["w3"])) + pp["b3"], 0.0)
    g = f(pool) @ h
    g = jnp.maximum(g @ f(pp["wf1"]) + pp["bf1"], 0.0)
    return (g @ f(pp["wf2"]) + pp["bf2"])[:, :1]


if __name__ == "__main__":
    key = jax.random.PRNGKey(0)
    k_x, k_p = jax.random.split(key)

    # Small synthetic graph batch: 2 graphs x 8 nodes = 16 nodes, 3 features.
    N, F_IN, NODES_PER_GRAPH, G = 16, 3, 8, 2
    x = jax.random.normal(k_x, (N, F_IN), jnp.float32)

    src, dst = [], []
    for gi in range(G):
        base = gi * NODES_PER_GRAPH
        for i in range(NODES_PER_GRAPH):            # undirected ring per graph
            a = base + i
            b = base + (i + 1) % NODES_PER_GRAPH
            src += [a, b]
            dst += [b, a]
    edge_index = jnp.array([src, dst], dtype=jnp.int32)
    batch = jnp.array([gi for gi in range(G) for _ in range(NODES_PER_GRAPH)],
                      jnp.int32)

    # One-time input prep (normalize adj, pool matrix, pad features, cast bf16).
    adj = build_norm_adj(edge_index, N).astype(jnp.bfloat16)
    pool = build_pool_matrix(batch, G).astype(jnp.bfloat16)
    x_pad = jnp.zeros((N, F_PAD), jnp.float32).at[:, :F_IN].set(x).astype(jnp.bfloat16)
    params = prepare_params(init_params(k_p))

    fwd = jax.jit(draggnn_forward)
    out = jax.block_until_ready(fwd(x_pad, adj, pool, params))

    ref = draggnn_reference(x_pad, adj, pool, params)
    assert out.shape == (G, 1), out.shape
    # bf16 matmul operands (f32 accumulation) -> loosened tolerance vs f32 ref.
    assert jnp.allclose(out, ref, rtol=2e-2, atol=2e-2), (out, ref)

    print("KERNEL_OK")
</pallas_src>

<mosaic_0001>
module attributes {stable_mosaic.version = 11 : i64} {
  func.func @_fused_draggnn_kernel(%arg0: i32, %arg1: memref<16x16xbf16, #tpu.memory_space<vmem>>, %arg2: memref<16x8xbf16, #tpu.memory_space<vmem>>, %arg3: memref<2x16xbf16, #tpu.memory_space<vmem>>, %arg4: memref<8x512xbf16, #tpu.memory_space<vmem>>, %arg5: memref<1x512xf32, #tpu.memory_space<vmem>>, %arg6: memref<512x1024xbf16, #tpu.memory_space<vmem>>, %arg7: memref<1x1024xf32, #tpu.memory_space<vmem>>, %arg8: memref<1024x512xbf16, #tpu.memory_space<vmem>>, %arg9: memref<1x512xf32, #tpu.memory_space<vmem>>, %arg10: memref<512x128xbf16, #tpu.memory_space<vmem>>, %arg11: memref<1x128xf32, #tpu.memory_space<vmem>>, %arg12: memref<128x128xbf16, #tpu.memory_space<vmem>>, %arg13: memref<1x128xf32, #tpu.memory_space<vmem>>, %arg14: memref<2x128xf32, #tpu.memory_space<vmem>>) attributes {dimension_semantics = [#tpu.dimension_semantics<arbitrary>], iteration_bounds = array<i64: 1>, scalar_prefetch = 0 : i64, scratch_operands = 0 : i64, tpu.core_type = #tpu.core_type<tc>, window_params = [{pipeline_mode = #tpu.pipeline_mode<synchronous>, transform_indices = @transform_0, window_bounds = array<i64: 16, 16>}, {pipeline_mode = #tpu.pipeline_mode<synchronous>, transform_indices = @transform_1, window_bounds = array<i64: 16, 8>}, {pipeline_mode = #tpu.pipeline_mode<synchronous>, transform_indices = @transform_2, window_bounds = array<i64: 2, 16>}, {pipeline_mode = #tpu.pipeline_mode<synchronous>, transform_indices = @transform_3, window_bounds = array<i64: 8, 512>}, {pipeline_mode = #tpu.pipeline_mode<synchronous>, transform_indices = @transform_4, window_bounds = array<i64: 1, 512>}, {pipeline_mode = #tpu.pipeline_mode<synchronous>, transform_indices = @transform_5, window_bounds = array<i64: 512, 1024>}, {pipeline_mode = #tpu.pipeline_mode<synchronous>, transform_indices = @transform_6, window_bounds = array<i64: 1, 1024>}, {pipeline_mode = #tpu.pipeline_mode<synchronous>, transform_indices = @transform_7, window_bounds = array<i64: 1024, 512>}, {pipeline_mode = #tpu.pipeline_mode<synchronous>, transform_indices = @transform_8, window_bounds = array<i64: 1, 512>}, {pipeline_mode = #tpu.pipeline_mode<synchronous>, transform_indices = @transform_9, window_bounds = array<i64: 512, 128>}, {pipeline_mode = #tpu.pipeline_mode<synchronous>, transform_indices = @transform_10, window_bounds = array<i64: 1, 128>}, {pipeline_mode = #tpu.pipeline_mode<synchronous>, transform_indices = @transform_11, window_bounds = array<i64: 128, 128>}, {pipeline_mode = #tpu.pipeline_mode<synchronous>, transform_indices = @transform_12, window_bounds = array<i64: 1, 128>}, {pipeline_mode = #tpu.pipeline_mode<synchronous>, transform_indices = @transform_13, window_bounds = array<i64: 2, 128>}]} {
    %c0 = arith.constant 0 : index
    %c0_0 = arith.constant 0 : index
    %0 = vector.load %arg1[%c0, %c0_0] : memref<16x16xbf16, #tpu.memory_space<vmem>>, vector<16x16xbf16>
    %c0_1 = arith.constant 0 : index
    %c0_2 = arith.constant 0 : index
    %1 = vector.load %arg2[%c0_1, %c0_2] : memref<16x8xbf16, #tpu.memory_space<vmem>>, vector<16x8xbf16>
    %c0_3 = arith.constant 0 : index
    %c0_4 = arith.constant 0 : index
    %2 = vector.load %arg4[%c0_3, %c0_4] : memref<8x512xbf16, #tpu.memory_space<vmem>>, vector<8x512xbf16>
    %cst = arith.constant dense<0.000000e+00> : vector<16x512xf32>
    %3 = tpu.matmul %1, %2, %cst {dimension_numbers = #tpu.dot_dimension_numbers<[1], [0], [0], [1], [0, 0, 1, 1], [], []>} : vector<16x8xbf16>, vector<8x512xbf16>, vector<16x512xf32> -> vector<16x512xf32>
    %4 = arith.truncf %3 : vector<16x512xf32> to vector<16x512xbf16>
    %cst_5 = arith.constant dense<0.000000e+00> : vector<16x512xf32>
    %5 = tpu.matmul %0, %4, %cst_5 {dimension_numbers = #tpu.dot_dimension_numbers<[1], [0], [0], [1], [0, 0, 1, 1], [], []>} : vector<16x16xbf16>, vector<16x512xbf16>, vector<16x512xf32> -> vector<16x512xf32>
    %c0_6 = arith.constant 0 : index
    %c0_7 = arith.constant 0 : index
    %6 = vector.load %arg5[%c0_6, %c0_7] : memref<1x512xf32, #tpu.memory_space<vmem>>, vector<1x512xf32>
    %7 = vector.broadcast %6 : vector<1x512xf32> to vector<16x512xf32>
    %8 = arith.addf %5, %7 : vector<16x512xf32>
    %cst_8 = arith.constant 0.000000e+00 : f32
    %9 = vector.broadcast %cst_8 : f32 to vector<16x512xf32>
    %10 = arith.maximumf %8, %9 : vector<16x512xf32>
    %11 = arith.truncf %10 : vector<16x512xf32> to vector<16x512xbf16>
    %c0_9 = arith.constant 0 : index
    %c0_10 = arith.constant 0 : index
    %12 = vector.load %arg6[%c0_9, %c0_10] : memref<512x1024xbf16, #tpu.memory_space<vmem>>, vector<512x1024xbf16>
    %cst_11 = arith.constant dense<0.000000e+00> : vector<16x1024xf32>
    %13 = tpu.matmul %11, %12, %cst_11 {dimension_numbers = #tpu.dot_dimension_numbers<[1], [0], [0], [1], [0, 0, 1, 1], [], []>} : vector<16x512xbf16>, vector<512x1024xbf16>, vector<16x1024xf32> -> vector<16x1024xf32>
    %14 = arith.truncf %13 : vector<16x1024xf32> to vector<16x1024xbf16>
    %cst_12 = arith.constant dense<0.000000e+00> : vector<16x1024xf32>
    %15 = tpu.matmul %0, %14, %cst_12 {dimension_numbers = #tpu.dot_dimension_numbers<[1], [0], [0], [1], [0, 0, 1, 1], [], []>} : vector<16x16xbf16>, vector<16x1024xbf16>, vector<16x1024xf32> -> vector<16x1024xf32>
    %c0_13 = arith.constant 0 : index
    %c0_14 = arith.constant 0 : index
    %16 = vector.load %arg7[%c0_13, %c0_14] : memref<1x1024xf32, #tpu.memory_space<vmem>>, vector<1x1024xf32>
    %17 = vector.broadcast %16 : vector<1x1024xf32> to vector<16x1024xf32>
    %18 = arith.addf %15, %17 : vector<16x1024xf32>
    %cst_15 = arith.constant 0.000000e+00 : f32
    %19 = vector.broadcast %cst_15 : f32 to vector<16x1024xf32>
    %20 = arith.maximumf %18, %19 : vector<16x1024xf32>
    %21 = arith.truncf %20 : vector<16x1024xf32> to vector<16x1024xbf16>
    %c0_16 = arith.constant 0 : index
    %c0_17 = arith.constant 0 : index
    %22 = vector.load %arg8[%c0_16, %c0_17] : memref<1024x512xbf16, #tpu.memory_space<vmem>>, vector<1024x512xbf16>
    %cst_18 = arith.constant dense<0.000000e+00> : vector<16x512xf32>
    %23 = tpu.matmul %21, %22, %cst_18 {dimension_numbers = #tpu.dot_dimension_numbers<[1], [0], [0], [1], [0, 0, 1, 1], [], []>} : vector<16x1024xbf16>, vector<1024x512xbf16>, vector<16x512xf32> -> vector<16x512xf32>
    %24 = arith.truncf %23 : vector<16x512xf32> to vector<16x512xbf16>
    %cst_19 = arith.constant dense<0.000000e+00> : vector<16x512xf32>
    %25 = tpu.matmul %0, %24, %cst_19 {dimension_numbers = #tpu.dot_dimension_numbers<[1], [0], [0], [1], [0, 0, 1, 1], [], []>} : vector<16x16xbf16>, vector<16x512xbf16>, vector<16x512xf32> -> vector<16x512xf32>
    %c0_20 = arith.constant 0 : index
    %c0_21 = arith.constant 0 : index
    %26 = vector.load %arg9[%c0_20, %c0_21] : memref<1x512xf32, #tpu.memory_space<vmem>>, vector<1x512xf32>
    %27 = vector.broadcast %26 : vector<1x512xf32> to vector<16x512xf32>
    %28 = arith.addf %25, %27 : vector<16x512xf32>
    %cst_22 = arith.constant 0.000000e+00 : f32
    %29 = vector.broadcast %cst_22 : f32 to vector<16x512xf32>
    %30 = arith.maximumf %28, %29 : vector<16x512xf32>
    %31 = arith.truncf %30 : vector<16x512xf32> to vector<16x512xbf16>
    %c0_23 = arith.constant 0 : index
    %c0_24 = arith.constant 0 : index
    %32 = vector.load %arg3[%c0_23, %c0_24] : memref<2x16xbf16, #tpu.memory_space<vmem>>, vector<2x16xbf16>
    %cst_25 = arith.constant dense<0.000000e+00> : vector<2x512xf32>
    %33 = tpu.matmul %32, %31, %cst_25 {dimension_numbers = #tpu.dot_dimension_numbers<[1], [0], [0], [1], [0, 0, 1, 1], [], []>} : vector<2x16xbf16>, vector<16x512xbf16>, vector<2x512xf32> -> vector<2x512xf32>
    %34 = arith.truncf %33 : vector<2x512xf32> to vector<2x512xbf16>
    %c0_26 = arith.constant 0 : index
    %c0_27 = arith.constant 0 : index
    %35 = vector.load %arg10[%c0_26, %c0_27] : memref<512x128xbf16, #tpu.memory_space<vmem>>, vector<512x128xbf16>
    %cst_28 = arith.constant dense<0.000000e+00> : vector<2x128xf32>
    %36 = tpu.matmul %34, %35, %cst_28 {dimension_numbers = #tpu.dot_dimension_numbers<[1], [0], [0], [1], [0, 0, 1, 1], [], []>} : vector<2x512xbf16>, vector<512x128xbf16>, vector<2x128xf32> -> vector<2x128xf32>
    %c0_29 = arith.constant 0 : index
    %c0_30 = arith.constant 0 : index
    %37 = vector.load %arg11[%c0_29, %c0_30] : memref<1x128xf32, #tpu.memory_space<vmem>>, vector<1x128xf32>
    %38 = vector.broadcast %37 : vector<1x128xf32> to vector<2x128xf32>
    %39 = arith.addf %36, %38 : vector<2x128xf32>
    %cst_31 = arith.constant 0.000000e+00 : f32
    %40 = vector.broadcast %cst_31 : f32 to vector<2x128xf32>
    %41 = arith.maximumf %39, %40 : vector<2x128xf32>
    %42 = arith.truncf %41 : vector<2x128xf32> to vector<2x128xbf16>
    %c0_32 = arith.constant 0 : index
    %c0_33 = arith.constant 0 : index
    %43 = vector.load %arg12[%c0_32, %c0_33] : memref<128x128xbf16, #tpu.memory_space<vmem>>, vector<128x128xbf16>
    %cst_34 = arith.constant dense<0.000000e+00> : vector<2x128xf32>
    %44 = tpu.matmul %42, %43, %cst_34 {dimension_numbers = #tpu.dot_dimension_numbers<[1], [0], [0], [1], [0, 0, 1, 1], [], []>} : vector<2x128xbf16>, vector<128x128xbf16>, vector<2x128xf32> -> vector<2x128xf32>
    %c0_35 = arith.constant 0 : index
    %c0_36 = arith.constant 0 : index
    %45 = vector.load %arg13[%c0_35, %c0_36] : memref<1x128xf32, #tpu.memory_space<vmem>>, vector<1x128xf32>
    %46 = vector.broadcast %45 : vector<1x128xf32> to vector<2x128xf32>
    %47 = arith.addf %44, %46 : vector<2x128xf32>
    %c0_37 = arith.constant 0 : index
    %c0_38 = arith.constant 0 : index
    %48 = vector.load %arg14[%c0_37, %c0_38] : memref<2x128xf32, #tpu.memory_space<vmem>>, vector<2x128xf32>
    tpu.vector_store %arg14[%c0_37, %c0_38], %47 {strides = array<i32>} : memref<2x128xf32, #tpu.memory_space<vmem>>, vector<2x128xf32>,
    return
  }
  func.func @transform_0(%arg0: i32) -> (i32, i32) {
    %c0_i32 = arith.constant 0 : i32
    %c0_i32_0 = arith.constant 0 : i32
    %c0_i32_1 = arith.constant 0 : i32
    return %c0_i32, %c0_i32_0 : i32, i32
  }
  func.func @transform_1(%arg0: i32) -> (i32, i32) {
    %c0_i32 = arith.constant 0 : i32
    %c0_i32_0 = arith.constant 0 : i32
    %c0_i32_1 = arith.constant 0 : i32
    return %c0_i32, %c0_i32_0 : i32, i32
  }
  func.func @transform_2(%arg0: i32) -> (i32, i32) {
    %c0_i32 = arith.constant 0 : i32
    %c0_i32_0 = arith.constant 0 : i32
    %c0_i32_1 = arith.constant 0 : i32
    return %c0_i32, %c0_i32_0 : i32, i32
  }
  func.func @transform_3(%arg0: i32) -> (i32, i32) {
    %c0_i32 = arith.constant 0 : i32
    %c0_i32_0 = arith.constant 0 : i32
    %c0_i32_1 = arith.constant 0 : i32
    return %c0_i32, %c0_i32_0 : i32, i32
  }
  func.func @transform_4(%arg0: i32) -> (i32, i32) {
    %c0_i32 = arith.constant 0 : i32
    %c0_i32_0 = arith.constant 0 : i32
    %c0_i32_1 = arith.constant 0 : i32
    return %c0_i32, %c0_i32_0 : i32, i32
  }
  func.func @transform_5(%arg0: i32) -> (i32, i32) {
    %c0_i32 = arith.constant 0 : i32
    %c0_i32_0 = arith.constant 0 : i32
    %c0_i32_1 = arith.constant 0 : i32
    return %c0_i32, %c0_i32_0 : i32, i32
  }
  func.func @transform_6(%arg0: i32) -> (i32, i32) {
    %c0_i32 = arith.constant 0 : i32
    %c0_i32_0 = arith.constant 0 : i32
    %c0_i32_1 = arith.constant 0 : i32
    return %c0_i32, %c0_i32_0 : i32, i32
  }
  func.func @transform_7(%arg0: i32) -> (i32, i32) {
    %c0_i32 = arith.constant 0 : i32
    %c0_i32_0 = arith.constant 0 : i32
    %c0_i32_1 = arith.constant 0 : i32
    return %c0_i32, %c0_i32_0 : i32, i32
  }
  func.func @transform_8(%arg0: i32) -> (i32, i32) {
    %c0_i32 = arith.constant 0 : i32
    %c0_i32_0 = arith.constant 0 : i32
    %c0_i32_1 = arith.constant 0 : i32
    return %c0_i32, %c0_i32_0 : i32, i32
  }
  func.func @transform_9(%arg0: i32) -> (i32, i32) {
    %c0_i32 = arith.constant 0 : i32
    %c0_i32_0 = arith.constant 0 : i32
    %c0_i32_1 = arith.constant 0 : i32
    return %c0_i32, %c0_i32_0 : i32, i32
  }
  func.func @transform_10(%arg0: i32) -> (i32, i32) {
    %c0_i32 = arith.constant 0 : i32
    %c0_i32_0 = arith.constant 0 : i32
    %c0_i32_1 = arith.constant 0 : i32
    return %c0_i32, %c0_i32_0 : i32, i32
  }
  func.func @transform_11(%arg0: i32) -> (i32, i32) {
    %c0_i32 = arith.constant 0 : i32
    %c0_i32_0 = arith.constant 0 : i32
    %c0_i32_1 = arith.constant 0 : i32
    return %c0_i32, %c0_i32_0 : i32, i32
  }
  func.func @transform_12(%arg0: i32) -> (i32, i32) {
    %c0_i32 = arith.constant 0 : i32
    %c0_i32_0 = arith.constant 0 : i32
    %c0_i32_1 = arith.constant 0 : i32
    return %c0_i32, %c0_i32_0 : i32, i32
  }
  func.func @transform_13(%arg0: i32) -> (i32, i32) {
    %c0_i32 = arith.constant 0 : i32
    %c0_i32_0 = arith.constant 0 : i32
    %c0_i32_1 = arith.constant 0 : i32
    return %c0_i32, %c0_i32_0 : i32, i32
  }
}

</mosaic_0001>

<bundles_post_ra>
// kernel: draggnn_forward.1
= control target key start
LH: loop header
LB: loop body
LE: loop exit
PB: predicated region body
PF: predicated region fallthrough
CT: control target
= control target key end

     0   :  { %18 = vsyncpa [#allocation3], 0  ;;  %s8381_s0 = inlined_call_operand.hbm [shape: bf16[16,16], index: 0, kind: input, shape index: {}]   ;;  %s8382_s1 = inlined_call_operand.vmem [shape: bf16[16,8], index: 1, kind: input, shape index: {}]   ;;  %s8383_s2 = inlined_call_operand.vmem [shape: bf16[2,16], index: 2, kind: input, shape index: {}]   ;;  %s8384_s3 = inlined_call_operand.vmem [shape: bf16[8,512], index: 3, kind: input, shape index: {}]   ;;  %s8385_s4 = inlined_call_operand.hbm [shape: f32[1,512], index: 4, kind: input, shape index: {}]   ;;  %s8386_s5 = inlined_call_operand.hbm [shape: bf16[512,1024], index: 5, kind: input, shape index: {}]   ;;  %s8387_s6 = inlined_call_operand.hbm [shape: f32[1,1024], index: 6, kind: input, shape index: {}]   ;;  %s8388_s7 = inlined_call_operand.hbm [shape: bf16[1024,512], index: 7, kind: input, shape index: {}]   ;;  %s8389_s8 = inlined_call_operand.hbm [shape: f32[1,512], index: 8, kind: input, shape index: {}]   ;;  %s8390_s9 = inlined_call_operand.hbm [shape: bf16[512,128], index: 9, kind: input, shape index: {}]   ;;  %s8391_s10 = inlined_call_operand.vmem [shape: f32[1,128], index: 10, kind: input, shape index: {}]   ;;  %s8392_s11 = inlined_call_operand.hbm [shape: bf16[128,128], index: 11, kind: input, shape index: {}]   ;;  %s8393_s12 = inlined_call_operand.vmem [shape: f32[1,128], index: 12, kind: input, shape index: {}]   ;;  %s8394_s13 = inlined_call_operand.vmem [shape: f32[2,128], index: 13, kind: output, shape index: {}]  }
   0x1   :  { %19 = vsyncpa [#allocation5], 0 }
   0x2   :  { %20 = vsyncpa [#allocation8], 0 }
   0x3   :  { %21 = vsyncpa [#allocation11], 0  ;;  %s47_s27 = sshll.u32 %s8385_s4, 4  ;;  %s48_s27 = int_to_ptr.hbm [resolvable:$true] %s47_s27 }
   0x4   :  { %22 = vsyncpa [#allocation14], 0  ;;  %s8041_s28 = smov [#allocation4]   ;;  %s71_s15 = sshll.u32 %s8387_s6, 4  ;;  %s72_s15 = int_to_ptr.hbm [resolvable:$true] %s71_s15 }
   0x5   :  { %s49_s29 = sshll.u32 %s8041_s28, 4  ;;  %s8042_s16 = smov [#allocation7]   ;;  %s50_s29 = int_to_ptr.vmem [resolvable:$true] %s49_s29 }
   0x6   :  { %52 = dma.hbm_to_vmem [thread:$0]  %s48_s27, 64, %s50_s29, [#allocation5]  }
   0x7   :  { %s73_s17 = sshll.u32 %s8042_s16, 4  ;;  %s95_s20 = sshll.u32 %s8389_s8, 4  ;;  %s74_s17 = int_to_ptr.vmem [resolvable:$true] %s73_s17  ;;  %s96_s20 = int_to_ptr.hbm [resolvable:$true] %s95_s20 }
   0x8   :  { %76 = dma.hbm_to_vmem [thread:$0]  %s72_s15, 128, %s74_s17, [#allocation8]  }
   0x9   :  { %s27_s22 = sshll.u32 %s8381_s0, 4  ;;  %s8043_s23 = smov [#allocation10]   ;;  %s28_s22 = int_to_ptr.hbm [resolvable:$true] %s27_s22 }
   0xa   :  { %s97_s24 = sshll.u32 %s8043_s23, 4  ;;  %s8044_s6 = smov [#allocation2]   ;;  %s98_s24 = int_to_ptr.vmem [resolvable:$true] %s97_s24 }
   0xb   :  { %100 = dma.hbm_to_vmem [thread:$0]  %s96_s20, 64, %s98_s24, [#allocation11]  }
   0xc   :  { %s29_s25 = sshll.u32 %s8044_s6, 4  ;;  %s8045_s26 = smov 64   ;;  %s30_s25 = int_to_ptr.vmem [resolvable:$true] %s29_s25 }
   0xd   :  { %s8046_s27 = smov 4   ;;  %s57_s29 = sshll.u32 %s8386_s5, 4  ;;  %s58_s29 = int_to_ptr.hbm [resolvable:$true] %s57_s29 }
   0xe   :  { %35 = dma.hbm_to_vmem [thread:$0]  %s28_s22, 128, %s30_s25, [#allocation3], %s8045_s26, %s8045_s26, %s8046_s27  }
   0xf   :  { %s8047_s0 = smov [#allocation6]   ;;  %s81_s16 = sshll.u32 %s8388_s7, 4  ;;  %s82_s16 = int_to_ptr.hbm [resolvable:$true] %s81_s16 }
  0x10   :  { %s59_s30 = sshll.u32 %s8047_s0, 4  ;;  %s8048_s17 = smov 512   ;;  %s60_s30 = int_to_ptr.vmem [resolvable:$true] %s59_s30 }
  0x11   :  { %s8049_s18 = smov 32   ;;  %s8050_s19 = smov [#allocation9]  }
  0x12   :  { %65 = dma.hbm_to_vmem [thread:$0]  %s58_s29, 32768, %s60_s30, [#allocation5], %s8048_s17, %s8048_s17, %s8049_s18  }
  0x13   :  { %s83_s20 = sshll.u32 %s8050_s19, 4  ;;  %s8051_s4 = smov 256   ;;  %s84_s20 = int_to_ptr.vmem [resolvable:$true] %s83_s20 }
  0x14   :  { %s8052_s21 = smov 16   ;;  %s105_s23 = sshll.u32 %s8390_s9, 4  ;;  %s106_s23 = int_to_ptr.hbm [resolvable:$true] %s105_s23 }
  0x15   :  { %89 = dma.hbm_to_vmem [thread:$0]  %s82_s16, 32768, %s84_s20, [#allocation8], %s8051_s4, %s8051_s4, %s8052_s21  }
  0x16   :  { %s8053_s24 = smov [#allocation12]   ;;  %s120_s8 = sshll.u32 %s8392_s11, 4  ;;  %s121_s8 = int_to_ptr.hbm [resolvable:$true] %s120_s8 }
  0x17   :  { %s107_s6 = sshll.u32 %s8053_s24, 4  ;;  %s8054_s28 = smov [#allocation13]   ;;  %s108_s6 = int_to_ptr.vmem [resolvable:$true] %s107_s6 }
  0x18   :  { %113 = dma.hbm_to_vmem [thread:$0]  %s106_s23, 4096, %s108_s6, [#allocation11], %s8045_s26, %s8045_s26, %s8046_s27  }
  0x19   :  { %s122_s29 = sshll.u32 %s8054_s28, 4  ;;  %s123_s29 = int_to_ptr.vmem [resolvable:$true] %s122_s29 }
  0x1a   :  { %128 = dma.hbm_to_vmem [thread:$0]  %s121_s8, 1024, %s123_s29, [#allocation14], %s8045_s26, %s8045_s26, %s8046_s27  }
  0x1b   :  { %8031 = dma.done.wait [#allocation3], 128  }
  0x1c   :  { %8032 = vsyncadd [#allocation3], 4294967168 }
  0x1d   :  { %8033 = dma.done.wait [#allocation5], 32832  }
  0x1e   :  { %8034 = vsyncadd [#allocation5], 4294934464 }
  0x1f   :  { %8035 = dma.done.wait [#allocation8], 32896  }
  0x20   :  { %8036 = vsyncadd [#allocation8], 4294934400 }
  0x21   :  { %8037 = dma.done.wait [#allocation11], 4160  }
  0x22   :  { %8038 = vsyncadd [#allocation11], 4294963136 }
  0x23   :  { %8039 = dma.done.wait [#allocation14], 1024  }
  0x24   :  { %8040 = vsyncadd [#allocation14], 4294966272  ;;  %v168_v0 = vld [vmem:[%s8384_s3] sm:$0xff]  ;;  %v169_v1 = vld [vmem:[%s8384_s3 + $0x8] sm:$0xff]  ;;  %vm189_vm0 = vcmask 1043456   ;;  %vm185_vm1 = vcmask 64512  }
  0x25   :  { %v177_v2 = vunpack.c.l.b16 %v168_v0  ;;  %v179_v3 = vunpack.c.l.b16 %v169_v1  ;;  %v180_v4 = vunpack.c.h.b16 %v169_v1  ;;  %v178_v5 = vunpack.c.h.b16 %v168_v0  ;;  %v7267_v13 = vld [vmem:[%s8382_s1] sm:$0xff]  ;;  %v5268_v16 = vld [vmem:[#allocation6 + $0x1c0] sm:$0xf]  ;;  %v8167_v25 = vld [vmem:[#allocation2] sm:$0xff] }
  0x26   :  { %v7328_v17 = vld [vmem:[#allocation6 + $0x1dc] sm:$0xf0]  ;;  %vm277_vm2 = vcmask 130048  }
  0x27   :  { %v181_v6 = vpack.c.b16 %v177_v2, %v177_v2  ;;  %v183_v7 = vpack.c.b16 %v179_v3, %v179_v3  ;;  %v184_v8 = vpack.c.b16 %v180_v4, %v180_v4  ;;  %v182_v9 = vpack.c.b16 %v178_v5, %v178_v5  ;;  %v5236_v23 = vld [vmem:[#allocation6 + $0x180] sm:$0xf] }
  0x28   :  { %v5269_v21 = vor.u32 %v7328_v17, %v5268_v16  ;;  %v7320_v24 = vld [vmem:[#allocation6 + $0x19c] sm:$0xf0] }
  0x29   :  { %v191_v10 = vsel %vm189_vm0, %v181_v6, 0  ;;  %v197_v11 = vsel %vm189_vm0, %v183_v7, 0  ;;  %v200_v12 = vsel %vm189_vm0, %v184_v8, 0  ;;  %v194_v14 = vsel %vm189_vm0, %v182_v9, 0  ;;  %v5780_v26 = vld [vmem:[#allocation6 + $0x5c0] sm:$0xf] }
  0x2a   :  { %209 = vmatpush.bf16.msra.mxu1 %v191_v10  ;;  %237 = vmatpush.bf16.msra.mxu2 %v197_v11  ;;  %v7456_v27 = vld [vmem:[#allocation6 + $0x5dc] sm:$0xf0]  ;;  %v5237_v28 = vor.u32 %v7320_v24, %v5236_v23 }
  0x2b   :  { %251 = vmatpush.bf16.msra.mxu3 %v200_v12  ;;  %v6036_v29 = vld [vmem:[#allocation6 + $0x7c0] sm:$0xf]  ;;  %v5781_v34 = vor.u32 %v7456_v27, %v5780_v26 }
  0x2c   :  { %v7520_v30 = vld [vmem:[#allocation6 + $0x7dc] sm:$0xf0] }
  0x2d   :  { %5030 = vmatmul.msk.bf16.vlgmr.msra.gmra.mxu1 %vm185_vm1, %v7267_v13  ;;  %5032 = vmatmul.msk.bf16.vlgmr.msra.gmra.mxu2 %vm185_vm1, %v7267_v13  ;;  %v5204_v31 = vld [vmem:[#allocation6 + $0x140] sm:$0xf]  ;;  %v6037_v37 = vor.u32 %v7520_v30, %v6036_v29 }
  0x2e   :  { %223 = vmatpush.bf16.msrb.mxu1 %v194_v14  ;;  %5033 = vmatmul.msk.bf16.vlgmr.msra.gmra.mxu3 %vm185_vm1, %v7267_v13  ;;  %v7312_v32 = vld [vmem:[#allocation6 + $0x15c] sm:$0xf0] }
  0x2f   :  { %v5748_v38 = vld [vmem:[#allocation6 + $0x580] sm:$0xf]  ;;  %v5205_v42 = vor.u32 %v7312_v32, %v5204_v31 }
  0x30   :  { %v7448_v39 = vld [vmem:[#allocation6 + $0x59c] sm:$0xf0] }
  0x31   :  { %v6004_v43 = vld [vmem:[#allocation6 + $0x780] sm:$0xf]  ;;  %v5749_v47 = vor.u32 %v7448_v39, %v5748_v38 }
  0x32   :  { %v7512_v44 = vld [vmem:[#allocation6 + $0x79c] sm:$0xf0] }
  0x33   :  { %v5172_v45 = vld [vmem:[#allocation6 + $0x100] sm:$0xf]  ;;  %v6005_v48 = vor.u32 %v7512_v44, %v6004_v43 }
  0x34   :  { %v7304_v46 = vld [vmem:[#allocation6 + $0x11c] sm:$0xf0] }
  0x35   :  { %v5716_v49 = vld [vmem:[#allocation6 + $0x540] sm:$0xf]  ;;  %v5173_v51 = vor.u32 %v7304_v46, %v5172_v45  ;;  %v7316_v45 = vld [vmem:[#allocation6 + $0x184] sm:$0xf] }
  0x36   :  { %v7440_v50 = vld [vmem:[#allocation6 + $0x55c] sm:$0xf0]  ;;  %v5238_v46 = vld [vmem:[#allocation6 + $0x1a0] sm:$0xf0] }
  0x37   :  { %v5140_v52 = vld [vmem:[#allocation6 + $0xc0] sm:$0xf]  ;;  %v5717_v58 = vor.u32 %v7440_v50, %v5716_v49 }
  0x38   :  { %v5972_v53 = vld [vmem:[#allocation6 + $0x740] sm:$0xf] }
  0x39   :  { %v7504_v54 = vld [vmem:[#allocation6 + $0x75c] sm:$0xf0] }
  0x3a   :  { %v7296_v55 = vld [vmem:[#allocation6 + $0xdc] sm:$0xf0]  ;;  %v5973_v59 = vor.u32 %v7504_v54, %v5972_v53 }
  0x3b   :  { %v5524_v56 = vld [vmem:[#allocation6 + $0x3c0] sm:$0xf]  ;;  %v5141_v63 = vor.u32 %v7296_v55, %v5140_v52  ;;  %v7452_v55 = vld [vmem:[#allocation6 + $0x5c4] sm:$0xf] }
  0x3c   :  { %v7392_v57 = vld [vmem:[#allocation6 + $0x3dc] sm:$0xf0] }
  0x3d   :  { %5031 = vmatmul.msk.bf16.vlgmr.msrb.gmra.mxu1 %vm185_vm1, %v7267_v13  ;;  %v5684_v60 = vld [vmem:[#allocation6 + $0x500] sm:$0xf]  ;;  %v5525_v0 = vor.u32 %v7392_v57, %v5524_v56  ;;  %v5782_v56 = vld [vmem:[#allocation6 + $0x5e0] sm:$0xf0]  ;;  %v5241_v57 = vor.u32 %v7316_v45, %v5238_v46 }
  0x3e   :  { %v7432_v61 = vld [vmem:[#allocation6 + $0x51c] sm:$0xf0] }
  0x3f   :  { %v5108_v1 = vld [vmem:[#allocation6 + $0x80] sm:$0xf]  ;;  %v5685_v8 = vor.u32 %v7432_v61, %v5684_v60  ;;  %v6038_v60 = vld [vmem:[#allocation6 + $0x7e0] sm:$0xf0] }
  0x40   :  { %v5940_v2 = vld [vmem:[#allocation6 + $0x700] sm:$0xf]  ;;  %v7308_v61 = vld [vmem:[#allocation6 + $0x144] sm:$0xf] }
  0x41   :  { %v7496_v3 = vld [vmem:[#allocation6 + $0x71c] sm:$0xf0] }
  0x42   :  { %v7288_v5 = vld [vmem:[#allocation6 + $0x9c] sm:$0xf0]  ;;  %v5941_v9 = vor.u32 %v7496_v3, %v5940_v2 }
  0x43   :  { %v5492_v6 = vld [vmem:[#allocation6 + $0x380] sm:$0xf]  ;;  %v5109_v12 = vor.u32 %v7288_v5, %v5108_v1  ;;  %v5785_v1 = vor.u32 %v7452_v55, %v5782_v56  ;;  %v7420_v55 = vld [vmem:[#allocation6 + $0x4c4] sm:$0xf] }
  0x44   :  { %v7384_v7 = vld [vmem:[#allocation6 + $0x39c] sm:$0xf0] }
  0x45   :  { %v5652_v10 = vld [vmem:[#allocation6 + $0x4c0] sm:$0xf]  ;;  %v5493_v13 = vor.u32 %v7384_v7, %v5492_v6  ;;  %v7300_v7 = vld [vmem:[#allocation6 + $0x104] sm:$0xf] }
  0x46   :  { %v7424_v11 = vld [vmem:[#allocation6 + $0x4dc] sm:$0xf0] }
  0x47   :  { %v5076_v14 = vld [vmem:[#allocation6 + $0x40] sm:$0xf] }
  0x48   :  { %v7488_v16 = vld [vmem:[#allocation6 + $0x6dc] sm:$0xf0] }
  0x49   :  { %v7280_v17 = vld [vmem:[#allocation6 + $0x5c] sm:$0xf0] }
  0x4a   :  { %v7416_v23 = vld [vmem:[#allocation6 + $0x49c] sm:$0xf0]  ;;  %v5077_v24 = vor.u32 %v7280_v17, %v5076_v14  ;;  %v7292_v14 = vld [vmem:[#allocation6 + $0xc4] sm:$0xf] }
  0x4b   :  { %v5044_v27 = vld [vmem:[#allocation6] sm:$0xf] }
  0x4c   :  { %v7480_v29 = vld [vmem:[#allocation6 + $0x69c] sm:$0xf0] }
  0x4d   :  { %v7272_v30 = vld [vmem:[#allocation6 + $0x1c] sm:$0xf0] }
  0x4e   :  { %v5428_v31 = vld [vmem:[#allocation6 + $0x300] sm:$0xf]  ;;  %v5045_v38 = vor.u32 %v7272_v30, %v5044_v27  ;;  %v7284_v27 = vld [vmem:[#allocation6 + $0x84] sm:$0xf] }
  0x4f   :  { %v7368_v32 = vld [vmem:[#allocation6 + $0x31c] sm:$0xf0] }
  0x50   :  { %v5429_v39 = vor.u32 %v7368_v32, %v5428_v31  ;;  %v5396_v43 = vld [vmem:[#allocation6 + $0x2c0] sm:$0xf]  ;;  %v5494_v31 = vld [vmem:[#allocation6 + $0x3a0] sm:$0xf0] }
  0x51   :  { %v7360_v44 = vld [vmem:[#allocation6 + $0x2dc] sm:$0xf0]  ;;  %v7436_v32 = vld [vmem:[#allocation6 + $0x544] sm:$0xf] }
  0x52   :  { %v5556_v50 = vld [vmem:[#allocation6 + $0x400] sm:$0xf]  ;;  %v5397_v53 = vor.u32 %v7360_v44, %v5396_v43  ;;  %v7428_v43 = vld [vmem:[#allocation6 + $0x504] sm:$0xf] }
  0x53   :  { %v5812_v52 = vld [vmem:[#allocation6 + $0x600] sm:$0xf]  ;;  %v5686_v44 = vld [vmem:[#allocation6 + $0x520] sm:$0xf0] }
  0x54   :  { %v7464_v54 = vld [vmem:[#allocation6 + $0x61c] sm:$0xf0]  ;;  %v5689_v46 = vor.u32 %v7428_v43, %v5686_v44  ;;  %v7321_v43 = vld [vmem:[#allocation6 + $0x1a4] sm:$0xf0] }
  0x55   :  { %v5332_v5 = vld [vmem:[#allocation6 + $0x240] sm:$0xf] }
  0x56   :  { %v7344_v6 = vld [vmem:[#allocation6 + $0x25c] sm:$0xf0] }
  0xaa   :  { %v211_v15 = vpop.f32.mrf.mxu1 }
  0xb0   :  { %v239_v18 = vpop.f32.mrf.mxu2 }
  0xb1   :  { %v253_v19 = vpop.f32.mrf.mxu3 }
  0xb2   :  { %v213_v20 = vpop.f32.mrf.mxu1 }
  0xb3   :  { %v258_v22 = vpack.c.bf16 %v213_v20, %v211_v15  ;;  %v5908_v15 = vld [vmem:[#allocation6 + $0x6c0] sm:$0xf]  ;;  %v5653_v20 = vor.u32 %v7424_v11, %v5652_v10 }
  0xb4   :  { %v5300_v11 = vld [vmem:[#allocation6 + $0x200] sm:$0xf] }
  0xb5   :  { %288 = vmatpush.bf16.msra.mxu0 %v258_v22  ;;  %v5620_v22 = vld [vmem:[#allocation6 + $0x480] sm:$0xf] }
  0xb8   :  { %v241_v33 = vpop.f32.mrf.mxu2  ;;  %5038 = vmatmul.msk.bf16.vlgmr.msra.gmra.mxu0 %vm277_vm2, %v8167_v25 }
  0xb9   :  { %1885 = vmatpush.bf16.msrb.mxu0 %v5269_v21  ;;  %v255_v35 = vpop.f32.mrf.mxu3  ;;  %v260_v36 = vpack.c.bf16 %v241_v33, %v239_v18  ;;  %v5460_v18 = vld [vmem:[#allocation6 + $0x340] sm:$0xf]  ;;  %v5909_v21 = vor.u32 %v7488_v16, %v5908_v15  ;;  %v7324_v33 = vld [vmem:[#allocation6 + $0x1c4] sm:$0xf] }
  0xba   :  { %v225_v40 = vpop.f32.mrf.mxu1  ;;  %v261_v41 = vpack.c.bf16 %v255_v35, %v253_v19  ;;  %v7376_v19 = vld [vmem:[#allocation6 + $0x35c] sm:$0xf0]  ;;  %v5142_v15 = vld [vmem:[#allocation6 + $0xe0] sm:$0xf0] }
  0xbb   :  { %316 = vmatpush.bf16.msrb.mxu2 %v260_v36  ;;  %v5461_v26 = vor.u32 %v7376_v19, %v5460_v18  ;;  %v5588_v36 = vld [vmem:[#allocation6 + $0x440] sm:$0xf]  ;;  %v7388_v16 = vld [vmem:[#allocation6 + $0x3c4] sm:$0xf]  ;;  %v5145_v17 = vor.u32 %v7292_v14, %v5142_v15 }
  0xbc   :  { %330 = vmatpush.bf16.msrb.mxu3 %v261_v41  ;;  %v7472_v41 = vld [vmem:[#allocation6 + $0x65c] sm:$0xf0]  ;;  %v5526_v18 = vld [vmem:[#allocation6 + $0x3e0] sm:$0xf0] }
  0xbd   :  { %1886 = vmatpush.bf16.msrb.mxu0 %v5237_v28  ;;  %v5876_v28 = vld [vmem:[#allocation6 + $0x680] sm:$0xf]  ;;  %v7444_v19 = vld [vmem:[#allocation6 + $0x584] sm:$0xf] }
  0xbe   :  { %5040 = vmatmul.msk.bf16.vlgmr.msrb.gmra.mxu2 %vm277_vm2, %v8167_v25  ;;  %v5877_v35 = vor.u32 %v7480_v29, %v5876_v28  ;;  %v5110_v28 = vld [vmem:[#allocation6 + $0xa0] sm:$0xf0] }
  0xbf   :  { %1913 = vmatpush.bf16.msra.mxu2 %v5781_v34  ;;  %5041 = vmatmul.msk.bf16.vlgmr.msrb.gmra.mxu3 %vm277_vm2, %v8167_v25  ;;  %v5270_v34 = vld [vmem:[#allocation6 + $0x1e0] sm:$0xf0]  ;;  %v5113_v30 = vor.u32 %v7284_v27, %v5110_v28  ;;  %v262_v28 = vld [vmem:[#allocation4] sm:$0xf] }
  0xc0   :  { %1927 = vmatpush.bf16.msra.mxu3 %v6037_v37  ;;  %v7408_v37 = vld [vmem:[#allocation6 + $0x45c] sm:$0xf0]  ;;  %v7380_v29 = vld [vmem:[#allocation6 + $0x384] sm:$0xf]  ;;  %v266_v44 = vperm.slane %v262_v28, 2 }
  0xc1   :  { %1887 = vmatpush.bf16.msrb.mxu0 %v5205_v42  ;;  %v5273_v42 = vor.u32 %v7324_v33, %v5270_v34  ;;  %v5718_v33 = vld [vmem:[#allocation6 + $0x560] sm:$0xf0]  ;;  %v5497_v34 = vor.u32 %v7380_v29, %v5494_v31  ;;  %v264_v31 = vperm.slane %v262_v28, 0 }
  0xc2   :  { %v227_v62 = vpop.f32.mrf.mxu1  ;;  %v5302_v27 = vld [vmem:[#allocation6 + $0x220] sm:$0xf0] }
  0xc3   :  { %1914 = vmatpush.bf16.msra.mxu2 %v5749_v47  ;;  %v259_v4 = vpack.c.bf16 %v227_v62, %v225_v40  ;;  %v5844_v40 = vld [vmem:[#allocation6 + $0x640] sm:$0xf]  ;;  %v5589_v47 = vor.u32 %v7408_v37, %v5588_v36  ;;  %v5206_v62 = vld [vmem:[#allocation6 + $0x160] sm:$0xf0] }
  0xc4   :  { %1928 = vmatpush.bf16.msra.mxu3 %v6005_v48  ;;  %v5364_v48 = vld [vmem:[#allocation6 + $0x280] sm:$0xf]  ;;  %v5845_v49 = vor.u32 %v7472_v41, %v5844_v40  ;;  %v5974_v36 = vld [vmem:[#allocation6 + $0x760] sm:$0xf0] }
  0xc5   :  { %1888 = vmatpush.bf16.msrb.mxu0 %v5173_v51  ;;  %302 = vmatpush.bf16.msra.mxu1 %v259_v4  ;;  %v7400_v51 = vld [vmem:[#allocation6 + $0x41c] sm:$0xf0]  ;;  %v5209_v4 = vor.u32 %v7308_v61, %v5206_v62  ;;  %v7372_v40 = vld [vmem:[#allocation6 + $0x344] sm:$0xf] }
  0xc6   :  { %v7356_v62 = vld [vmem:[#allocation6 + $0x2c4] sm:$0xf] }
  0xc7   :  { %1915 = vmatpush.bf16.msra.mxu2 %v5717_v58  ;;  %v7352_v58 = vld [vmem:[#allocation6 + $0x29c] sm:$0xf0] }
  0xc8   :  { %1929 = vmatpush.bf16.msra.mxu3 %v5973_v59  ;;  %5039 = vmatmul.msk.bf16.vlgmr.msra.gmra.mxu1 %vm277_vm2, %v8167_v25  ;;  %v5621_v25 = vor.u32 %v7416_v23, %v5620_v22  ;;  %v7516_v59 = vld [vmem:[#allocation6 + $0x7c4] sm:$0xf]  ;;  %v5365_v2 = vor.u32 %v7352_v58, %v5364_v48 }
  0xc9   :  { %1889 = vmatpush.bf16.msrb.mxu0 %v5141_v63  ;;  %1899 = vmatpush.bf16.msrb.mxu1 %v5525_v0  ;;  %v5557_v63 = vor.u32 %v7400_v51, %v5556_v50  ;;  %v5813_v0 = vor.u32 %v7464_v54, %v5812_v52  ;;  %v6041_v3 = vor.u32 %v7516_v59, %v6038_v60  ;;  %v7508_v23 = vld [vmem:[#allocation6 + $0x784] sm:$0xf] }
  0xca   :  { %v5942_v48 = vld [vmem:[#allocation6 + $0x720] sm:$0xf0] }
  0xcb   :  { %1916 = vmatpush.bf16.msra.mxu2 %v5685_v8  ;;  %v5174_v8 = vld [vmem:[#allocation6 + $0x120] sm:$0xf0] }
  0xcc   :  { %1930 = vmatpush.bf16.msra.mxu3 %v5941_v9  ;;  %v5333_v9 = vor.u32 %v7344_v6, %v5332_v5  ;;  %v5177_v10 = vor.u32 %v7300_v7, %v5174_v8  ;;  %v7268_v50 = vld [vmem:[#allocation6 + $0x4] sm:$0xf] }
  0xcd   :  { %1890 = vmatpush.bf16.msrb.mxu0 %v5109_v12  ;;  %1900 = vmatpush.bf16.msrb.mxu1 %v5493_v13  ;;  %v7336_v12 = vld [vmem:[#allocation6 + $0x21c] sm:$0xf0]  ;;  %v5046_v51 = vld [vmem:[#allocation6 + $0x20] sm:$0xf0] }
  0xce   :  { %v5301_v13 = vor.u32 %v7336_v12, %v5300_v11  ;;  %v5049_v52 = vor.u32 %v7268_v50, %v5046_v51  ;;  %v5430_v54 = vld [vmem:[#allocation6 + $0x320] sm:$0xf0]  ;;  %v265_v51 = vperm.slane %v262_v28, 1 }
  0xcf   :  { %1917 = vmatpush.bf16.msra.mxu2 %v5653_v20  ;;  %v5750_v20 = vld [vmem:[#allocation6 + $0x5a0] sm:$0xf0] }
  0xd0   :  { %1931 = vmatpush.bf16.msra.mxu3 %v5909_v21  ;;  %v5529_v21 = vor.u32 %v7388_v16, %v5526_v18  ;;  %v5753_v22 = vor.u32 %v7444_v19, %v5750_v20  ;;  %v7484_v58 = vld [vmem:[#allocation6 + $0x6c4] sm:$0xf] }
  0xd1   :  { %1891 = vmatpush.bf16.msrb.mxu0 %v5077_v24  ;;  %1901 = vmatpush.bf16.msrb.mxu1 %v5461_v26  ;;  %v6006_v24 = vld [vmem:[#allocation6 + $0x7a0] sm:$0xf0] }
  0xd2   :  { %v6009_v26 = vor.u32 %v7508_v23, %v6006_v24  ;;  %v5910_v60 = vld [vmem:[#allocation6 + $0x6e0] sm:$0xf0] }
  0xd3   :  { %1918 = vmatpush.bf16.msra.mxu2 %v5621_v25  ;;  %v5721_v25 = vor.u32 %v7436_v32, %v5718_v33  ;;  %v5913_v61 = vor.u32 %v7484_v58, %v5910_v60  ;;  %v5878_v5 = vld [vmem:[#allocation6 + $0x6a0] sm:$0xf0]  ;;  %v7305_v58 = vld [vmem:[#allocation6 + $0x124] sm:$0xf0] }
  0xd4   :  { %1932 = vmatpush.bf16.msra.mxu3 %v5877_v35  ;;  %v7500_v35 = vld [vmem:[#allocation6 + $0x744] sm:$0xf] }
  0xd5   :  { %1892 = vmatpush.bf16.msrb.mxu0 %v5045_v38  ;;  %1902 = vmatpush.bf16.msrb.mxu1 %v5429_v39  ;;  %v5977_v37 = vor.u32 %v7500_v35, %v5974_v36  ;;  %v7276_v38 = vld [vmem:[#allocation6 + $0x44] sm:$0xf]  ;;  %v5276_v35 = vld [vmem:[#allocation6 + $0x1c8] sm:$0xf] }
  0xd6   :  { %v5078_v39 = vld [vmem:[#allocation6 + $0x60] sm:$0xf0]  ;;  %v7329_v36 = vld [vmem:[#allocation6 + $0x1e4] sm:$0xf0] }
  0xd7   :  { %1919 = vmatpush.bf16.msra.mxu2 %v5589_v47  ;;  %v5081_v41 = vor.u32 %v7276_v38, %v5078_v39  ;;  %v7492_v47 = vld [vmem:[#allocation6 + $0x704] sm:$0xf]  ;;  %v5277_v39 = vor.u32 %v7329_v36, %v5276_v35 }
  0xd8   :  { %1933 = vmatpush.bf16.msra.mxu3 %v5845_v49  ;;  %v5945_v49 = vor.u32 %v7492_v47, %v5942_v48  ;;  %v7348_v7 = vld [vmem:[#allocation6 + $0x284] sm:$0xf]  ;;  %v5212_v48 = vld [vmem:[#allocation6 + $0x148] sm:$0xf] }
  0xd9   :  { %1941 = vmatpush.bf16.msra.mxu0 %v5273_v42  ;;  %1903 = vmatpush.bf16.msrb.mxu1 %v5397_v53  ;;  %v5462_v42 = vld [vmem:[#allocation6 + $0x360] sm:$0xf0] }
  0xda   :  { %v5465_v45 = vor.u32 %v7372_v40, %v5462_v42  ;;  %v7364_v53 = vld [vmem:[#allocation6 + $0x304] sm:$0xf]  ;;  %v5244_v42 = vld [vmem:[#allocation6 + $0x188] sm:$0xf] }
  0xdb   :  { %1920 = vmatpush.bf16.msra.mxu2 %v5557_v63  ;;  %v5433_v56 = vor.u32 %v7364_v53, %v5430_v54  ;;  %v5398_v63 = vld [vmem:[#allocation6 + $0x2e0] sm:$0xf0]  ;;  %v5245_v47 = vor.u32 %v7321_v43, %v5244_v42  ;;  %v5468_v42 = vld [vmem:[#allocation6 + $0x348] sm:$0xf] }
  0xdc   :  { %1934 = vmatpush.bf16.msra.mxu3 %v5813_v0  ;;  %v5401_v0 = vor.u32 %v7356_v62, %v5398_v63  ;;  %v5366_v8 = vld [vmem:[#allocation6 + $0x2a0] sm:$0xf0]  ;;  %v6044_v62 = vld [vmem:[#allocation6 + $0x7c8] sm:$0xf] }
  0xdd   :  { %1942 = vmatpush.bf16.msra.mxu0 %v5241_v57  ;;  %1904 = vmatpush.bf16.msrb.mxu1 %v5365_v2  ;;  %v5654_v57 = vld [vmem:[#allocation6 + $0x4e0] sm:$0xf0]  ;;  %v7521_v63 = vld [vmem:[#allocation6 + $0x7e4] sm:$0xf0] }
  0xde   :  { %v5657_v59 = vor.u32 %v7420_v55, %v5654_v57  ;;  %v5622_v2 = vld [vmem:[#allocation6 + $0x4a0] sm:$0xf0]  ;;  %v5180_v57 = vld [vmem:[#allocation6 + $0x108] sm:$0xf] }
  0xdf   :  { %1969 = vmatpush.bf16.msrb.mxu2 %v5785_v1  ;;  %v7412_v1 = vld [vmem:[#allocation6 + $0x484] sm:$0xf]  ;;  %v7377_v43 = vld [vmem:[#allocation6 + $0x364] sm:$0xf0] }
  0xe0   :  { %1983 = vmatpush.bf16.msrb.mxu3 %v6041_v3  ;;  %v7476_v3 = vld [vmem:[#allocation6 + $0x684] sm:$0xf] }
  0xe1   :  { %1943 = vmatpush.bf16.msra.mxu0 %v5209_v4  ;;  %1905 = vmatpush.bf16.msrb.mxu1 %v5333_v9  ;;  %v5625_v4 = vor.u32 %v7412_v1, %v5622_v2  ;;  %v5881_v6 = vor.u32 %v7476_v3, %v5878_v5  ;;  %v7404_v9 = vld [vmem:[#allocation6 + $0x444] sm:$0xf] }
  0xe2   :  { %v5590_v11 = vld [vmem:[#allocation6 + $0x460] sm:$0xf0] }
  0xe3   :  { %1970 = vmatpush.bf16.msrb.mxu2 %v5753_v22  ;;  %v7468_v12 = vld [vmem:[#allocation6 + $0x644] sm:$0xf]  ;;  %v5593_v14 = vor.u32 %v7404_v9, %v5590_v11 }
  0xe4   :  { %1984 = vmatpush.bf16.msrb.mxu3 %v6009_v26  ;;  %v7340_v16 = vld [vmem:[#allocation6 + $0x244] sm:$0xf] }
  0xe5   :  { %1944 = vmatpush.bf16.msra.mxu0 %v5177_v10  ;;  %1906 = vmatpush.bf16.msrb.mxu1 %v5301_v13  ;;  %v5369_v10 = vor.u32 %v7348_v7, %v5366_v8  ;;  %v5846_v13 = vld [vmem:[#allocation6 + $0x660] sm:$0xf0]  ;;  %v5148_v7 = vld [vmem:[#allocation6 + $0xc8] sm:$0xf] }
  0xe6   :  { %v5849_v15 = vor.u32 %v7468_v12, %v5846_v13  ;;  %v7396_v18 = vld [vmem:[#allocation6 + $0x404] sm:$0xf]  ;;  %v7297_v8 = vld [vmem:[#allocation6 + $0xe4] sm:$0xf0]  ;;  %v6045_v12 = vor.u32 %v7521_v63, %v6044_v62 }
  0xe7   :  { %1971 = vmatpush.bf16.msrb.mxu2 %v5721_v25  ;;  %v5558_v20 = vld [vmem:[#allocation6 + $0x420] sm:$0xf0]  ;;  %v5532_v13 = vld [vmem:[#allocation6 + $0x3c8] sm:$0xf] }
  0xe8   :  { %1985 = vmatpush.bf16.msrb.mxu3 %v5977_v37  ;;  %v5814_v22 = vld [vmem:[#allocation6 + $0x620] sm:$0xf0]  ;;  %v5561_v23 = vor.u32 %v7396_v18, %v5558_v20  ;;  %v6012_v18 = vld [vmem:[#allocation6 + $0x788] sm:$0xf] }
  0xe9   :  { %1945 = vmatpush.bf16.msra.mxu0 %v5145_v17  ;;  %1955 = vmatpush.bf16.msra.mxu1 %v5529_v21  ;;  %v5334_v17 = vld [vmem:[#allocation6 + $0x260] sm:$0xf0] }
  0xea   :  { %v5337_v19 = vor.u32 %v7340_v16, %v5334_v17  ;;  %v7460_v21 = vld [vmem:[#allocation6 + $0x604] sm:$0xf]  ;;  %v7449_v17 = vld [vmem:[#allocation6 + $0x5a4] sm:$0xf0] }
  0xeb   :  { %1972 = vmatpush.bf16.msrb.mxu2 %v5689_v46  ;;  %v5817_v24 = vor.u32 %v7460_v21, %v5814_v22  ;;  %v7332_v26 = vld [vmem:[#allocation6 + $0x204] sm:$0xf]  ;;  %v5149_v22 = vor.u32 %v7297_v8, %v5148_v7  ;;  %v5884_v7 = vld [vmem:[#allocation6 + $0x688] sm:$0xf] }
  0xec   :  { %1986 = vmatpush.bf16.msrb.mxu3 %v5945_v49  ;;  %v5305_v29 = vor.u32 %v7332_v26, %v5302_v27  ;;  %v7313_v49 = vld [vmem:[#allocation6 + $0x164] sm:$0xf0] }
  0xed   :  { %1946 = vmatpush.bf16.msra.mxu0 %v5113_v30  ;;  %1956 = vmatpush.bf16.msra.mxu1 %v5497_v34  ;;  %v5213_v54 = vor.u32 %v7313_v49, %v5212_v48  ;;  %v7289_v26 = vld [vmem:[#allocation6 + $0xa4] sm:$0xf0]  ;;  %v5469_v49 = vor.u32 %v7377_v43, %v5468_v42  ;;  %v6046_v42 = vld [vmem:[#allocation6 + $0x7e8] sm:$0xf0] }
  0xee   :  { %v7481_v8 = vld [vmem:[#allocation6 + $0x6a4] sm:$0xf0] }
  0xef   :  { %1973 = vmatpush.bf16.msrb.mxu2 %v5657_v59  ;;  %v5788_v59 = vld [vmem:[#allocation6 + $0x5c8] sm:$0xf] }
  0xf0   :  { %1987 = vmatpush.bf16.msrb.mxu3 %v5913_v61  ;;  %v7457_v61 = vld [vmem:[#allocation6 + $0x5e4] sm:$0xf0] }
  0xf1   :  { %1947 = vmatpush.bf16.msra.mxu0 %v5081_v41  ;;  %1957 = vmatpush.bf16.msra.mxu1 %v5465_v45  ;;  %v267_v45 = vperm.slane %v262_v28, 3  ;;  %v5789_v11 = vor.u32 %v7457_v61, %v5788_v59  ;;  %v7489_v59 = vld [vmem:[#allocation6 + $0x6e4] sm:$0xf0]  ;;  %v5278_v61 = vld [vmem:[#allocation6 + $0x1e8] sm:$0xf0] }
  0xf3   :  { %1974 = vmatpush.bf16.msrb.mxu2 %v5625_v4 }
  0xf4   :  { %1988 = vmatpush.bf16.msrb.mxu3 %v5881_v6  ;;  %v5181_v6 = vor.u32 %v7305_v58, %v5180_v57  ;;  %v7425_v57 = vld [vmem:[#allocation6 + $0x4e4] sm:$0xf0] }
  0xf5   :  { %1948 = vmatpush.bf16.msra.mxu0 %v5049_v52  ;;  %1958 = vmatpush.bf16.msra.mxu1 %v5433_v56  ;;  %v5916_v58 = vld [vmem:[#allocation6 + $0x6c8] sm:$0xf] }
  0xf7   :  { %1975 = vmatpush.bf16.msrb.mxu2 %v5593_v14  ;;  %v7393_v14 = vld [vmem:[#allocation6 + $0x3e4] sm:$0xf0] }
  0xf8   :  { %1989 = vmatpush.bf16.msrb.mxu3 %v5849_v15  ;;  %v5756_v15 = vld [vmem:[#allocation6 + $0x588] sm:$0xf] }
  0xf9   :  { %1959 = vmatpush.bf16.msra.mxu1 %v5401_v0  ;;  %v5757_v28 = vor.u32 %v7449_v17, %v5756_v15  ;;  %v7353_v15 = vld [vmem:[#allocation6 + $0x2a4] sm:$0xf0]  ;;  %v5885_v17 = vor.u32 %v7481_v8, %v5884_v7  ;;  %v5982_v7 = vld [vmem:[#allocation6 + $0x768] sm:$0xf0] }
  0xfb   :  { %1976 = vmatpush.bf16.msrb.mxu2 %v5561_v23  ;;  %v5533_v23 = vor.u32 %v7393_v14, %v5532_v13  ;;  %v5372_v14 = vld [vmem:[#allocation6 + $0x288] sm:$0xf] }
  0xfc   :  { %1990 = vmatpush.bf16.msrb.mxu3 %v5817_v24  ;;  %v5116_v24 = vld [vmem:[#allocation6 + $0x88] sm:$0xf] }
  0xfd   :  { %1960 = vmatpush.bf16.msra.mxu1 %v5369_v10  ;;  %v5117_v35 = vor.u32 %v7289_v26, %v5116_v24  ;;  %v5214_v24 = vld [vmem:[#allocation6 + $0x168] sm:$0xf0]  ;;  %v5373_v26 = vor.u32 %v7353_v15, %v5372_v14 }
  0xfe   :  { %v7373_v15 = vld [vmem:[#allocation6 + $0x34c] sm:$0xf] }
 0x101   :  { %1961 = vmatpush.bf16.msra.mxu1 %v5337_v19  ;;  %v7513_v19 = vld [vmem:[#allocation6 + $0x7a4] sm:$0xf0] }
 0x105   :  { %1962 = vmatpush.bf16.msra.mxu1 %v5305_v29  ;;  %v6013_v29 = vor.u32 %v7513_v19, %v6012_v18  ;;  %v5596_v19 = vld [vmem:[#allocation6 + $0x448] sm:$0xf] }
 0x135   :  { %v290_v30 = vpop.f32.mrf.mxu0 }
 0x136   :  { %v291_v32 = vadd.f32 %v290_v30, %v264_v31  ;;  %v5500_v30 = vld [vmem:[#allocation6 + $0x388] sm:$0xf] }
 0x138   :  { %v337_v34 = vmax.f32 %v291_v32, 0.0  ;;  %v5724_v32 = vld [vmem:[#allocation6 + $0x548] sm:$0xf] }
 0x13d   :  { %v292_v33 = vpop.f32.mrf.mxu0 }
 0x13e   :  { %v293_v25 = vadd.f32 %v292_v33, %v264_v31  ;;  %v7385_v31 = vld [vmem:[#allocation6 + $0x3a4] sm:$0xf0] }
 0x13f   :  { %v7441_v33 = vld [vmem:[#allocation6 + $0x564] sm:$0xf0]  ;;  %v5501_v36 = vor.u32 %v7385_v31, %v5500_v30 }
 0x140   :  { %v341_v37 = vmax.f32 %v293_v25, 0.0  ;;  %v7505_v25 = vld [vmem:[#allocation6 + $0x764] sm:$0xf0] }
 0x141   :  { %v318_v38 = vpop.f32.mrf.mxu2  ;;  %v7345_v30 = vld [vmem:[#allocation6 + $0x264] sm:$0xf0] }
 0x142   :  { %v8177_v40 = vpack.c.bf16 %v341_v37, %v337_v34  ;;  %v332_v41 = vpop.f32.mrf.mxu3  ;;  %v319_v50 = vadd.f32 %v318_v38, %v266_v44  ;;  %v5980_v34 = vld [vmem:[#allocation6 + $0x748] sm:$0xf] }
 0x143   :  { %v333_v52 = vadd.f32 %v332_v41, %v267_v45  ;;  %v5084_v37 = vld [vmem:[#allocation6 + $0x48] sm:$0xf]  ;;  %v5981_v41 = vor.u32 %v7505_v25, %v5980_v34 }
 0x144   :  { %1893 = vmatmul.bf16.vlgmr.msrb.gmra.mxu0 %v8177_v40  ;;  %v339_v0 = vmax.f32 %v319_v50, 0.0  ;;  %v7281_v38 = vld [vmem:[#allocation6 + $0x64] sm:$0xf0] }
 0x145   :  { %1997 = vmatpush.bf16.msrb.mxu0 %v5277_v39  ;;  %v304_v46 = vpop.f32.mrf.mxu1  ;;  %v340_v3 = vmax.f32 %v333_v52, 0.0  ;;  %v5725_v39 = vor.u32 %v7441_v33, %v5724_v32  ;;  %v5085_v48 = vor.u32 %v7281_v38, %v5084_v37  ;;  %v5052_v50 = vld [vmem:[#allocation6 + $0x8] sm:$0xf]  ;;  %v5182_v37 = vld [vmem:[#allocation6 + $0x128] sm:$0xf0] }
 0x146   :  { %v305_v1 = vadd.f32 %v304_v46, %v265_v51  ;;  %v5948_v46 = vld [vmem:[#allocation6 + $0x708] sm:$0xf]  ;;  %v7453_v38 = vld [vmem:[#allocation6 + $0x5cc] sm:$0xf] }
 0x147   :  { %v5564_v31 = vld [vmem:[#allocation6 + $0x408] sm:$0xf] }
 0x148   :  { %v338_v20 = vmax.f32 %v305_v1, 0.0  ;;  %v5404_v1 = vld [vmem:[#allocation6 + $0x2c8] sm:$0xf] }
 0x149   :  { %1998 = vmatpush.bf16.msrb.mxu0 %v5245_v47  ;;  %v320_v53 = vpop.f32.mrf.mxu2  ;;  %v7497_v47 = vld [vmem:[#allocation6 + $0x724] sm:$0xf0] }
 0x14a   :  { %v321_v55 = vadd.f32 %v320_v53, %v266_v44  ;;  %v334_v56 = vpop.f32.mrf.mxu3  ;;  %v5692_v44 = vld [vmem:[#allocation6 + $0x508] sm:$0xf]  ;;  %v5949_v52 = vor.u32 %v7497_v47, %v5948_v46 }
 0x14b   :  { %v335_v60 = vadd.f32 %v334_v56, %v267_v45  ;;  %v7433_v45 = vld [vmem:[#allocation6 + $0x524] sm:$0xf0] }
 0x14c   :  { %v343_v2 = vmax.f32 %v321_v55, 0.0  ;;  %v7273_v53 = vld [vmem:[#allocation6 + $0x24] sm:$0xf0] }
 0x14d   :  { %v344_v4 = vmax.f32 %v335_v60, 0.0  ;;  %1999 = vmatpush.bf16.msrb.mxu0 %v5213_v54  ;;  %v306_v5 = vpop.f32.mrf.mxu1  ;;  %v5436_v54 = vld [vmem:[#allocation6 + $0x308] sm:$0xf]  ;;  %v7325_v60 = vld [vmem:[#allocation6 + $0x1cc] sm:$0xf]  ;;  %v5053_v62 = vor.u32 %v7273_v53, %v5052_v50 }
 0x14e   :  { %v8180_v9 = vpack.c.bf16 %v343_v2, %v339_v0  ;;  %v307_v10 = vadd.f32 %v306_v5, %v265_v51  ;;  %v5693_v51 = vor.u32 %v7433_v45, %v5692_v44  ;;  %v7369_v55 = vld [vmem:[#allocation6 + $0x324] sm:$0xf0]  ;;  %v5150_v50 = vld [vmem:[#allocation6 + $0xe8] sm:$0xf0] }
 0x14f   :  { %v8182_v16 = vpack.c.bf16 %v344_v4, %v340_v3  ;;  %v5660_v56 = vld [vmem:[#allocation6 + $0x4c8] sm:$0xf]  ;;  %v5437_v63 = vor.u32 %v7369_v55, %v5436_v54  ;;  %v5917_v3 = vor.u32 %v7489_v59, %v5916_v58  ;;  %v5281_v4 = vor.u32 %v7325_v60, %v5278_v61  ;;  %v7389_v53 = vld [vmem:[#allocation6 + $0x3cc] sm:$0xf] }
 0x150   :  { %v342_v21 = vmax.f32 %v307_v10, 0.0  ;;  %1921 = vmatmul.bf16.vlgmr.msra.gmra.mxu2 %v8180_v9  ;;  %v5661_v0 = vor.u32 %v7425_v57, %v5660_v56  ;;  %v7361_v2 = vld [vmem:[#allocation6 + $0x2e4] sm:$0xf0]  ;;  %v7317_v10 = vld [vmem:[#allocation6 + $0x18c] sm:$0xf] }
 0x151   :  { %1935 = vmatmul.bf16.vlgmr.msra.gmra.mxu3 %v8182_v16  ;;  %2000 = vmatpush.bf16.msrb.mxu0 %v5181_v6  ;;  %v5628_v5 = vld [vmem:[#allocation6 + $0x488] sm:$0xf]  ;;  %v5534_v54 = vld [vmem:[#allocation6 + $0x3e8] sm:$0xf0] }
 0x152   :  { %v8186_v27 = vpack.c.bf16 %v342_v21, %v338_v20  ;;  %2025 = vmatpush.bf16.msra.mxu2 %v5789_v11  ;;  %2039 = vmatpush.bf16.msra.mxu3 %v6045_v12  ;;  %v7417_v6 = vld [vmem:[#allocation6 + $0x4a4] sm:$0xf0]  ;;  %v5246_v11 = vld [vmem:[#allocation6 + $0x1a8] sm:$0xf0]  ;;  %v5405_v12 = vor.u32 %v7361_v2, %v5404_v1  ;;  %v5537_v61 = vor.u32 %v7389_v53, %v5534_v54 }
 0x153   :  { %v5629_v13 = vor.u32 %v7417_v6, %v5628_v5  ;;  %v5249_v18 = vor.u32 %v7317_v10, %v5246_v11  ;;  %v7409_v20 = vld [vmem:[#allocation6 + $0x464] sm:$0xf0]  ;;  %v7445_v55 = vld [vmem:[#allocation6 + $0x58c] sm:$0xf] }
 0x154   :  { %1907 = vmatmul.bf16.vlgmr.msrb.gmra.mxu1 %v8186_v27  ;;  %1949 = vmatmul.bf16.vlgmr.msra.gmra.mxu0 %v8177_v40  ;;  %v5852_v21 = vld [vmem:[#allocation6 + $0x648] sm:$0xf]  ;;  %v5758_v56 = vld [vmem:[#allocation6 + $0x5a8] sm:$0xf0] }
 0x155   :  { %2001 = vmatpush.bf16.msrb.mxu0 %v5149_v22  ;;  %2011 = vmatpush.bf16.msrb.mxu1 %v5533_v23  ;;  %v7473_v22 = vld [vmem:[#allocation6 + $0x664] sm:$0xf0]  ;;  %v7309_v23 = vld [vmem:[#allocation6 + $0x14c] sm:$0xf] }
 0x156   :  { %2026 = vmatpush.bf16.msra.mxu2 %v5757_v28  ;;  %2040 = vmatpush.bf16.msra.mxu3 %v6013_v29  ;;  %v5597_v28 = vor.u32 %v7409_v20, %v5596_v19  ;;  %v5340_v29 = vld [vmem:[#allocation6 + $0x248] sm:$0xf]  ;;  %v5853_v32 = vor.u32 %v7473_v22, %v5852_v21  ;;  %v5217_v33 = vor.u32 %v7309_v23, %v5214_v24  ;;  %v7509_v57 = vld [vmem:[#allocation6 + $0x78c] sm:$0xf] }
 0x157   :  { %v7401_v34 = vld [vmem:[#allocation6 + $0x424] sm:$0xf0]  ;;  %v5341_v43 = vor.u32 %v7345_v30, %v5340_v29  ;;  %v6014_v58 = vld [vmem:[#allocation6 + $0x7a8] sm:$0xf0] }
 0x158   :  { %v5820_v25 = vld [vmem:[#allocation6 + $0x608] sm:$0xf]  ;;  %v5565_v44 = vor.u32 %v7401_v34, %v5564_v31  ;;  %v6017_v1 = vor.u32 %v7509_v57, %v6014_v58  ;;  %v7381_v2 = vld [vmem:[#allocation6 + $0x38c] sm:$0xf] }
 0x159   :  { %2002 = vmatpush.bf16.msrb.mxu0 %v5117_v35  ;;  %2012 = vmatpush.bf16.msrb.mxu1 %v5501_v36  ;;  %v7465_v35 = vld [vmem:[#allocation6 + $0x624] sm:$0xf0]  ;;  %v7301_v36 = vld [vmem:[#allocation6 + $0x10c] sm:$0xf] }
 0x15a   :  { %2027 = vmatpush.bf16.msra.mxu2 %v5725_v39  ;;  %2041 = vmatpush.bf16.msra.mxu3 %v5981_v41  ;;  %v5790_v39 = vld [vmem:[#allocation6 + $0x5e8] sm:$0xf0]  ;;  %v5308_v45 = vld [vmem:[#allocation6 + $0x208] sm:$0xf]  ;;  %v5821_v46 = vor.u32 %v7465_v35, %v5820_v25  ;;  %v5185_v47 = vor.u32 %v7301_v36, %v5182_v37  ;;  %v5284_v35 = vld [vmem:[#allocation6 + $0x1d0] sm:$0xf] }
 0x15b   :  { %v7517_v41 = vld [vmem:[#allocation6 + $0x7cc] sm:$0xf]  ;;  %v7330_v36 = vld [vmem:[#allocation6 + $0x1ec] sm:$0xf0] }
 0x15c   :  { %v5726_v5 = vld [vmem:[#allocation6 + $0x568] sm:$0xf0] }
 0x15d   :  { %2003 = vmatpush.bf16.msrb.mxu0 %v5085_v48  ;;  %2013 = vmatpush.bf16.msrb.mxu1 %v5469_v49  ;;  %v7337_v48 = vld [vmem:[#allocation6 + $0x224] sm:$0xf0]  ;;  %v7293_v49 = vld [vmem:[#allocation6 + $0xcc] sm:$0xf] }
 0x15e   :  { %2028 = vmatpush.bf16.msra.mxu2 %v5693_v51  ;;  %2042 = vmatpush.bf16.msra.mxu3 %v5949_v52  ;;  %v5793_v51 = vor.u32 %v7453_v38, %v5790_v39  ;;  %v6049_v52 = vor.u32 %v7517_v41, %v6046_v42  ;;  %v5309_v59 = vor.u32 %v7337_v48, %v5308_v45  ;;  %v7501_v6 = vld [vmem:[#allocation6 + $0x74c] sm:$0xf] }
 0x15f   :  { %v5153_v60 = vor.u32 %v7293_v49, %v5150_v50  ;;  %v7277_v11 = vld [vmem:[#allocation6 + $0x4c] sm:$0xf]  ;;  %v5985_v14 = vor.u32 %v7501_v6, %v5982_v7  ;;  %v5285_v45 = vor.u32 %v7330_v36, %v5284_v35  ;;  %v5252_v49 = vld [vmem:[#allocation6 + $0x190] sm:$0xf] }
 0x160   :  { %1977 = vmatmul.bf16.vlgmr.msrb.gmra.mxu2 %v8180_v9  ;;  %v5694_v19 = vld [vmem:[#allocation6 + $0x528] sm:$0xf0]  ;;  %v7322_v50 = vld [vmem:[#allocation6 + $0x1ac] sm:$0xf0] }
 0x161   :  { %1991 = vmatmul.bf16.vlgmr.msrb.gmra.mxu3 %v8182_v16  ;;  %2004 = vmatpush.bf16.msrb.mxu0 %v5053_v62  ;;  %v7285_v62 = vld [vmem:[#allocation6 + $0x8c] sm:$0xf]  ;;  %v5253_v57 = vor.u32 %v7322_v50, %v5252_v49  ;;  %v5092_v50 = vld [vmem:[#allocation6 + $0x50] sm:$0xf] }
 0x162   :  { %2014 = vmatpush.bf16.msrb.mxu1 %v5437_v63  ;;  %2029 = vmatpush.bf16.msra.mxu2 %v5661_v0  ;;  %v5118_v63 = vld [vmem:[#allocation6 + $0xa8] sm:$0xf0]  ;;  %v5761_v0 = vor.u32 %v7445_v55, %v5758_v56 }
 0x163   :  { %2043 = vmatpush.bf16.msra.mxu3 %v5917_v3  ;;  %v5502_v3 = vld [vmem:[#allocation6 + $0x3a8] sm:$0xf0]  ;;  %v5121_v8 = vor.u32 %v7285_v62, %v5118_v63  ;;  %v7314_v62 = vld [vmem:[#allocation6 + $0x16c] sm:$0xf0] }
 0x164   :  { %1963 = vmatmul.bf16.vlgmr.msra.gmra.mxu1 %v8186_v27  ;;  %2005 = vmatmul.bf16.vlgmr.msrb.gmra.mxu0 %v8177_v40  ;;  %v5505_v10 = vor.u32 %v7381_v2, %v5502_v3  ;;  %v7493_v20 = vld [vmem:[#allocation6 + $0x70c] sm:$0xf] }
 0x165   :  { %2053 = vmatpush.bf16.msra.mxu0 %v5281_v4  ;;  %v7437_v4 = vld [vmem:[#allocation6 + $0x54c] sm:$0xf] }
 0x166   :  { %2015 = vmatpush.bf16.msrb.mxu1 %v5405_v12  ;;  %2030 = vmatpush.bf16.msra.mxu2 %v5629_v13  ;;  %v5086_v12 = vld [vmem:[#allocation6 + $0x68] sm:$0xf0]  ;;  %v5729_v13 = vor.u32 %v7437_v4, %v5726_v5 }
 0x167   :  { %2044 = vmatpush.bf16.msra.mxu3 %v5885_v17  ;;  %v5470_v17 = vld [vmem:[#allocation6 + $0x368] sm:$0xf0]  ;;  %v5089_v22 = vor.u32 %v7277_v11, %v5086_v12  ;;  %v7306_v11 = vld [vmem:[#allocation6 + $0x12c] sm:$0xf0] }
 0x168   :  { %v5950_v21 = vld [vmem:[#allocation6 + $0x728] sm:$0xf0]  ;;  %v5473_v23 = vor.u32 %v7373_v15, %v5470_v17  ;;  %v5796_v12 = vld [vmem:[#allocation6 + $0x5d0] sm:$0xf] }
 0x169   :  { %2054 = vmatpush.bf16.msra.mxu0 %v5249_v18  ;;  %v7429_v18 = vld [vmem:[#allocation6 + $0x50c] sm:$0xf]  ;;  %v5953_v29 = vor.u32 %v7493_v20, %v5950_v21  ;;  %v6052_v15 = vld [vmem:[#allocation6 + $0x7d0] sm:$0xf] }
 0x16a   :  { %2016 = vmatpush.bf16.msrb.mxu1 %v5373_v26  ;;  %2031 = vmatpush.bf16.msra.mxu2 %v5597_v28  ;;  %v7269_v24 = vld [vmem:[#allocation6 + $0xc] sm:$0xf]  ;;  %v5697_v28 = vor.u32 %v7429_v18, %v5694_v19  ;;  %v7522_v17 = vld [vmem:[#allocation6 + $0x7ec] sm:$0xf0] }
 0x16b   :  { %2045 = vmatpush.bf16.msra.mxu3 %v5853_v32  ;;  %v5054_v26 = vld [vmem:[#allocation6 + $0x28] sm:$0xf0] }
 0x16c   :  { %v7365_v30 = vld [vmem:[#allocation6 + $0x30c] sm:$0xf]  ;;  %v5057_v37 = vor.u32 %v7269_v24, %v5054_v26  ;;  %v5156_v24 = vld [vmem:[#allocation6 + $0xd0] sm:$0xf] }
 0x16d   :  { %2055 = vmatpush.bf16.msra.mxu0 %v5217_v33  ;;  %v5438_v31 = vld [vmem:[#allocation6 + $0x328] sm:$0xf0]  ;;  %v7298_v26 = vld [vmem:[#allocation6 + $0xec] sm:$0xf0] }
 0x16e   :  { %2017 = vmatpush.bf16.msrb.mxu1 %v5341_v43  ;;  %2032 = vmatpush.bf16.msra.mxu2 %v5565_v44  ;;  %v7421_v32 = vld [vmem:[#allocation6 + $0x4cc] sm:$0xf]  ;;  %v5441_v38 = vor.u32 %v7365_v30, %v5438_v31  ;;  %v7394_v30 = vld [vmem:[#allocation6 + $0x3ec] sm:$0xf0]  ;;  %v5157_v35 = vor.u32 %v7298_v26, %v5156_v24  ;;  %v5254_v24 = vld [vmem:[#allocation6 + $0x1b0] sm:$0xf0] }
 0x16f   :  { %2046 = vmatpush.bf16.msra.mxu3 %v5821_v46  ;;  %v5662_v33 = vld [vmem:[#allocation6 + $0x4e8] sm:$0xf0]  ;;  %v5764_v31 = vld [vmem:[#allocation6 + $0x590] sm:$0xf] }
 0x170   :  { %v7485_v34 = vld [vmem:[#allocation6 + $0x6cc] sm:$0xf]  ;;  %v5665_v39 = vor.u32 %v7421_v32, %v5662_v33  ;;  %v7450_v32 = vld [vmem:[#allocation6 + $0x5ac] sm:$0xf0] }
 0x171   :  { %2056 = vmatpush.bf16.msra.mxu0 %v5185_v47  ;;  %2033 = vmatmul.bf16.vlgmr.msra.gmra.mxu2 %v8180_v9  ;;  %v5918_v25 = vld [vmem:[#allocation6 + $0x6e8] sm:$0xf0]  ;;  %v6020_v33 = vld [vmem:[#allocation6 + $0x790] sm:$0xf] }
 0x172   :  { %2081 = vmatpush.bf16.msrb.mxu2 %v5793_v51  ;;  %2018 = vmatpush.bf16.msrb.mxu1 %v5309_v59  ;;  %v5921_v41 = vor.u32 %v7485_v34, %v5918_v25  ;;  %v7357_v42 = vld [vmem:[#allocation6 + $0x2cc] sm:$0xf]  ;;  %v7514_v34 = vld [vmem:[#allocation6 + $0x7ac] sm:$0xf0] }
 0x173   :  { %2095 = vmatpush.bf16.msrb.mxu3 %v6049_v52  ;;  %v5406_v43 = vld [vmem:[#allocation6 + $0x2e8] sm:$0xf0] }
 0x174   :  { %2047 = vmatmul.bf16.vlgmr.msra.gmra.mxu3 %v8182_v16  ;;  %v7413_v44 = vld [vmem:[#allocation6 + $0x48c] sm:$0xf]  ;;  %v5409_v51 = vor.u32 %v7357_v42, %v5406_v43  ;;  %v5508_v42 = vld [vmem:[#allocation6 + $0x390] sm:$0xf] }
 0x175   :  { %2057 = vmatpush.bf16.msra.mxu0 %v5153_v60  ;;  %2019 = vmatmul.bf16.vlgmr.msrb.gmra.mxu1 %v8186_v27  ;;  %v5630_v46 = vld [vmem:[#allocation6 + $0x4a8] sm:$0xf0]  ;;  %v7386_v43 = vld [vmem:[#allocation6 + $0x3ac] sm:$0xf0] }
 0x176   :  { %2067 = vmatpush.bf16.msra.mxu1 %v5537_v61  ;;  %2082 = vmatpush.bf16.msrb.mxu2 %v5761_v0  ;;  %v7477_v47 = vld [vmem:[#allocation6 + $0x68c] sm:$0xf]  ;;  %v5633_v52 = vor.u32 %v7413_v44, %v5630_v46  ;;  %v5220_v61 = vld [vmem:[#allocation6 + $0x150] sm:$0xf]  ;;  %v5509_v49 = vor.u32 %v7386_v43, %v5508_v42 }
 0x177   :  { %2096 = vmatpush.bf16.msrb.mxu3 %v6017_v1  ;;  %v5886_v48 = vld [vmem:[#allocation6 + $0x6a8] sm:$0xf0]  ;;  %v5221_v6 = vor.u32 %v7314_v62, %v5220_v61  ;;  %v5732_v44 = vld [vmem:[#allocation6 + $0x550] sm:$0xf] }
 0x178   :  { %v5889_v53 = vor.u32 %v7477_v47, %v5886_v48  ;;  %v7349_v54 = vld [vmem:[#allocation6 + $0x28c] sm:$0xf]  ;;  %v5988_v46 = vld [vmem:[#allocation6 + $0x750] sm:$0xf] }
 0x179   :  { %2058 = vmatpush.bf16.msra.mxu0 %v5121_v8  ;;  %v5374_v55 = vld [vmem:[#allocation6 + $0x2a8] sm:$0xf0]  ;;  %v7506_v47 = vld [vmem:[#allocation6 + $0x76c] sm:$0xf0] }
 0x17a   :  { %2068 = vmatpush.bf16.msra.mxu1 %v5505_v10  ;;  %2083 = vmatpush.bf16.msrb.mxu2 %v5729_v13  ;;  %v7405_v56 = vld [vmem:[#allocation6 + $0x44c] sm:$0xf]  ;;  %v5377_v63 = vor.u32 %v7349_v54, %v5374_v55  ;;  %v5188_v10 = vld [vmem:[#allocation6 + $0x110] sm:$0xf] }
 0x17b   :  { %2097 = vmatpush.bf16.msrb.mxu3 %v5985_v14  ;;  %v5598_v58 = vld [vmem:[#allocation6 + $0x468] sm:$0xf0]  ;;  %v7458_v13 = vld [vmem:[#allocation6 + $0x5ec] sm:$0xf0]  ;;  %v5189_v21 = vor.u32 %v7306_v11, %v5188_v10  ;;  %v5286_v10 = vld [vmem:[#allocation6 + $0x1f0] sm:$0xf0] }
 0x17c   :  { %v7469_v59 = vld [vmem:[#allocation6 + $0x64c] sm:$0xf]  ;;  %v5601_v1 = vor.u32 %v7405_v56, %v5598_v58  ;;  %v5476_v54 = vld [vmem:[#allocation6 + $0x350] sm:$0xf] }
 0x17d   :  { %2059 = vmatpush.bf16.msra.mxu0 %v5089_v22  ;;  %v5854_v60 = vld [vmem:[#allocation6 + $0x668] sm:$0xf0]  ;;  %v5797_v22 = vor.u32 %v7458_v13, %v5796_v12  ;;  %v7378_v55 = vld [vmem:[#allocation6 + $0x36c] sm:$0xf0] }
 0x17e   :  { %2069 = vmatpush.bf16.msra.mxu1 %v5473_v23  ;;  %2084 = vmatpush.bf16.msrb.mxu2 %v5697_v28  ;;  %v7341_v0 = vld [vmem:[#allocation6 + $0x24c] sm:$0xf]  ;;  %v5857_v2 = vor.u32 %v7469_v59, %v5854_v60  ;;  %v6053_v28 = vor.u32 %v7522_v17, %v6052_v15  ;;  %v5700_v56 = vld [vmem:[#allocation6 + $0x510] sm:$0xf]  ;;  %v5477_v61 = vor.u32 %v7378_v55, %v5476_v54  ;;  %v7518_v54 = vld [vmem:[#allocation6 + $0x7d4] sm:$0xf] }
 0x17f   :  { %2098 = vmatpush.bf16.msrb.mxu3 %v5953_v29  ;;  %v5342_v3 = vld [vmem:[#allocation6 + $0x268] sm:$0xf0]  ;;  %v5540_v29 = vld [vmem:[#allocation6 + $0x3d0] sm:$0xf]  ;;  %v6054_v55 = vld [vmem:[#allocation6 + $0x7f0] sm:$0xf0] }
 0x180   :  { %v7397_v4 = vld [vmem:[#allocation6 + $0x40c] sm:$0xf]  ;;  %v5345_v14 = vor.u32 %v7341_v0, %v5342_v3  ;;  %v5541_v36 = vor.u32 %v7394_v30, %v5540_v29  ;;  %v5956_v58 = vld [vmem:[#allocation6 + $0x710] sm:$0xf] }
 0x181   :  { %2060 = vmatpush.bf16.msra.mxu0 %v5057_v37  ;;  %v5566_v5 = vld [vmem:[#allocation6 + $0x428] sm:$0xf0]  ;;  %v5124_v37 = vld [vmem:[#allocation6 + $0x90] sm:$0xf] }
 0x182   :  { %2070 = vmatpush.bf16.msra.mxu1 %v5441_v38  ;;  %2085 = vmatpush.bf16.msrb.mxu2 %v5665_v39  ;;  %v7461_v7 = vld [vmem:[#allocation6 + $0x60c] sm:$0xf]  ;;  %v5569_v18 = vor.u32 %v7397_v4, %v5566_v5  ;;  %v7290_v38 = vld [vmem:[#allocation6 + $0xac] sm:$0xf0]  ;;  %v5765_v39 = vor.u32 %v7450_v32, %v5764_v31 }
 0x183   :  { %2099 = vmatpush.bf16.msrb.mxu3 %v5921_v41  ;;  %v5822_v8 = vld [vmem:[#allocation6 + $0x628] sm:$0xf0]  ;;  %v6021_v41 = vor.u32 %v7514_v34, %v6020_v33  ;;  %v5125_v48 = vor.u32 %v7290_v38, %v5124_v37  ;;  %v7498_v59 = vld [vmem:[#allocation6 + $0x72c] sm:$0xf0]  ;;  %v5222_v37 = vld [vmem:[#allocation6 + $0x170] sm:$0xf0] }
 0x184   :  { %2061 = vmatmul.bf16.vlgmr.msra.gmra.mxu0 %v8177_v40  ;;  %v5825_v19 = vor.u32 %v7461_v7, %v5822_v8  ;;  %v7333_v20 = vld [vmem:[#allocation6 + $0x20c] sm:$0xf]  ;;  %v5060_v62 = vld [vmem:[#allocation6 + $0x10] sm:$0xf]  ;;  %v7326_v8 = vld [vmem:[#allocation6 + $0x1d4] sm:$0xf] }
 0x185   :  { %2109 = vmatpush.bf16.msrb.mxu0 %v5285_v45  ;;  %v5310_v23 = vld [vmem:[#allocation6 + $0x228] sm:$0xf0]  ;;  %v7442_v45 = vld [vmem:[#allocation6 + $0x56c] sm:$0xf0] }
 0x186   :  { %2071 = vmatpush.bf16.msra.mxu1 %v5409_v51  ;;  %2086 = vmatpush.bf16.msrb.mxu2 %v5633_v52  ;;  %v5313_v25 = vor.u32 %v7333_v20, %v5310_v23  ;;  %v7282_v51 = vld [vmem:[#allocation6 + $0x6c] sm:$0xf0]  ;;  %v5733_v52 = vor.u32 %v7442_v45, %v5732_v44  ;;  %v7318_v23 = vld [vmem:[#allocation6 + $0x194] sm:$0xf] }
 0x187   :  { %2100 = vmatpush.bf16.msrb.mxu3 %v5889_v53  ;;  %v5989_v53 = vor.u32 %v7506_v47, %v5988_v46  ;;  %v5093_v60 = vor.u32 %v7282_v51, %v5092_v50  ;;  %v7370_v3 = vld [vmem:[#allocation6 + $0x32c] sm:$0xf0]  ;;  %v5257_v33 = vor.u32 %v7318_v23, %v5254_v24  ;;  %v5190_v50 = vld [vmem:[#allocation6 + $0x130] sm:$0xf0] }
 0x188   :  { %v5668_v4 = vld [vmem:[#allocation6 + $0x4d0] sm:$0xf]  ;;  %v7454_v51 = vld [vmem:[#allocation6 + $0x5d4] sm:$0xf] }
 0x189   :  { %2110 = vmatpush.bf16.msrb.mxu0 %v5253_v57  ;;  %v7434_v57 = vld [vmem:[#allocation6 + $0x52c] sm:$0xf0]  ;;  %v7278_v24 = vld [vmem:[#allocation6 + $0x54] sm:$0xf] }
 0x18a   :  { %2072 = vmatpush.bf16.msra.mxu1 %v5377_v63  ;;  %2087 = vmatpush.bf16.msrb.mxu2 %v5601_v1  ;;  %v7274_v63 = vld [vmem:[#allocation6 + $0x2c] sm:$0xf0]  ;;  %v5701_v0 = vor.u32 %v7434_v57, %v5700_v56  ;;  %v5957_v1 = vor.u32 %v7498_v59, %v5956_v58 }
 0x18b   :  { %2101 = vmatpush.bf16.msrb.mxu3 %v5857_v2  ;;  %v5444_v2 = vld [vmem:[#allocation6 + $0x310] sm:$0xf]  ;;  %v5061_v11 = vor.u32 %v7274_v63, %v5060_v62  ;;  %v7294_v62 = vld [vmem:[#allocation6 + $0xd4] sm:$0xf] }
 0x18c   :  { %v7426_v5 = vld [vmem:[#allocation6 + $0x4ec] sm:$0xf0]  ;;  %v5445_v12 = vor.u32 %v7370_v3, %v5444_v2  ;;  %v5158_v63 = vld [vmem:[#allocation6 + $0xf0] sm:$0xf0] }
 0x18d   :  { %2111 = vmatpush.bf16.msrb.mxu0 %v5221_v6  ;;  %v5924_v6 = vld [vmem:[#allocation6 + $0x6d0] sm:$0xf]  ;;  %v5669_v13 = vor.u32 %v7426_v5, %v5668_v4  ;;  %v5542_v2 = vld [vmem:[#allocation6 + $0x3f0] sm:$0xf0] }
 0x18e   :  { %2073 = vmatpush.bf16.msra.mxu1 %v5345_v14  ;;  %2088 = vmatpush.bf16.msrb.mxu2 %v5569_v18  ;;  %v7490_v7 = vld [vmem:[#allocation6 + $0x6ec] sm:$0xf0]  ;;  %v7446_v3 = vld [vmem:[#allocation6 + $0x594] sm:$0xf] }
 0x18f   :  { %2102 = vmatpush.bf16.msrb.mxu3 %v5825_v19  ;;  %v5925_v14 = vor.u32 %v7490_v7, %v5924_v6  ;;  %v5412_v15 = vld [vmem:[#allocation6 + $0x2d0] sm:$0xf]  ;;  %v5289_v19 = vor.u32 %v7326_v8, %v5286_v10  ;;  %v5766_v4 = vld [vmem:[#allocation6 + $0x5b0] sm:$0xf0]  ;;  %v5161_v8 = vor.u32 %v7294_v62, %v5158_v63  ;;  %v7323_v62 = vld [vmem:[#allocation6 + $0x1b4] sm:$0xf0] }
 0x190   :  { %v7362_v17 = vld [vmem:[#allocation6 + $0x2ec] sm:$0xf0]  ;;  %v7510_v5 = vld [vmem:[#allocation6 + $0x794] sm:$0xf] }
 0x191   :  { %2112 = vmatpush.bf16.msrb.mxu0 %v5189_v21  ;;  %2089 = vmatmul.bf16.vlgmr.msrb.gmra.mxu2 %v8180_v9  ;;  %v5636_v18 = vld [vmem:[#allocation6 + $0x490] sm:$0xf]  ;;  %v5413_v26 = vor.u32 %v7362_v17, %v5412_v15  ;;  %v6022_v6 = vld [vmem:[#allocation6 + $0x7b0] sm:$0xf0] }
 0x192   :  { %2137 = vmatpush.bf16.msra.mxu2 %v5797_v22  ;;  %2103 = vmatmul.bf16.vlgmr.msrb.gmra.mxu3 %v8182_v16  ;;  %v7418_v20 = vld [vmem:[#allocation6 + $0x4ac] sm:$0xf0]  ;;  %v7382_v15 = vld [vmem:[#allocation6 + $0x394] sm:$0xf] }
 0x193   :  { %2151 = vmatpush.bf16.msra.mxu3 %v6053_v28  ;;  %2074 = vmatpush.bf16.msra.mxu1 %v5313_v25  ;;  %v5892_v21 = vld [vmem:[#allocation6 + $0x690] sm:$0xf]  ;;  %v5637_v28 = vor.u32 %v7418_v20, %v5636_v18  ;;  %v5510_v17 = vld [vmem:[#allocation6 + $0x3b0] sm:$0xf0] }
 0x194   :  { %v7482_v22 = vld [vmem:[#allocation6 + $0x6ac] sm:$0xf0]  ;;  %v7438_v18 = vld [vmem:[#allocation6 + $0x554] sm:$0xf]  ;;  %v5513_v23 = vor.u32 %v7382_v15, %v5510_v17 }
 0x195   :  { %2113 = vmatpush.bf16.msrb.mxu0 %v5157_v35  ;;  %v5893_v29 = vor.u32 %v7482_v22, %v5892_v21  ;;  %v5380_v30 = vld [vmem:[#allocation6 + $0x290] sm:$0xf]  ;;  %v7502_v20 = vld [vmem:[#allocation6 + $0x754] sm:$0xf] }
 0x196   :  { %2138 = vmatpush.bf16.msra.mxu2 %v5765_v39  ;;  %2075 = vmatmul.bf16.vlgmr.msra.gmra.mxu1 %v8186_v27  ;;  %v7354_v31 = vld [vmem:[#allocation6 + $0x2ac] sm:$0xf0]  ;;  %v5990_v21 = vld [vmem:[#allocation6 + $0x770] sm:$0xf0] }
 0x197   :  { %2123 = vmatpush.bf16.msrb.mxu1 %v5541_v36  ;;  %2152 = vmatpush.bf16.msra.mxu3 %v6021_v41  ;;  %v5604_v32 = vld [vmem:[#allocation6 + $0x450] sm:$0xf]  ;;  %v7310_v36 = vld [vmem:[#allocation6 + $0x154] sm:$0xf]  ;;  %v5381_v38 = vor.u32 %v7354_v31, %v5380_v30 }
 0x198   :  { %v7410_v34 = vld [vmem:[#allocation6 + $0x46c] sm:$0xf0]  ;;  %v5225_v46 = vor.u32 %v7310_v36, %v5222_v37  ;;  %v7374_v30 = vld [vmem:[#allocation6 + $0x354] sm:$0xf] }
 0x199   :  { %2114 = vmatpush.bf16.msrb.mxu0 %v5125_v48  ;;  %v5860_v25 = vld [vmem:[#allocation6 + $0x650] sm:$0xf]  ;;  %v5605_v41 = vor.u32 %v7410_v34, %v5604_v32  ;;  %v5478_v31 = vld [vmem:[#allocation6 + $0x370] sm:$0xf0] }
 0x19a   :  { %2139 = vmatpush.bf16.msra.mxu2 %v5733_v52  ;;  %v7474_v35 = vld [vmem:[#allocation6 + $0x66c] sm:$0xf0]  ;;  %v5798_v52 = vld [vmem:[#allocation6 + $0x5f0] sm:$0xf0]  ;;  %v5481_v36 = vor.u32 %v7374_v30, %v5478_v31  ;;  %v6060_v30 = vld [vmem:[#allocation6 + $0x7d8] sm:$0xf] }
 0x19b   :  { %2124 = vmatpush.bf16.msrb.mxu1 %v5509_v49  ;;  %2153 = vmatpush.bf16.msra.mxu3 %v5989_v53  ;;  %v5348_v39 = vld [vmem:[#allocation6 + $0x250] sm:$0xf]  ;;  %v5861_v42 = vor.u32 %v7474_v35, %v5860_v25  ;;  %v7302_v49 = vld [vmem:[#allocation6 + $0x114] sm:$0xf]  ;;  %v7523_v31 = vld [vmem:[#allocation6 + $0x7f4] sm:$0xf0] }
 0x19c   :  { %v7346_v43 = vld [vmem:[#allocation6 + $0x26c] sm:$0xf0]  ;;  %v5193_v59 = vor.u32 %v7302_v49, %v5190_v50  ;;  %v7430_v32 = vld [vmem:[#allocation6 + $0x514] sm:$0xf]  ;;  %v7331_v49 = vld [vmem:[#allocation6 + $0x1f4] sm:$0xf0] }
 0x19d   :  { %2115 = vmatpush.bf16.msrb.mxu0 %v5093_v60  ;;  %v5572_v44 = vld [vmem:[#allocation6 + $0x410] sm:$0xf]  ;;  %v5349_v53 = vor.u32 %v7346_v43, %v5348_v39  ;;  %v5801_v60 = vor.u32 %v7454_v51, %v5798_v52  ;;  %v7494_v34 = vld [vmem:[#allocation6 + $0x714] sm:$0xf] }
 0x19e   :  { %2140 = vmatpush.bf16.msra.mxu2 %v5701_v0  ;;  %v7402_v45 = vld [vmem:[#allocation6 + $0x42c] sm:$0xf0]  ;;  %v6057_v0 = vor.u32 %v7518_v54, %v6054_v55  ;;  %v5958_v25 = vld [vmem:[#allocation6 + $0x730] sm:$0xf0] }
 0x19f   :  { %2125 = vmatpush.bf16.msrb.mxu1 %v5477_v61  ;;  %2154 = vmatpush.bf16.msra.mxu3 %v5957_v1  ;;  %v5828_v47 = vld [vmem:[#allocation6 + $0x610] sm:$0xf]  ;;  %v5573_v56 = vor.u32 %v7402_v45, %v5572_v44  ;;  %v7390_v1 = vld [vmem:[#allocation6 + $0x3d4] sm:$0xf] }
 0x1a0   :  { %v7466_v48 = vld [vmem:[#allocation6 + $0x62c] sm:$0xf0]  ;;  %v5545_v10 = vor.u32 %v7390_v1, %v5542_v2  ;;  %v7270_v37 = vld [vmem:[#allocation6 + $0x14] sm:$0xf] }
 0x1a1   :  { %2116 = vmatpush.bf16.msrb.mxu0 %v5061_v11  ;;  %v5829_v57 = vor.u32 %v7466_v48, %v5828_v47  ;;  %v5316_v58 = vld [vmem:[#allocation6 + $0x210] sm:$0xf]  ;;  %v7286_v11 = vld [vmem:[#allocation6 + $0x94] sm:$0xf]  ;;  %v5292_v48 = vld [vmem:[#allocation6 + $0x1d8] sm:$0xf] }
 0x1a2   :  { %2141 = vmatpush.bf16.msra.mxu2 %v5669_v13  ;;  %v7338_v61 = vld [vmem:[#allocation6 + $0x22c] sm:$0xf0]  ;;  %v5769_v13 = vor.u32 %v7446_v3, %v5766_v4  ;;  %v5446_v43 = vld [vmem:[#allocation6 + $0x330] sm:$0xf0] }
 0x1a3   :  { %2126 = vmatpush.bf16.msrb.mxu1 %v5445_v12  ;;  %2155 = vmatpush.bf16.msra.mxu3 %v5925_v14  ;;  %v5317_v7 = vor.u32 %v7338_v61, %v5316_v58  ;;  %v5126_v12 = vld [vmem:[#allocation6 + $0xb0] sm:$0xf0]  ;;  %v6025_v14 = vor.u32 %v7510_v5, %v6022_v6  ;;  %v5260_v61 = vld [vmem:[#allocation6 + $0x198] sm:$0xf] }
 0x1a4   :  { %2117 = vmatmul.bf16.vlgmr.msrb.gmra.mxu0 %v8177_v40  ;;  %v5129_v22 = vor.u32 %v7286_v11, %v5126_v12  ;;  %v7422_v44 = vld [vmem:[#allocation6 + $0x4d4] sm:$0xf]  ;;  %v5261_v5 = vor.u32 %v7323_v62, %v5260_v61  ;;  %v7315_v11 = vld [vmem:[#allocation6 + $0x174] sm:$0xf0] }
 0x1a5   :  { %2165 = vmatpush.bf16.msra.mxu0 %v5289_v19  ;;  %v5734_v19 = vld [vmem:[#allocation6 + $0x570] sm:$0xf0] }
 0x1a6   :  { %2142 = vmatpush.bf16.msra.mxu2 %v5637_v28  ;;  %v5737_v28 = vor.u32 %v7438_v18, %v5734_v19  ;;  %v5670_v45 = vld [vmem:[#allocation6 + $0x4f0] sm:$0xf0] }
 0x1a7   :  { %2127 = vmatpush.bf16.msrb.mxu1 %v5413_v26  ;;  %2156 = vmatpush.bf16.msra.mxu3 %v5893_v29  ;;  %v5094_v26 = vld [vmem:[#allocation6 + $0x70] sm:$0xf0]  ;;  %v5993_v29 = vor.u32 %v7502_v20, %v5990_v21  ;;  %v5673_v52 = vor.u32 %v7422_v44, %v5670_v45  ;;  %v7451_v44 = vld [vmem:[#allocation6 + $0x5b4] sm:$0xf0] }
 0x1a8   :  { %v5097_v35 = vor.u32 %v7278_v24, %v5094_v26  ;;  %v5926_v47 = vld [vmem:[#allocation6 + $0x6f0] sm:$0xf0]  ;;  %v7307_v24 = vld [vmem:[#allocation6 + $0x134] sm:$0xf0] }
 0x1a9   :  { %2166 = vmatpush.bf16.msra.mxu0 %v5257_v33  ;;  %v5702_v33 = vld [vmem:[#allocation6 + $0x530] sm:$0xf0]  ;;  %v5804_v26 = vld [vmem:[#allocation6 + $0x5d8] sm:$0xf] }
 0x1aa   :  { %2143 = vmatpush.bf16.msra.mxu2 %v5605_v41  ;;  %v5705_v39 = vor.u32 %v7430_v32, %v5702_v33  ;;  %v5961_v41 = vor.u32 %v7494_v34, %v5958_v25  ;;  %v7358_v54 = vld [vmem:[#allocation6 + $0x2d4] sm:$0xf]  ;;  %v6028_v45 = vld [vmem:[#allocation6 + $0x798] sm:$0xf] }
 0x1ab   :  { %2128 = vmatpush.bf16.msrb.mxu1 %v5381_v38  ;;  %2157 = vmatpush.bf16.msra.mxu3 %v5861_v42  ;;  %v5062_v38 = vld [vmem:[#allocation6 + $0x30] sm:$0xf0] }
 0x1ac   :  { %v7366_v42 = vld [vmem:[#allocation6 + $0x314] sm:$0xf]  ;;  %v5065_v50 = vor.u32 %v7270_v37, %v5062_v38  ;;  %v5164_v37 = vld [vmem:[#allocation6 + $0xd8] sm:$0xf] }
 0x1ad   :  { %2167 = vmatpush.bf16.msra.mxu0 %v5225_v46  ;;  %v7486_v46 = vld [vmem:[#allocation6 + $0x6d4] sm:$0xf]  ;;  %v5449_v51 = vor.u32 %v7366_v42, %v5446_v43  ;;  %v7299_v38 = vld [vmem:[#allocation6 + $0xf4] sm:$0xf0] }
 0x1ae   :  { %2144 = vmatpush.bf16.msra.mxu2 %v5573_v56  ;;  %v5414_v55 = vld [vmem:[#allocation6 + $0x2f0] sm:$0xf0]  ;;  %v7395_v42 = vld [vmem:[#allocation6 + $0x3f4] sm:$0xf0] }
 0x1af   :  { %2129 = vmatpush.bf16.msrb.mxu1 %v5349_v53  ;;  %2158 = vmatpush.bf16.msra.mxu3 %v5829_v57  ;;  %v5929_v53 = vor.u32 %v7486_v46, %v5926_v47  ;;  %v7414_v56 = vld [vmem:[#allocation6 + $0x494] sm:$0xf]  ;;  %v5293_v57 = vor.u32 %v7331_v49, %v5292_v48  ;;  %v5417_v63 = vor.u32 %v7358_v54, %v5414_v55  ;;  %v5772_v43 = vld [vmem:[#allocation6 + $0x598] sm:$0xf] }
 0x1b0   :  { %v5638_v58 = vld [vmem:[#allocation6 + $0x4b0] sm:$0xf0]  ;;  %v7515_v46 = vld [vmem:[#allocation6 + $0x7b4] sm:$0xf0]  ;;  %v5165_v49 = vor.u32 %v7299_v38, %v5164_v37 }
 0x1b1   :  { %2168 = vmatpush.bf16.msra.mxu0 %v5193_v59  ;;  %2145 = vmatmul.bf16.vlgmr.msra.gmra.mxu2 %v8180_v9  ;;  %v7478_v59 = vld [vmem:[#allocation6 + $0x694] sm:$0xf]  ;;  %v6029_v54 = vor.u32 %v7515_v46, %v6028_v45  ;;  %v5516_v55 = vld [vmem:[#allocation6 + $0x398] sm:$0xf] }
 0x1b2   :  { %2193 = vmatpush.bf16.msrb.mxu2 %v5801_v60  ;;  %2159 = vmatmul.bf16.vlgmr.msra.gmra.mxu3 %v8182_v16  ;;  %v5894_v60 = vld [vmem:[#allocation6 + $0x6b0] sm:$0xf0]  ;;  %v7419_v38 = vld [vmem:[#allocation6 + $0x4b4] sm:$0xf0] }
 0x1b3   :  { %2207 = vmatpush.bf16.msrb.mxu3 %v6057_v0  ;;  %2130 = vmatpush.bf16.msrb.mxu1 %v5317_v7  ;;  %v5641_v0 = vor.u32 %v7414_v56, %v5638_v58  ;;  %v5897_v1 = vor.u32 %v7478_v59, %v5894_v60  ;;  %v7350_v2 = vld [vmem:[#allocation6 + $0x294] sm:$0xf]  ;;  %v7387_v56 = vld [vmem:[#allocation6 + $0x3b4] sm:$0xf0] }
 0x1b4   :  { %v5382_v3 = vld [vmem:[#allocation6 + $0x2b0] sm:$0xf0]  ;;  %v7443_v58 = vld [vmem:[#allocation6 + $0x574] sm:$0xf0]  ;;  %v5517_v62 = vor.u32 %v7387_v56, %v5516_v55 }
 0x1b5   :  { %2169 = vmatpush.bf16.msra.mxu0 %v5161_v8  ;;  %v7406_v4 = vld [vmem:[#allocation6 + $0x454] sm:$0xf]  ;;  %v5385_v12 = vor.u32 %v7350_v2, %v5382_v3  ;;  %v5996_v59 = vld [vmem:[#allocation6 + $0x758] sm:$0xf] }
 0x1b6   :  { %2194 = vmatpush.bf16.msrb.mxu2 %v5769_v13  ;;  %2131 = vmatmul.bf16.vlgmr.msrb.gmra.mxu1 %v8186_v27  ;;  %v5606_v6 = vld [vmem:[#allocation6 + $0x470] sm:$0xf0]  ;;  %v7507_v60 = vld [vmem:[#allocation6 + $0x774] sm:$0xf0] }
 0x1b7   :  { %2179 = vmatpush.bf16.msra.mxu1 %v5545_v10  ;;  %2208 = vmatpush.bf16.msrb.mxu3 %v6025_v14  ;;  %v7470_v7 = vld [vmem:[#allocation6 + $0x654] sm:$0xf]  ;;  %v5228_v10 = vld [vmem:[#allocation6 + $0x158] sm:$0xf]  ;;  %v5609_v14 = vor.u32 %v7406_v4, %v5606_v6  ;;  %v5997_v2 = vor.u32 %v7507_v60, %v5996_v59  ;;  %v7311_v59 = vld [vmem:[#allocation6 + $0x15c] sm:$0xf] }
 0x1b8   :  { %v5862_v8 = vld [vmem:[#allocation6 + $0x670] sm:$0xf0]  ;;  %v5229_v20 = vor.u32 %v7315_v11, %v5228_v10  ;;  %v5484_v3 = vld [vmem:[#allocation6 + $0x358] sm:$0xf]  ;;  %v5230_v60 = vld [vmem:[#allocation6 + $0x178] sm:$0xf0] }
 0x1b9   :  { %2170 = vmatpush.bf16.msra.mxu0 %v5129_v22  ;;  %v7342_v13 = vld [vmem:[#allocation6 + $0x254] sm:$0xf]  ;;  %v5865_v15 = vor.u32 %v7470_v7, %v5862_v8  ;;  %v7379_v4 = vld [vmem:[#allocation6 + $0x374] sm:$0xf0] }
 0x1ba   :  { %2195 = vmatpush.bf16.msrb.mxu2 %v5737_v28  ;;  %v5350_v17 = vld [vmem:[#allocation6 + $0x270] sm:$0xf0]  ;;  %v7459_v28 = vld [vmem:[#allocation6 + $0x5f4] sm:$0xf0]  ;;  %v5485_v11 = vor.u32 %v7379_v4, %v5484_v3  ;;  %v5233_v4 = vor.u32 %v7311_v59, %v5230_v60  ;;  %v5998_v59 = vld [vmem:[#allocation6 + $0x778] sm:$0xf0] }
 0x1bb   :  { %2180 = vmatpush.bf16.msra.mxu1 %v5513_v23  ;;  %2209 = vmatpush.bf16.msrb.mxu3 %v5993_v29  ;;  %v7398_v18 = vld [vmem:[#allocation6 + $0x414] sm:$0xf]  ;;  %v5196_v23 = vld [vmem:[#allocation6 + $0x118] sm:$0xf]  ;;  %v5353_v29 = vor.u32 %v7342_v13, %v5350_v17 }
 0x1bc   :  { %v5574_v19 = vld [vmem:[#allocation6 + $0x430] sm:$0xf0]  ;;  %v5197_v25 = vor.u32 %v7307_v24, %v5196_v23  ;;  %v7435_v6 = vld [vmem:[#allocation6 + $0x534] sm:$0xf0] }
 0x1bd   :  { %2171 = vmatpush.bf16.msra.mxu0 %v5097_v35  ;;  %v7462_v21 = vld [vmem:[#allocation6 + $0x614] sm:$0xf]  ;;  %v5577_v32 = vor.u32 %v7398_v18, %v5574_v19  ;;  %v5805_v35 = vor.u32 %v7459_v28, %v5804_v26  ;;  %v5964_v7 = vld [vmem:[#allocation6 + $0x718] sm:$0xf] }
 0x1be   :  { %2196 = vmatpush.bf16.msrb.mxu2 %v5705_v39  ;;  %v5830_v22 = vld [vmem:[#allocation6 + $0x630] sm:$0xf0]  ;;  %v6061_v39 = vor.u32 %v7523_v31, %v6060_v30  ;;  %v7499_v8 = vld [vmem:[#allocation6 + $0x734] sm:$0xf0]  ;;  %v5294_v30 = vld [vmem:[#allocation6 + $0x1f8] sm:$0xf0] }
 0x1bf   :  { %2181 = vmatpush.bf16.msra.mxu1 %v5481_v36  ;;  %2210 = vmatpush.bf16.msrb.mxu3 %v5961_v41  ;;  %v5833_v33 = vor.u32 %v7462_v21, %v5830_v22  ;;  %v7334_v34 = vld [vmem:[#allocation6 + $0x214] sm:$0xf]  ;;  %v5548_v41 = vld [vmem:[#allocation6 + $0x3d8] sm:$0xf]  ;;  %v5965_v18 = vor.u32 %v7499_v8, %v5964_v7  ;;  %v7303_v7 = vld [vmem:[#allocation6 + $0x11c] sm:$0xf] }
 0x1c0   :  { %v5318_v36 = vld [vmem:[#allocation6 + $0x230] sm:$0xf0]  ;;  %v5068_v13 = vld [vmem:[#allocation6 + $0x18] sm:$0xf]  ;;  %v5198_v8 = vld [vmem:[#allocation6 + $0x138] sm:$0xf0] }
 0x1c1   :  { %2172 = vmatpush.bf16.msra.mxu0 %v5065_v50  ;;  %v8206_v47 = vpop.f32.mrf.mxu0  ;;  %v5321_v48 = vor.u32 %v7334_v34, %v5318_v36  ;;  %v5549_v50 = vor.u32 %v7395_v42, %v5548_v41  ;;  %v5452_v19 = vld [vmem:[#allocation6 + $0x318] sm:$0xf]  ;;  %v7319_v42 = vld [vmem:[#allocation6 + $0x19c] sm:$0xf] }
 0x1c2   :  { %2197 = vmatpush.bf16.msrb.mxu2 %v5673_v52  ;;  %v7291_v52 = vld [vmem:[#allocation6 + $0xb4] sm:$0xf0] }
 0x1c3   :  { %2182 = vmatpush.bf16.msra.mxu1 %v5449_v51  ;;  %2211 = vmatpush.bf16.msrb.mxu3 %v5929_v53  ;;  %v5132_v51 = vld [vmem:[#allocation6 + $0x98] sm:$0xf]  ;;  %v5773_v53 = vor.u32 %v7451_v44, %v5772_v43  ;;  %v5262_v43 = vld [vmem:[#allocation6 + $0x1b8] sm:$0xf0] }
 0x1c4   :  { %2173 = vmatmul.bf16.vlgmr.msra.gmra.mxu0 %v8177_v40  ;;  %v5133_v61 = vor.u32 %v7291_v52, %v5132_v51  ;;  %v5676_v21 = vld [vmem:[#allocation6 + $0x4d8] sm:$0xf]  ;;  %v5265_v52 = vor.u32 %v7319_v42, %v5262_v43 }
 0x1c5   :  { %2221 = vmatpush.bf16.msrb.mxu0 %v5293_v57  ;;  %v5740_v57 = vld [vmem:[#allocation6 + $0x558] sm:$0xf] }
 0x1c6   :  { %2198 = vmatpush.bf16.msrb.mxu2 %v5641_v0  ;;  %v7283_v0 = vld [vmem:[#allocation6 + $0x74] sm:$0xf0] }
 0x1c7   :  { %2183 = vmatpush.bf16.msra.mxu1 %v5417_v63  ;;  %2212 = vmatpush.bf16.msrb.mxu3 %v5897_v1  ;;  %v5100_v63 = vld [vmem:[#allocation6 + $0x58] sm:$0xf]  ;;  %v5741_v1 = vor.u32 %v7443_v58, %v5740_v57 }
 0x1c8   :  { %v5101_v10 = vor.u32 %v7283_v0, %v5100_v63  ;;  %v7427_v23 = vld [vmem:[#allocation6 + $0x4f4] sm:$0xf0] }
 0x1c9   :  { %2222 = vmatpush.bf16.msrb.mxu0 %v5261_v5  ;;  %v5708_v5 = vld [vmem:[#allocation6 + $0x518] sm:$0xf] }
 0x1ca   :  { %2199 = vmatpush.bf16.msrb.mxu2 %v5609_v14  ;;  %v7275_v14 = vld [vmem:[#allocation6 + $0x34] sm:$0xf0]  ;;  %v5709_v17 = vor.u32 %v7435_v6, %v5708_v5 }
 0x1cb   :  { %2184 = vmatpush.bf16.msra.mxu1 %v5385_v12  ;;  %2213 = vmatpush.bf16.msrb.mxu3 %v5865_v15  ;;  %v8213_v15 = vpop.f32.mrf.mxu0  ;;  %v5932_v24 = vld [vmem:[#allocation6 + $0x6d8] sm:$0xf]  ;;  %v5069_v31 = vor.u32 %v7275_v14, %v5068_v13 }
 0x1cc   :  { %v7491_v26 = vld [vmem:[#allocation6 + $0x6f4] sm:$0xf0] }
 0x1cd   :  { %2223 = vmatpush.bf16.msrb.mxu0 %v5229_v20  ;;  %v7371_v20 = vld [vmem:[#allocation6 + $0x334] sm:$0xf0]  ;;  %v5933_v34 = vor.u32 %v7491_v26, %v5932_v24 }
 0x1ce   :  { %2200 = vmatpush.bf16.msrb.mxu2 %v5577_v32  ;;  %v5453_v32 = vor.u32 %v7371_v20, %v5452_v19  ;;  %v5644_v36 = vld [vmem:[#allocation6 + $0x498] sm:$0xf] }
 0x1cf   :  { %2185 = vmatpush.bf16.msra.mxu1 %v5353_v29  ;;  %2214 = vmatpush.bf16.msrb.mxu3 %v5833_v33  ;;  %v7327_v29 = vld [vmem:[#allocation6 + $0x1dc] sm:$0xf]  ;;  %v5677_v33 = vor.u32 %v7427_v23, %v5676_v21  ;;  %v7483_v41 = vld [vmem:[#allocation6 + $0x6b4] sm:$0xf0]  ;;  %v5645_v46 = vor.u32 %v7419_v38, %v5644_v36  ;;  %v5201_v23 = vor.u32 %v7303_v7, %v5198_v8 }
 0x1d0   :  { %v5297_v37 = vor.u32 %v7327_v29, %v5294_v30  ;;  %v5612_v51 = vld [vmem:[#allocation6 + $0x458] sm:$0xf]  ;;  %v7295_v30 = vld [vmem:[#allocation6 + $0xdc] sm:$0xf] }
 0x1d1   :  { %2224 = vmatpush.bf16.msrb.mxu0 %v5197_v25  ;;  %2201 = vmatmul.bf16.vlgmr.msrb.gmra.mxu2 %v8180_v9  ;;  %v8211_v12 = vpop.f32.mrf.mxu1  ;;  %v5420_v25 = vld [vmem:[#allocation6 + $0x2d8] sm:$0xf]  ;;  %v5774_v36 = vld [vmem:[#allocation6 + $0x5b8] sm:$0xf0] }
 0x1d2   :  { %2249 = vmatpush.bf16.msra.mxu2 %v5805_v35  ;;  %2215 = vmatmul.bf16.vlgmr.msrb.gmra.mxu3 %v8182_v16  ;;  %v7363_v35 = vld [vmem:[#allocation6 + $0x2f4] sm:$0xf0]  ;;  %v6030_v38 = vld [vmem:[#allocation6 + $0x7b8] sm:$0xf0] }
 0x1d3   :  { %2263 = vmatpush.bf16.msra.mxu3 %v6061_v39  ;;  %2186 = vmatpush.bf16.msra.mxu1 %v5321_v48  ;;  %v8215_v22 = vpop.f32.mrf.mxu2  ;;  %v5900_v39 = vld [vmem:[#allocation6 + $0x698] sm:$0xf]  ;;  %v5421_v44 = vor.u32 %v7363_v35, %v5420_v25  ;;  %v8223_v57 = vpop.f32.mrf.mxu0  ;;  %v5550_v25 = vld [vmem:[#allocation6 + $0x3f8] sm:$0xf0] }
 0x1d4   :  { %v8217_v28 = vpop.f32.mrf.mxu3  ;;  %v5901_v48 = vor.u32 %v7483_v41, %v5900_v39  ;;  %v5868_v55 = vld [vmem:[#allocation6 + $0x658] sm:$0xf]  ;;  %v7447_v35 = vld [vmem:[#allocation6 + $0x59c] sm:$0xf] }
 0x1d5   :  { %2225 = vmatpush.bf16.msrb.mxu0 %v5165_v49  ;;  %v5388_v49 = vld [vmem:[#allocation6 + $0x298] sm:$0xf]  ;;  %v7431_v7 = vld [vmem:[#allocation6 + $0x51c] sm:$0xf] }
 0x1d6   :  { %2250 = vmatpush.bf16.msra.mxu2 %v5773_v53  ;;  %2187 = vmatmul.bf16.vlgmr.msra.gmra.mxu1 %v8186_v27  ;;  %v7475_v56 = vld [vmem:[#allocation6 + $0x674] sm:$0xf0]  ;;  %v7495_v8 = vld [vmem:[#allocation6 + $0x71c] sm:$0xf] }
 0x1d7   :  { %2235 = vmatpush.bf16.msrb.mxu1 %v5549_v50  ;;  %2264 = vmatpush.bf16.msra.mxu3 %v6029_v54  ;;  %v7355_v50 = vld [vmem:[#allocation6 + $0x2b4] sm:$0xf0]  ;;  %v5869_v0 = vor.u32 %v7475_v56, %v5868_v55  ;;  %v5742_v55 = vld [vmem:[#allocation6 + $0x578] sm:$0xf0] }
 0x1d8   :  { %v7411_v54 = vld [vmem:[#allocation6 + $0x474] sm:$0xf0]  ;;  %v7503_v56 = vld [vmem:[#allocation6 + $0x75c] sm:$0xf] }
 0x1d9   :  { %2226 = vmatpush.bf16.msrb.mxu0 %v5133_v61  ;;  %v8219_v45 = vpop.f32.mrf.mxu1  ;;  %v5389_v61 = vor.u32 %v7355_v50, %v5388_v49  ;;  %v5613_v63 = vor.u32 %v7411_v54, %v5612_v51  ;;  %v7403_v3 = vld [vmem:[#allocation6 + $0x434] sm:$0xf0]  ;;  %v7383_v50 = vld [vmem:[#allocation6 + $0x39c] sm:$0xf] }
 0x1da   :  { %2251 = vmatpush.bf16.msra.mxu2 %v5741_v1  ;;  %v7347_v1 = vld [vmem:[#allocation6 + $0x274] sm:$0xf0]  ;;  %v5518_v51 = vld [vmem:[#allocation6 + $0x3b8] sm:$0xf0]  ;;  %v1911_v60 = vadd.f32 %v8219_v45, %v8213_v15  ;;  %v1909_v15 = vadd.f32 %v8211_v12, %v8206_v47 }
 0x1db   :  { %2236 = vmatpush.bf16.msrb.mxu1 %v5517_v62  ;;  %2265 = vmatpush.bf16.msra.mxu3 %v5997_v2  ;;  %v8221_v53 = vpop.f32.mrf.mxu2  ;;  %v5356_v62 = vld [vmem:[#allocation6 + $0x258] sm:$0xf]  ;;  %v8234_v39 = vpop.f32.mrf.mxu0  ;;  %v5710_v45 = vld [vmem:[#allocation6 + $0x538] sm:$0xf0] }
 0x1dc   :  { %v8226_v58 = vpop.f32.mrf.mxu3  ;;  %v5580_v2 = vld [vmem:[#allocation6 + $0x418] sm:$0xf]  ;;  %v5357_v13 = vor.u32 %v7347_v1, %v5356_v62  ;;  %v5521_v62 = vor.u32 %v7383_v50, %v5518_v51  ;;  %v5102_v1 = vld [vmem:[#allocation6 + $0x78] sm:$0xf0] }
 0x1dd   :  { %2227 = vmatpush.bf16.msrb.mxu0 %v5101_v10  ;;  %v5836_v5 = vld [vmem:[#allocation6 + $0x618] sm:$0xf]  ;;  %v7455_v10 = vld [vmem:[#allocation6 + $0x5dc] sm:$0xf]  ;;  %v5581_v19 = vor.u32 %v7403_v3, %v5580_v2  ;;  %v6001_v3 = vor.u32 %v7503_v56, %v5998_v59 }
 0x1de   :  { %2252 = vmatpush.bf16.msra.mxu2 %v5709_v17  ;;  %v7467_v6 = vld [vmem:[#allocation6 + $0x634] sm:$0xf0]  ;;  %v7519_v17 = vld [vmem:[#allocation6 + $0x7dc] sm:$0xf] }
 0x1df   :  { %2237 = vmatpush.bf16.msrb.mxu1 %v5485_v11  ;;  %2266 = vmatpush.bf16.msra.mxu3 %v5965_v18  ;;  %v5806_v11 = vld [vmem:[#allocation6 + $0x5f8] sm:$0xf0]  ;;  %v5837_v20 = vor.u32 %v7467_v6, %v5836_v5  ;;  %v5324_v21 = vld [vmem:[#allocation6 + $0x218] sm:$0xf] }
 0x1e0   :  { %v6062_v18 = vld [vmem:[#allocation6 + $0x7f8] sm:$0xf0]  ;;  %v5809_v24 = vor.u32 %v7455_v10, %v5806_v11  ;;  %v7339_v29 = vld [vmem:[#allocation6 + $0x234] sm:$0xf0]  ;;  %v1925_v11 = vadd.f32 %v8221_v53, %v1911_v60 }
 0x1e1   :  { %2228 = vmatpush.bf16.msrb.mxu0 %v5069_v31  ;;  %v8228_v14 = vpop.f32.mrf.mxu1  ;;  %v5166_v31 = vld [vmem:[#allocation6 + $0xf8] sm:$0xf0]  ;;  %v5325_v41 = vor.u32 %v7339_v29, %v5324_v21  ;;  %v5713_v21 = vor.u32 %v7431_v7, %v5710_v45  ;;  %v1923_v29 = vadd.f32 %v8215_v22, %v1909_v15 }
 0x1e2   :  { %2253 = vmatpush.bf16.msra.mxu2 %v5677_v33  ;;  %v5169_v42 = vor.u32 %v7295_v30, %v5166_v31  ;;  %v7375_v5 = vld [vmem:[#allocation6 + $0x35c] sm:$0xf] }
 0x1e3   :  { %2238 = vmatpush.bf16.msrb.mxu1 %v5453_v32  ;;  %2267 = vmatpush.bf16.msra.mxu3 %v5933_v34  ;;  %v8230_v26 = vpop.f32.mrf.mxu2  ;;  %v6065_v32 = vor.u32 %v7519_v17, %v6062_v18  ;;  %v7391_v34 = vld [vmem:[#allocation6 + $0x3dc] sm:$0xf]  ;;  %v1937_v22 = vadd.f32 %v8217_v28, %v1923_v29 }
 0x1e4   :  { %2229 = vmatmul.bf16.vlgmr.msrb.gmra.mxu0 %v8177_v40  ;;  %v8232_v33 = vpop.f32.mrf.mxu3  ;;  %v5553_v43 = vor.u32 %v7391_v34, %v5550_v25  ;;  %v5486_v6 = vld [vmem:[#allocation6 + $0x378] sm:$0xf0]  ;;  %v1939_v34 = vadd.f32 %v8226_v58, %v1925_v11 }
 0x1e5   :  { %2277 = vmatpush.bf16.msra.mxu0 %v5297_v37  ;;  %v7511_v37 = vld [vmem:[#allocation6 + $0x79c] sm:$0xf]  ;;  %v5489_v17 = vor.u32 %v7375_v5, %v5486_v6 }
 0x1e6   :  { %2254 = vmatpush.bf16.msra.mxu2 %v5645_v46  ;;  %v5134_v46 = vld [vmem:[#allocation6 + $0xb8] sm:$0xf0]  ;;  %v6033_v49 = vor.u32 %v7511_v37, %v6030_v38  ;;  %v2333_v50 = vpack.c.bf16 %v1939_v34, %v1937_v22 }
 0x1e7   :  { %2239 = vmatpush.bf16.msrb.mxu1 %v5421_v44  ;;  %2268 = vmatpush.bf16.msra.mxu3 %v5901_v48  ;;  %v7287_v44 = vld [vmem:[#allocation6 + $0x9c] sm:$0xf]  ;;  %v5777_v48 = vor.u32 %v7447_v35, %v5774_v36 }
 0x1e8   :  { %v5966_v10 = vld [vmem:[#allocation6 + $0x738] sm:$0xf0] }
 0x1e9   :  { %2278 = vmatpush.bf16.msra.mxu0 %v5265_v52  ;;  %v7439_v52 = vld [vmem:[#allocation6 + $0x55c] sm:$0xf]  ;;  %v8238_v54 = vpop.f32.mrf.mxu1 }
 0x1ea   :  { %2255 = vmatpush.bf16.msra.mxu2 %v5613_v63  ;;  %v5745_v2 = vor.u32 %v7439_v52, %v5742_v55  ;;  %v7271_v18 = vld [vmem:[#allocation6 + $0x1c] sm:$0xf] }
 0x1eb   :  { %2240 = vmatpush.bf16.msrb.mxu1 %v5389_v61  ;;  %2269 = vmatpush.bf16.msra.mxu3 %v5869_v0  ;;  %v5137_v61 = vor.u32 %v7287_v44, %v5134_v46  ;;  %v8242_v63 = vpop.f32.mrf.mxu2  ;;  %v7279_v0 = vld [vmem:[#allocation6 + $0x5c] sm:$0xf] }
 0x1ec   :  { %v5454_v47 = vld [vmem:[#allocation6 + $0x338] sm:$0xf0] }
 0x1ed   :  { %2279 = vmatpush.bf16.msra.mxu0 %v5233_v4  ;;  %v8244_v4 = vpop.f32.mrf.mxu3  ;;  %v7423_v12 = vld [vmem:[#allocation6 + $0x4dc] sm:$0xf] }
 0x1ee   :  { %2256 = vmatpush.bf16.msra.mxu2 %v5581_v19  ;;  %v5070_v19 = vld [vmem:[#allocation6 + $0x38] sm:$0xf0] }
 0x1ef   :  { %2241 = vmatpush.bf16.msrb.mxu1 %v5357_v13  ;;  %2270 = vmatpush.bf16.msra.mxu3 %v5837_v20  ;;  %v5105_v13 = vor.u32 %v7279_v0, %v5102_v1  ;;  %v2006_v20 = vpop.f32.mrf.mxu0  ;;  %v5678_v30 = vld [vmem:[#allocation6 + $0x4f8] sm:$0xf0]  ;;  %v5073_v25 = vor.u32 %v7271_v18, %v5070_v19 }
 0x1f0   :  { %v7487_v31 = vld [vmem:[#allocation6 + $0x6dc] sm:$0xf]  ;;  %v5681_v36 = vor.u32 %v7423_v12, %v5678_v30 }
 0x1f1   :  { %2280 = vmatpush.bf16.msra.mxu0 %v5201_v23  ;;  %2257 = vmatmul.bf16.vlgmr.msra.gmra.mxu2 %v8180_v9  ;;  %v5969_v23 = vor.u32 %v7495_v8, %v5966_v10  ;;  %v5646_v46 = vld [vmem:[#allocation6 + $0x4b8] sm:$0xf0] }
 0x1f2   :  { %2305 = vmatpush.bf16.msrb.mxu2 %v5809_v24  ;;  %2271 = vmatmul.bf16.vlgmr.msra.gmra.mxu3 %v8182_v16  ;;  %v7367_v24 = vld [vmem:[#allocation6 + $0x31c] sm:$0xf]  ;;  %v2020_v53 = vpop.f32.mrf.mxu1 }
 0x1f3   :  { %2319 = vmatpush.bf16.msrb.mxu3 %v6065_v32  ;;  %2242 = vmatpush.bf16.msrb.mxu1 %v5325_v41  ;;  %v5934_v32 = vld [vmem:[#allocation6 + $0x6f8] sm:$0xf0]  ;;  %v5457_v35 = vor.u32 %v7367_v24, %v5454_v47  ;;  %v2021_v58 = vadd.f32 %v2020_v53, %v2006_v20 }
 0x1f4   :  { %v5937_v37 = vor.u32 %v7487_v31, %v5934_v32  ;;  %v2034_v38 = vpop.f32.mrf.mxu2  ;;  %v7359_v41 = vld [vmem:[#allocation6 + $0x2dc] sm:$0xf] }
 0x1f5   :  { %2281 = vmatpush.bf16.msra.mxu0 %v5169_v42  ;;  %v5422_v42 = vld [vmem:[#allocation6 + $0x2f8] sm:$0xf0] }
 0x1f6   :  { %2306 = vmatpush.bf16.msrb.mxu2 %v5777_v48  ;;  %2243 = vmatmul.bf16.vlgmr.msrb.gmra.mxu1 %v8186_v27  ;;  %v7479_v48 = vld [vmem:[#allocation6 + $0x69c] sm:$0xf]  ;;  %v5425_v51 = vor.u32 %v7359_v41, %v5422_v42 }
 0x1f7   :  { %2291 = vmatpush.bf16.msra.mxu1 %v5553_v43  ;;  %2320 = vmatpush.bf16.msrb.mxu3 %v6033_v49  ;;  %v7415_v43 = vld [vmem:[#allocation6 + $0x49c] sm:$0xf]  ;;  %v2048_v44 = vpop.f32.mrf.mxu3  ;;  %v2008_v0 = vpop.f32.mrf.mxu0 }
 0x1f8   :  { %v5902_v49 = vld [vmem:[#allocation6 + $0x6b8] sm:$0xf0]  ;;  %v5649_v52 = vor.u32 %v7415_v43, %v5646_v46 }
 0x1f9   :  { %2282 = vmatpush.bf16.msra.mxu0 %v5137_v61  ;;  %v5905_v55 = vor.u32 %v7479_v48, %v5902_v49  ;;  %v7351_v56 = vld [vmem:[#allocation6 + $0x29c] sm:$0xf] }
 0x1fa   :  { %2307 = vmatpush.bf16.msrb.mxu2 %v5745_v2  ;;  %v5390_v59 = vld [vmem:[#allocation6 + $0x2b8] sm:$0xf0]  ;;  %v2022_v1 = vpop.f32.mrf.mxu1  ;;  %v1967_v2 = vadd.f32 %v8238_v54, %v8234_v39 }
 0x1fb   :  { %2292 = vmatpush.bf16.msra.mxu1 %v5521_v62  ;;  %2321 = vmatpush.bf16.msrb.mxu3 %v6001_v3  ;;  %v7407_v60 = vld [vmem:[#allocation6 + $0x45c] sm:$0xf]  ;;  %v2035_v3 = vadd.f32 %v2034_v38, %v2021_v58  ;;  %v2023_v5 = vadd.f32 %v2022_v1, %v2008_v0  ;;  %v5393_v6 = vor.u32 %v7351_v56, %v5390_v59 }
 0x1fc   :  { %v5614_v61 = vld [vmem:[#allocation6 + $0x478] sm:$0xf0]  ;;  %v2036_v45 = vpop.f32.mrf.mxu2  ;;  %v1981_v54 = vadd.f32 %v8242_v63, %v1967_v2 }
 0x1fd   :  { %2283 = vmatpush.bf16.msra.mxu0 %v5105_v13  ;;  %v7471_v62 = vld [vmem:[#allocation6 + $0x65c] sm:$0xf]  ;;  %v5617_v7 = vor.u32 %v7407_v60, %v5614_v61  ;;  %v1965_v13 = vadd.f32 %v8228_v14, %v8223_v57  ;;  %v2049_v20 = vadd.f32 %v2048_v44, %v2035_v3 }
 0x1fe   :  { %2308 = vmatpush.bf16.msrb.mxu2 %v5713_v21  ;;  %v5870_v28 = vld [vmem:[#allocation6 + $0x678] sm:$0xf0]  ;;  %v1995_v14 = vadd.f32 %v8244_v4, %v1981_v54  ;;  %v7550_v54 = vld [vmem:[#allocation9 + $0xcc] sm:$0xf0] }
 0x1ff   :  { %2293 = vmatpush.bf16.msra.mxu1 %v5489_v17  ;;  %2322 = vmatpush.bf16.msrb.mxu3 %v5969_v23  ;;  %v5873_v15 = vor.u32 %v7471_v62, %v5870_v28  ;;  %v7343_v8 = vld [vmem:[#allocation6 + $0x25c] sm:$0xf]  ;;  %v2050_v39 = vpop.f32.mrf.mxu3  ;;  %v1979_v12 = vadd.f32 %v8230_v26, %v1965_v13  ;;  %v8264_v26 = vld [vmem:[#allocation2] sm:$0xff] }
 0x200   :  { %v5358_v10 = vld [vmem:[#allocation6 + $0x278] sm:$0xf0] }
 0x201   :  { %2284 = vmatpush.bf16.msra.mxu0 %v5073_v25  ;;  %v7399_v11 = vld [vmem:[#allocation6 + $0x41c] sm:$0xf]  ;;  %v5361_v23 = vor.u32 %v7343_v8, %v5358_v10  ;;  %v1993_v63 = vadd.f32 %v8232_v33, %v1979_v12  ;;  %v2062_v4 = vpop.f32.mrf.mxu0  ;;  %v6188_v10 = vld [vmem:[#allocation9 + $0xe0] sm:$0xf]  ;;  %v7542_v12 = vld [vmem:[#allocation9 + $0x8c] sm:$0xf0] }
 0x202   :  { %2309 = vmatpush.bf16.msrb.mxu2 %v5681_v36  ;;  %v5582_v17 = vld [vmem:[#allocation6 + $0x438] sm:$0xf0] }
 0x203   :  { %2294 = vmatpush.bf16.msra.mxu1 %v5457_v35  ;;  %2323 = vmatpush.bf16.msrb.mxu3 %v5937_v37  ;;  %v7463_v18 = vld [vmem:[#allocation6 + $0x61c] sm:$0xf]  ;;  %v5585_v24 = vor.u32 %v7399_v11, %v5582_v17  ;;  %v2334_v32 = vpack.c.bf16 %v1995_v14, %v1993_v63  ;;  %v7554_v11 = vld [vmem:[#allocation9 + $0xec] sm:$0xf0] }
 0x204   :  { %2285 = vmatmul.bf16.vlgmr.msra.gmra.mxu0 %v8177_v40  ;;  %v2037_v40 = vadd.f32 %v2036_v45, %v2023_v5  ;;  %v5838_v19 = vld [vmem:[#allocation6 + $0x638] sm:$0xf0]  ;;  %v7538_v14 = vld [vmem:[#allocation9 + $0x6c] sm:$0xf0] }
 0x205   :  { %2366 = vmatpush.bf16.msrb.mxu0 %v2333_v50  ;;  %v5841_v47 = vor.u32 %v7463_v18, %v5838_v19  ;;  %v7335_v30 = vld [vmem:[#allocation6 + $0x21c] sm:$0xf] }
 0x206   :  { %2310 = vmatpush.bf16.msrb.mxu2 %v5649_v52  ;;  %v2051_v21 = vadd.f32 %v2050_v39, %v2037_v40  ;;  %v5326_v57 = vld [vmem:[#allocation6 + $0x238] sm:$0xf0]  ;;  %v6189_v40 = vor.u32 %v7554_v11, %v6188_v10  ;;  %v6172_v39 = vld [vmem:[#allocation9 + $0xc0] sm:$0xf] }
 0x207   :  { %2295 = vmatpush.bf16.msra.mxu1 %v5425_v51  ;;  %2324 = vmatpush.bf16.msrb.mxu3 %v5905_v55  ;;  %v5329_v31 = vor.u32 %v7335_v30, %v5326_v57  ;;  %v6124_v57 = vld [vmem:[#allocation9 + $0x60] sm:$0xf] }
 0x208   :  { %v2335_v29 = vpack.c.bf16 %v2051_v21, %v2049_v20  ;;  %v6173_v20 = vor.u32 %v7550_v54, %v6172_v39  ;;  %v6156_v21 = vld [vmem:[#allocation9 + $0xa0] sm:$0xf]  ;;  %v7570_v39 = vld [vmem:[#allocation9 + $0x16c] sm:$0xf0] }
 0x209   :  { %v6652_v11 = vld [vmem:[#allocation9 + $0x480] sm:$0xf] }
 0x20a   :  { %2311 = vmatpush.bf16.msrb.mxu2 %v5617_v7  ;;  %v6636_v54 = vld [vmem:[#allocation9 + $0x460] sm:$0xf] }
 0x20b   :  { %2296 = vmatpush.bf16.msra.mxu1 %v5393_v6  ;;  %2325 = vmatpush.bf16.msrb.mxu3 %v5873_v15 }
 0x20e   :  { %2312 = vmatpush.bf16.msrb.mxu2 %v5585_v24  ;;  %v6140_v24 = vld [vmem:[#allocation9 + $0x80] sm:$0xf] }
 0x20f   :  { %2297 = vmatpush.bf16.msra.mxu1 %v5361_v23  ;;  %2326 = vmatpush.bf16.msrb.mxu3 %v5841_v47  ;;  %v7546_v23 = vld [vmem:[#allocation9 + $0xac] sm:$0xf0] }
 0x210   :  { %v6157_v47 = vor.u32 %v7546_v23, %v6156_v21  ;;  %v8285_v23 = vld [vmem:[#allocation7] sm:$0xff] }
 0x211   :  { %2313 = vmatmul.bf16.vlgmr.msrb.gmra.mxu2 %v8180_v9  ;;  %v2064_v9 = vpop.f32.mrf.mxu0 }
 0x212   :  { %2394 = vmatpush.bf16.msra.mxu2 %v2335_v29  ;;  %2327 = vmatmul.bf16.vlgmr.msrb.gmra.mxu3 %v8182_v16  ;;  %v6141_v29 = vor.u32 %v7542_v12, %v6140_v24  ;;  %v7566_v12 = vld [vmem:[#allocation9 + $0x14c] sm:$0xf0] }
 0x213   :  { %2298 = vmatpush.bf16.msra.mxu1 %v5329_v31  ;;  %v2076_v53 = vpop.f32.mrf.mxu1  ;;  %v6125_v31 = vor.u32 %v7538_v14, %v6124_v57  ;;  %v2343_v57 = vperm.slane %v8285_v23, 0 }
 0x214   :  { %6066 = vmatmul.msk.bf16.vlgmr.msrb.gmra.mxu0 %vm277_vm2, %v8264_v26  ;;  %v2090_v34 = vpop.f32.mrf.mxu2  ;;  %v2077_v33 = vadd.f32 %v2076_v53, %v2062_v4  ;;  %v7534_v4 = vld [vmem:[#allocation9 + $0x4c] sm:$0xf0] }
 0x215   :  { %v2104_v25 = vpop.f32.mrf.mxu3 }
 0x216   :  { %2299 = vmatmul.bf16.vlgmr.msra.gmra.mxu1 %v8186_v27  ;;  %v2091_v16 = vadd.f32 %v2090_v34, %v2077_v33 }
 0x217   :  { %2380 = vmatpush.bf16.msrb.mxu1 %v2334_v32  ;;  %v6108_v32 = vld [vmem:[#allocation9 + $0x40] sm:$0xf] }
 0x218   :  { %v2105_v42 = vadd.f32 %v2104_v25, %v2091_v16  ;;  %v6109_v25 = vor.u32 %v7534_v4, %v6108_v32  ;;  %v7530_v16 = vld [vmem:[#allocation9 + $0x2c] sm:$0xf0] }
 0x219   :  { %v7618_v32 = vld [vmem:[#allocation9 + $0x2ec] sm:$0xf0] }
 0x21b   :  { %v2078_v35 = vpop.f32.mrf.mxu1 }
 0x21c   :  { %v2079_v36 = vadd.f32 %v2078_v35, %v2064_v9  ;;  %v2092_v37 = vpop.f32.mrf.mxu2  ;;  %v6092_v35 = vld [vmem:[#allocation9 + $0x20] sm:$0xf] }
 0x21d   :  { %v2106_v41 = vpop.f32.mrf.mxu3 }
 0x21e   :  { %v2093_v38 = vadd.f32 %v2092_v37, %v2079_v36  ;;  %v6093_v36 = vor.u32 %v7530_v16, %v6092_v35  ;;  %v7658_v35 = vld [vmem:[#allocation9 + $0x42c] sm:$0xf0]  ;;  %v6428_v16 = vld [vmem:[#allocation9 + $0x2c0] sm:$0xf] }
 0x220   :  { %v2107_v27 = vadd.f32 %v2106_v41, %v2093_v38 }
 0x221   :  { %6068 = vmatmul.msk.bf16.vlgmr.msra.gmra.mxu2 %vm277_vm2, %v8264_v26  ;;  %v2118_v22 = vpop.f32.mrf.mxu0 }
 0x222   :  { %v2336_v43 = vpack.c.bf16 %v2107_v27, %v2105_v42  ;;  %v6076_v42 = vld [vmem:[#allocation9] sm:$0xf]  ;;  %v7526_v27 = vld [vmem:[#allocation9 + $0xc] sm:$0xf0] }
 0x224   :  { %2408 = vmatpush.bf16.msra.mxu3 %v2336_v43 }
 0x226   :  { %6067 = vmatmul.msk.bf16.vlgmr.msrb.gmra.mxu1 %vm277_vm2, %v8264_v26 }
 0x227   :  { %6069 = vmatmul.msk.bf16.vlgmr.msra.gmra.mxu3 %vm277_vm2, %v8264_v26 }
 0x229   :  { %v2120_v50 = vpop.f32.mrf.mxu0 }
 0x233   :  { %v2132_v44 = vpop.f32.mrf.mxu1 }
 0x234   :  { %v2146_v46 = vpop.f32.mrf.mxu2  ;;  %v2133_v49 = vadd.f32 %v2132_v44, %v2118_v22  ;;  %v6077_v22 = vor.u32 %v7526_v27, %v6076_v42  ;;  %v6316_v44 = vld [vmem:[#allocation9 + $0x1e0] sm:$0xf] }
 0x235   :  { %v2160_v48 = vpop.f32.mrf.mxu3 }
 0x236   :  { %v2147_v51 = vadd.f32 %v2146_v46, %v2133_v49  ;;  %v7586_v46 = vld [vmem:[#allocation9 + $0x1ec] sm:$0xf0] }
 0x238   :  { %v2161_v60 = vadd.f32 %v2160_v48, %v2147_v51  ;;  %v6700_v48 = vld [vmem:[#allocation9 + $0x4e0] sm:$0xf] }
 0x23b   :  { %v2134_v58 = vpop.f32.mrf.mxu1 }
 0x23c   :  { %v2135_v52 = vadd.f32 %v2134_v58, %v2120_v50  ;;  %v2148_v55 = vpop.f32.mrf.mxu2  ;;  %v6317_v50 = vor.u32 %v7586_v46, %v6316_v44  ;;  %v7682_v58 = vld [vmem:[#allocation9 + $0x4ec] sm:$0xf0]  ;;  %v6588_v46 = vld [vmem:[#allocation9 + $0x400] sm:$0xf] }
 0x23d   :  { %v2162_v59 = vpop.f32.mrf.mxu3  ;;  %v7558_v44 = vld [vmem:[#allocation9 + $0x10c] sm:$0xf0] }
 0x23e   :  { %v2149_v56 = vadd.f32 %v2148_v55, %v2135_v52  ;;  %v6701_v52 = vor.u32 %v7682_v58, %v6700_v48  ;;  %v7714_v58 = vld [vmem:[#allocation9 + $0x5ec] sm:$0xf0] }
 0x240   :  { %v2163_v61 = vadd.f32 %v2162_v59, %v2149_v56 }
 0x241   :  { %v2174_v28 = vpop.f32.mrf.mxu0 }
 0x242   :  { %v2337_v62 = vpack.c.bf16 %v2163_v61, %v2161_v60  ;;  %v6300_v60 = vld [vmem:[#allocation9 + $0x1c0] sm:$0xf]  ;;  %v7582_v61 = vld [vmem:[#allocation9 + $0x1cc] sm:$0xf0] }
 0x244   :  { %2422 = vmatpush.bf16.msra.mxu0 %v2337_v62  ;;  %v6684_v62 = vld [vmem:[#allocation9 + $0x4c0] sm:$0xf] }
 0x247   :  { %6070 = vmatmul.msk.bf16.vlgmr.msra.gmra.mxu0 %vm277_vm2, %v8264_v26 }
 0x248   :  { %4031 = vmatpush.bf16.msrb.mxu0 %v6189_v40 }
 0x249   :  { %v2176_v5 = vpop.f32.mrf.mxu0 }
 0x24c   :  { %4032 = vmatpush.bf16.msrb.mxu0 %v6173_v20  ;;  %v7666_v20 = vld [vmem:[#allocation9 + $0x46c] sm:$0xf0] }
 0x24d   :  { %v6637_v24 = vor.u32 %v7666_v20, %v6636_v54 }
 0x250   :  { %4033 = vmatpush.bf16.msrb.mxu0 %v6157_v47  ;;  %v6236_v47 = vld [vmem:[#allocation9 + $0x140] sm:$0xf] }
 0x253   :  { %v2188_v0 = vpop.f32.mrf.mxu1 }
 0x254   :  { %v2202_v1 = vpop.f32.mrf.mxu2  ;;  %v2189_v3 = vadd.f32 %v2188_v0, %v2174_v28  ;;  %4034 = vmatpush.bf16.msrb.mxu0 %v6141_v29  ;;  %v6301_v0 = vor.u32 %v7582_v61, %v6300_v60  ;;  %v6620_v29 = vld [vmem:[#allocation9 + $0x440] sm:$0xf] }
 0x255   :  { %v2216_v2 = vpop.f32.mrf.mxu3 }
 0x256   :  { %v2203_v7 = vadd.f32 %v2202_v1, %v2189_v3  ;;  %v7678_v1 = vld [vmem:[#allocation9 + $0x4cc] sm:$0xf0]  ;;  %v6284_v3 = vld [vmem:[#allocation9 + $0x1a0] sm:$0xf] }
 0x258   :  { %v2217_v17 = vadd.f32 %v2216_v2, %v2203_v7  ;;  %4035 = vmatpush.bf16.msrb.mxu0 %v6125_v31  ;;  %v6685_v2 = vor.u32 %v7678_v1, %v6684_v62  ;;  %v6237_v31 = vor.u32 %v7566_v12, %v6236_v47  ;;  %v6780_v12 = vld [vmem:[#allocation9 + $0x580] sm:$0xf] }
 0x25b   :  { %v2190_v6 = vpop.f32.mrf.mxu1 }
 0x25c   :  { %v2191_v15 = vadd.f32 %v2190_v6, %v2176_v5  ;;  %v2204_v45 = vpop.f32.mrf.mxu2  ;;  %4036 = vmatpush.bf16.msrb.mxu0 %v6109_v25  ;;  %v7578_v5 = vld [vmem:[#allocation9 + $0x1ac] sm:$0xf0]  ;;  %v6668_v6 = vld [vmem:[#allocation9 + $0x4a0] sm:$0xf] }
 0x25d   :  { %v2218_v13 = vpop.f32.mrf.mxu3  ;;  %v6285_v7 = vor.u32 %v7578_v5, %v6284_v3  ;;  %v7562_v25 = vld [vmem:[#allocation9 + $0x12c] sm:$0xf0]  ;;  %v6812_v3 = vld [vmem:[#allocation9 + $0x5c0] sm:$0xf] }
 0x25e   :  { %v2205_v8 = vadd.f32 %v2204_v45, %v2191_v15  ;;  %v7674_v15 = vld [vmem:[#allocation9 + $0x4ac] sm:$0xf0]  ;;  %v6268_v45 = vld [vmem:[#allocation9 + $0x180] sm:$0xf] }
 0x25f   :  { %v6669_v10 = vor.u32 %v7674_v15, %v6668_v6 }
 0x260   :  { %v2219_v18 = vadd.f32 %v2218_v13, %v2205_v8  ;;  %4037 = vmatpush.bf16.msrb.mxu0 %v6093_v36  ;;  %v7574_v8 = vld [vmem:[#allocation9 + $0x18c] sm:$0xf0] }
 0x261   :  { %v2230_v30 = vpop.f32.mrf.mxu0  ;;  %v7670_v13 = vld [vmem:[#allocation9 + $0x48c] sm:$0xf0] }
 0x262   :  { %v2338_v19 = vpack.c.bf16 %v2219_v18, %v2217_v17  ;;  %v6269_v17 = vor.u32 %v7574_v8, %v6268_v45  ;;  %v6653_v18 = vor.u32 %v7670_v13, %v6652_v11  ;;  %v7614_v36 = vld [vmem:[#allocation9 + $0x2cc] sm:$0xf0]  ;;  %v7548_v11 = vld [vmem:[#allocation9 + $0xc4] sm:$0xf]  ;;  %v6174_v13 = vld [vmem:[#allocation9 + $0xd0] sm:$0xf0] }
 0x263   :  { %v6177_v54 = vor.u32 %v7548_v11, %v6174_v13  ;;  %v6318_v11 = vld [vmem:[#allocation9 + $0x1f0] sm:$0xf0] }
 0x264   :  { %2436 = vmatpush.bf16.msra.mxu1 %v2338_v19  ;;  %4038 = vmatpush.bf16.msrb.mxu0 %v6077_v22  ;;  %v6252_v19 = vld [vmem:[#allocation9 + $0x160] sm:$0xf] }
 0x265   :  { %v6253_v21 = vor.u32 %v7570_v39, %v6252_v19  ;;  %v6204_v22 = vld [vmem:[#allocation9 + $0x100] sm:$0xf]  ;;  %v7706_v39 = vld [vmem:[#allocation9 + $0x5ac] sm:$0xf0] }
 0x266   :  { %v6796_v19 = vld [vmem:[#allocation9 + $0x5a0] sm:$0xf] }
 0x267   :  { %6071 = vmatmul.msk.bf16.vlgmr.msra.gmra.mxu1 %vm277_vm2, %v8264_v26  ;;  %v6797_v20 = vor.u32 %v7706_v39, %v6796_v19  ;;  %v7594_v19 = vld [vmem:[#allocation9 + $0x22c] sm:$0xf0] }
 0x268   :  { %4045 = vmatpush.bf16.msrb.mxu1 %v6317_v50  ;;  %4087 = vmatpush.bf16.msra.mxu0 %v6701_v52  ;;  %v6828_v50 = vld [vmem:[#allocation9 + $0x5e0] sm:$0xf]  ;;  %v6205_v52 = vor.u32 %v7558_v44, %v6204_v22  ;;  %v7694_v22 = vld [vmem:[#allocation9 + $0x54c] sm:$0xf0] }
 0x269   :  { %v2232_v33 = vpop.f32.mrf.mxu0  ;;  %v6829_v62 = vor.u32 %v7714_v58, %v6828_v50 }
 0x26c   :  { %4046 = vmatpush.bf16.msrb.mxu1 %v6301_v0  ;;  %4088 = vmatpush.bf16.msra.mxu0 %v6685_v2  ;;  %v6190_v0 = vld [vmem:[#allocation9 + $0xf0] sm:$0xf0] }
 0x270   :  { %4047 = vmatpush.bf16.msrb.mxu1 %v6285_v7  ;;  %4089 = vmatpush.bf16.msra.mxu0 %v6669_v10 }
 0x273   :  { %v2244_v63 = vpop.f32.mrf.mxu1 }
 0x274   :  { %v2258_v53 = vpop.f32.mrf.mxu2  ;;  %v2245_v9 = vadd.f32 %v2244_v63, %v2230_v30  ;;  %4048 = vmatpush.bf16.msrb.mxu1 %v6269_v17  ;;  %4090 = vmatpush.bf16.msra.mxu0 %v6653_v18  ;;  %v7662_v30 = vld [vmem:[#allocation9 + $0x44c] sm:$0xf0]  ;;  %v6444_v63 = vld [vmem:[#allocation9 + $0x2e0] sm:$0xf] }
 0x275   :  { %v2272_v34 = vpop.f32.mrf.mxu3 }
 0x276   :  { %v2259_v38 = vadd.f32 %v2258_v53, %v2245_v9  ;;  %v6621_v53 = vor.u32 %v7662_v30, %v6620_v29  ;;  %v6445_v9 = vor.u32 %v7618_v32, %v6444_v63  ;;  %v7702_v29 = vld [vmem:[#allocation9 + $0x58c] sm:$0xf0]  ;;  %v6142_v63 = vld [vmem:[#allocation9 + $0x90] sm:$0xf0] }
 0x278   :  { %v2273_v55 = vadd.f32 %v2272_v34, %v2259_v38  ;;  %4049 = vmatpush.bf16.msrb.mxu1 %v6253_v21  ;;  %4091 = vmatpush.bf16.msra.mxu0 %v6637_v24  ;;  %v6220_v34 = vld [vmem:[#allocation9 + $0x120] sm:$0xf]  ;;  %v7544_v21 = vld [vmem:[#allocation9 + $0xa4] sm:$0xf]  ;;  %v6158_v24 = vld [vmem:[#allocation9 + $0xb0] sm:$0xf0] }
 0x279   :  { %v6221_v42 = vor.u32 %v7562_v25, %v6220_v34  ;;  %v6161_v30 = vor.u32 %v7544_v21, %v6158_v24  ;;  %v7610_v34 = vld [vmem:[#allocation9 + $0x2ac] sm:$0xf0]  ;;  %v6332_v21 = vld [vmem:[#allocation9 + $0x200] sm:$0xf] }
 0x27a   :  { %v7590_v24 = vld [vmem:[#allocation9 + $0x20c] sm:$0xf0] }
 0x27b   :  { %v2246_v37 = vpop.f32.mrf.mxu1 }
 0x27c   :  { %v2247_v41 = vadd.f32 %v2246_v37, %v2232_v33  ;;  %v2260_v43 = vpop.f32.mrf.mxu2  ;;  %v6604_v33 = vld [vmem:[#allocation9 + $0x420] sm:$0xf]  ;;  %4050 = vmatpush.bf16.msrb.mxu1 %v6237_v31  ;;  %4092 = vmatpush.bf16.msra.mxu0 %v6621_v53  ;;  %v7540_v31 = vld [vmem:[#allocation9 + $0x84] sm:$0xf] }
 0x27d   :  { %v2274_v51 = vpop.f32.mrf.mxu3  ;;  %v6145_v32 = vor.u32 %v7540_v31, %v6142_v63  ;;  %v6412_v53 = vld [vmem:[#allocation9 + $0x2a0] sm:$0xf]  ;;  %v7576_v63 = vld [vmem:[#allocation9 + $0x1a4] sm:$0xf] }
 0x27e   :  { %v2261_v49 = vadd.f32 %v2260_v43, %v2247_v41  ;;  %v6429_v41 = vor.u32 %v7614_v36, %v6428_v16  ;;  %v6605_v43 = vor.u32 %v7658_v35, %v6604_v33  ;;  %v6413_v25 = vor.u32 %v7610_v34, %v6412_v53  ;;  %v6764_v33 = vld [vmem:[#allocation9 + $0x560] sm:$0xf]  ;;  %v7536_v35 = vld [vmem:[#allocation9 + $0x64] sm:$0xf]  ;;  %v6126_v36 = vld [vmem:[#allocation9 + $0x70] sm:$0xf0] }
 0x27f   :  { %v6556_v53 = vld [vmem:[#allocation9 + $0x3c0] sm:$0xf]  ;;  %v7646_v34 = vld [vmem:[#allocation9 + $0x3cc] sm:$0xf0] }
 0x280   :  { %v2275_v56 = vadd.f32 %v2274_v51, %v2261_v49  ;;  %v7654_v49 = vld [vmem:[#allocation9 + $0x40c] sm:$0xf0]  ;;  %4051 = vmatpush.bf16.msrb.mxu1 %v6221_v42  ;;  %4093 = vmatpush.bf16.msra.mxu0 %v6605_v43  ;;  %v6129_v42 = vor.u32 %v7536_v35, %v6126_v36  ;;  %v6748_v43 = vld [vmem:[#allocation9 + $0x540] sm:$0xf]  ;;  %v7572_v35 = vld [vmem:[#allocation9 + $0x184] sm:$0xf] }
 0x281   :  { %v8279_v59 = vpop.f32.mrf.mxu0  ;;  %v6589_v61 = vor.u32 %v7654_v49, %v6588_v46  ;;  %v6749_v46 = vor.u32 %v7694_v22, %v6748_v43  ;;  %v6110_v49 = vld [vmem:[#allocation9 + $0x50] sm:$0xf0]  ;;  %v7568_v22 = vld [vmem:[#allocation9 + $0x164] sm:$0xf] }
 0x282   :  { %v2339_v28 = vpack.c.bf16 %v2275_v56, %v2273_v55 }
 0x284   :  { %2450 = vmatpush.bf16.msrb.mxu2 %v2339_v28  ;;  %v7552_v28 = vld [vmem:[#allocation9 + $0xe4] sm:$0xf]  ;;  %4052 = vmatpush.bf16.msrb.mxu1 %v6205_v52  ;;  %v6380_v52 = vld [vmem:[#allocation9 + $0x260] sm:$0xf] }
 0x285   :  { %v6193_v15 = vor.u32 %v7552_v28, %v6190_v0  ;;  %4094 = vmatpush.bf16.msra.mxu0 %v6589_v61  ;;  %v7690_v61 = vld [vmem:[#allocation9 + $0x52c] sm:$0xf0]  ;;  %v6094_v0 = vld [vmem:[#allocation9 + $0x30] sm:$0xf0] }
 0x287   :  { %6072 = vmatmul.msk.bf16.vlgmr.msrb.gmra.mxu2 %vm277_vm2, %v8264_v26 }
 0x288   :  { %4059 = vmatpush.bf16.msra.mxu2 %v6445_v9  ;;  %4101 = vmatpush.bf16.msra.mxu1 %v6829_v62  ;;  %v7698_v9 = vld [vmem:[#allocation9 + $0x56c] sm:$0xf0]  ;;  %v7528_v62 = vld [vmem:[#allocation9 + $0x24] sm:$0xf] }
 0x289   :  { %v8283_v40 = vpop.f32.mrf.mxu0  ;;  %v6765_v16 = vor.u32 %v7698_v9, %v6764_v33  ;;  %v6557_v33 = vor.u32 %v7646_v34, %v6556_v53  ;;  %v7742_v9 = vld [vmem:[#allocation9 + $0x6cc] sm:$0xf0]  ;;  %v7676_v34 = vld [vmem:[#allocation9 + $0x4c4] sm:$0xf] }
 0x28c   :  { %4060 = vmatpush.bf16.msra.mxu2 %v6429_v41 }
 0x290   :  { %4061 = vmatpush.bf16.msra.mxu2 %v6413_v25  ;;  %v6940_v25 = vld [vmem:[#allocation9 + $0x6c0] sm:$0xf] }
 0x291   :  { %v2368_v14 = vpop.f32.mrf.mxu0  ;;  %v6941_v36 = vor.u32 %v7742_v9, %v6940_v25  ;;  %v6686_v25 = vld [vmem:[#allocation9 + $0x4d0] sm:$0xf0]  ;;  %v6476_v9 = vld [vmem:[#allocation9 + $0x320] sm:$0xf] }
 0x292   :  { %v2369_v27 = vadd.f32 %v2368_v14, %v2343_v57  ;;  %v6781_v14 = vor.u32 %v7702_v29, %v6780_v12  ;;  %v6333_v12 = vor.u32 %v7590_v24, %v6332_v21  ;;  %v7650_v29 = vld [vmem:[#allocation9 + $0x3ec] sm:$0xf0]  ;;  %v6876_v21 = vld [vmem:[#allocation9 + $0x640] sm:$0xf] }
 0x293   :  { %v2300_v4 = vpop.f32.mrf.mxu1 }
 0x294   :  { %v2314_v37 = vpop.f32.mrf.mxu2  ;;  %v2301_v48 = vadd.f32 %v2300_v4, %v8279_v59  ;;  %v2471_v56 = vmax.f32 %v2369_v27, 0.0  ;;  %v7710_v59 = vld [vmem:[#allocation9 + $0x5cc] sm:$0xf0] }
 0x295   :  { %v2328_v38 = vpop.f32.mrf.mxu3  ;;  %v6813_v10 = vor.u32 %v7710_v59, %v6812_v3  ;;  %v7598_v3 = vld [vmem:[#allocation9 + $0x24c] sm:$0xf0] }
 0x296   :  { %v2315_v1 = vadd.f32 %v2314_v37, %v2301_v48  ;;  %v6396_v37 = vld [vmem:[#allocation9 + $0x280] sm:$0xf]  ;;  %v7532_v48 = vld [vmem:[#allocation9 + $0x44] sm:$0xf] }
 0x297   :  { %4102 = vmatpush.bf16.msra.mxu1 %v6813_v10  ;;  %v6113_v58 = vor.u32 %v7532_v48, %v6110_v49  ;;  %v7584_v10 = vld [vmem:[#allocation9 + $0x1e4] sm:$0xf] }
 0x298   :  { %v2329_v17 = vadd.f32 %v2328_v38, %v2315_v1  ;;  %v7606_v38 = vld [vmem:[#allocation9 + $0x28c] sm:$0xf0]  ;;  %v6097_v1 = vor.u32 %v7528_v62, %v6094_v0 }
 0x299   :  { %v2370_v51 = vpop.f32.mrf.mxu0  ;;  %v6397_v27 = vor.u32 %v7606_v38, %v6396_v37  ;;  %v6540_v38 = vld [vmem:[#allocation9 + $0x3a0] sm:$0xf] }
 0x29a   :  { %v2371_v60 = vadd.f32 %v2370_v51, %v2343_v57  ;;  %v2344_v57 = vperm.slane %v8285_v23, 1 }
 0x29b   :  { %v2302_v55 = vpop.f32.mrf.mxu1  ;;  %4103 = vmatpush.bf16.msra.mxu1 %v6797_v20  ;;  %4062 = vmatpush.bf16.msra.mxu2 %v6397_v27  ;;  %v7738_v27 = vld [vmem:[#allocation9 + $0x6ac] sm:$0xf0] }
 0x29c   :  { %v2303_v2 = vadd.f32 %v2302_v55, %v8283_v40  ;;  %v2316_v5 = vpop.f32.mrf.mxu2  ;;  %v2479_v6 = vmax.f32 %v2371_v60, 0.0  ;;  %v7602_v55 = vld [vmem:[#allocation9 + $0x26c] sm:$0xf0]  ;;  %v6732_v60 = vld [vmem:[#allocation9 + $0x520] sm:$0xf] }
 0x29d   :  { %v2330_v45 = vpop.f32.mrf.mxu3  ;;  %v6733_v28 = vor.u32 %v7690_v61, %v6732_v60  ;;  %v7734_v60 = vld [vmem:[#allocation9 + $0x68c] sm:$0xf0]  ;;  %v7564_v61 = vld [vmem:[#allocation9 + $0x144] sm:$0xf] }
 0x29e   :  { %v2317_v7 = vadd.f32 %v2316_v5, %v2303_v2  ;;  %v8290_v8 = vpack.c.bf16 %v2479_v6, %v2471_v56  ;;  %v6381_v56 = vor.u32 %v7602_v55, %v6380_v52  ;;  %v6364_v2 = vld [vmem:[#allocation9 + $0x240] sm:$0xf]  ;;  %v7686_v6 = vld [vmem:[#allocation9 + $0x50c] sm:$0xf0] }
 0x29f   :  { %4104 = vmatpush.bf16.msra.mxu1 %v6781_v14  ;;  %v6365_v59 = vor.u32 %v7598_v3, %v6364_v2  ;;  %v6716_v5 = vld [vmem:[#allocation9 + $0x500] sm:$0xf] }
 0x2a0   :  { %v2331_v18 = vadd.f32 %v2330_v45, %v2317_v7  ;;  %4039 = vmatmul.bf16.vlgmr.msrb.gmra.mxu0 %v8290_v8  ;;  %4063 = vmatpush.bf16.msra.mxu2 %v6381_v56  ;;  %v7524_v7 = vld [vmem:[#allocation9 + $0x4] sm:$0xf]  ;;  %v6078_v45 = vld [vmem:[#allocation9 + $0x10] sm:$0xf0]  ;;  %v6908_v52 = vld [vmem:[#allocation9 + $0x680] sm:$0xf] }
 0x2a1   :  { %4143 = vmatpush.bf16.msrb.mxu0 %v6193_v15  ;;  %v6717_v15 = vor.u32 %v7686_v6, %v6716_v5  ;;  %v6081_v13 = vor.u32 %v7524_v7, %v6078_v45  ;;  %v6909_v62 = vor.u32 %v7734_v60, %v6908_v52  ;;  %v6508_v3 = vld [vmem:[#allocation9 + $0x360] sm:$0xf]  ;;  %v7730_v7 = vld [vmem:[#allocation9 + $0x66c] sm:$0xf0]  ;;  %v7560_v45 = vld [vmem:[#allocation9 + $0x124] sm:$0xf] }
 0x2a2   :  { %v2340_v40 = vpack.c.bf16 %v2331_v18, %v2329_v17  ;;  %v6321_v17 = vor.u32 %v7584_v10, %v6318_v11  ;;  %v6348_v18 = vld [vmem:[#allocation9 + $0x220] sm:$0xf]  ;;  %v6222_v10 = vld [vmem:[#allocation9 + $0x130] sm:$0xf0]  ;;  %v7616_v60 = vld [vmem:[#allocation9 + $0x2e4] sm:$0xf] }
 0x2a3   :  { %v2382_v47 = vpop.f32.mrf.mxu1  ;;  %4105 = vmatpush.bf16.msra.mxu1 %v6765_v16  ;;  %v6349_v39 = vor.u32 %v7594_v19, %v6348_v18  ;;  %v6270_v16 = vld [vmem:[#allocation9 + $0x190] sm:$0xf0]  ;;  %v6892_v5 = vld [vmem:[#allocation9 + $0x660] sm:$0xf] }
 0x2a4   :  { %2464 = vmatpush.bf16.msrb.mxu3 %v2340_v40  ;;  %v2383_v4 = vadd.f32 %v2382_v47, %v2344_v57  ;;  %4064 = vmatpush.bf16.msra.mxu2 %v6365_v59  ;;  %v7580_v40 = vld [vmem:[#allocation9 + $0x1c4] sm:$0xf]  ;;  %v6572_v47 = vld [vmem:[#allocation9 + $0x3e0] sm:$0xf]  ;;  %v6273_v37 = vor.u32 %v7572_v35, %v6270_v16  ;;  %v2396_v55 = vpop.f32.mrf.mxu2  ;;  %v7634_v59 = vld [vmem:[#allocation9 + $0x36c] sm:$0xf0] }
 0x2a5   :  { %4144 = vmatpush.bf16.msrb.mxu0 %v6177_v54  ;;  %v6302_v54 = vld [vmem:[#allocation9 + $0x1d0] sm:$0xf0]  ;;  %v6573_v14 = vor.u32 %v7650_v29, %v6572_v47  ;;  %v6509_v6 = vor.u32 %v7634_v59, %v6508_v3  ;;  %v7726_v47 = vld [vmem:[#allocation9 + $0x64c] sm:$0xf0]  ;;  %v7068_v59 = vld [vmem:[#allocation9 + $0x7c0] sm:$0xf] }
 0x2a6   :  { %v2472_v41 = vmax.f32 %v2383_v4, 0.0  ;;  %v6305_v20 = vor.u32 %v7580_v40, %v6302_v54  ;;  %v6702_v18 = vld [vmem:[#allocation9 + $0x4f0] sm:$0xf0]  ;;  %v6492_v54 = vld [vmem:[#allocation9 + $0x340] sm:$0xf]  ;;  %v6877_v29 = vor.u32 %v7726_v47, %v6876_v21 }
 0x2a7   :  { %6073 = vmatmul.msk.bf16.vlgmr.msrb.gmra.mxu3 %vm277_vm2, %v8264_v26  ;;  %4106 = vmatpush.bf16.msra.mxu1 %v6749_v46  ;;  %v2347_v46 = vperm.slane %v8285_v23, 4  ;;  %v7626_v35 = vld [vmem:[#allocation9 + $0x32c] sm:$0xf0] }
 0x2a8   :  { %4065 = vmatpush.bf16.msra.mxu2 %v6349_v39  ;;  %4073 = vmatpush.bf16.msra.mxu3 %v6573_v14  ;;  %v6225_v39 = vor.u32 %v7560_v45, %v6222_v10  ;;  %v6206_v14 = vld [vmem:[#allocation9 + $0x110] sm:$0xf0] }
 0x2a9   :  { %4145 = vmatpush.bf16.msrb.mxu0 %v6161_v30  ;;  %v6956_v30 = vld [vmem:[#allocation9 + $0x6e0] sm:$0xf]  ;;  %v6430_v10 = vld [vmem:[#allocation9 + $0x2d0] sm:$0xf0] }
 0x2aa   :  { %v2410_v16 = vpop.f32.mrf.mxu3 }
 0x2ab   :  { %v2384_v26 = vpop.f32.mrf.mxu1  ;;  %4107 = vmatpush.bf16.msra.mxu1 %v6733_v28  ;;  %v6238_v28 = vld [vmem:[#allocation9 + $0x150] sm:$0xf0] }
 0x2ac   :  { %v2385_v44 = vadd.f32 %v2384_v26, %v2344_v57  ;;  %v7746_v57 = vld [vmem:[#allocation9 + $0x6ec] sm:$0xf0]  ;;  %4066 = vmatpush.bf16.msra.mxu2 %v6333_v12  ;;  %4074 = vmatpush.bf16.msra.mxu3 %v6557_v33  ;;  %v6241_v2 = vor.u32 %v7564_v61, %v6238_v28  ;;  %v6446_v61 = vld [vmem:[#allocation9 + $0x2f0] sm:$0xf0] }
 0x2ad   :  { %4146 = vmatpush.bf16.msrb.mxu0 %v6145_v32  ;;  %v6957_v31 = vor.u32 %v7746_v57, %v6956_v30  ;;  %v6286_v32 = vld [vmem:[#allocation9 + $0x1b0] sm:$0xf0]  ;;  %v7642_v26 = vld [vmem:[#allocation9 + $0x3ac] sm:$0xf0]  ;;  %v2398_v30 = vpop.f32.mrf.mxu2  ;;  %v7556_v57 = vld [vmem:[#allocation9 + $0x104] sm:$0xf] }
 0x2ae   :  { %v2480_v50 = vmax.f32 %v2385_v44, 0.0  ;;  %v6289_v4 = vor.u32 %v7576_v63, %v6286_v32  ;;  %v6254_v44 = vld [vmem:[#allocation9 + $0x170] sm:$0xf0] }
 0x2af   :  { %4108 = vmatpush.bf16.msra.mxu1 %v6717_v15  ;;  %v6257_v49 = vor.u32 %v7568_v22, %v6254_v44  ;;  %v6893_v15 = vor.u32 %v7730_v7, %v6892_v5  ;;  %v6460_v44 = vld [vmem:[#allocation9 + $0x300] sm:$0xf]  ;;  %v7774_v5 = vld [vmem:[#allocation9 + $0x7cc] sm:$0xf0] }
 0x2b0   :  { %v8296_v51 = vpack.c.bf16 %v2480_v50, %v2472_v41  ;;  %4115 = vmatpush.bf16.msrb.mxu2 %v6957_v31  ;;  %v6924_v41 = vld [vmem:[#allocation9 + $0x6a0] sm:$0xf]  ;;  %v7069_v45 = vor.u32 %v7774_v5, %v7068_v59  ;;  %v7708_v59 = vld [vmem:[#allocation9 + $0x5c4] sm:$0xf] }
 0x2b1   :  { %4147 = vmatpush.bf16.msrb.mxu0 %v6129_v42  ;;  %v6541_v42 = vor.u32 %v7642_v26, %v6540_v38  ;;  %v6925_v43 = vor.u32 %v7738_v27, %v6924_v41  ;;  %v6524_v50 = vld [vmem:[#allocation9 + $0x380] sm:$0xf]  ;;  %v7722_v38 = vld [vmem:[#allocation9 + $0x62c] sm:$0xf0]  ;;  %v2346_v26 = vperm.slane %v8285_v23, 3  ;;  %v6689_v41 = vor.u32 %v7676_v34, %v6686_v25 }
 0x2b2   :  { %4053 = vmatmul.bf16.vlgmr.msrb.gmra.mxu1 %v8296_v51  ;;  %v6670_v27 = vld [vmem:[#allocation9 + $0x4b0] sm:$0xf0]  ;;  %v2412_v3 = vpop.f32.mrf.mxu3 }
 0x2b3   :  { %4157 = vmatpush.bf16.msrb.mxu1 %v6321_v17  ;;  %4075 = vmatpush.bf16.msra.mxu3 %v6541_v42  ;;  %v7680_v17 = vld [vmem:[#allocation9 + $0x4e4] sm:$0xf]  ;;  %v2411_v52 = vadd.f32 %v2410_v16, %v2346_v26  ;;  %v6398_v34 = vld [vmem:[#allocation9 + $0x290] sm:$0xf0]  ;;  %v7020_v16 = vld [vmem:[#allocation9 + $0x760] sm:$0xf] }
 0x2b4   :  { %4116 = vmatpush.bf16.msrb.mxu2 %v6941_v36  ;;  %v6705_v31 = vor.u32 %v7680_v17, %v6702_v18  ;;  %v6477_v36 = vor.u32 %v7626_v35, %v6476_v9  ;;  %v7672_v42 = vld [vmem:[#allocation9 + $0x4a4] sm:$0xf]  ;;  %v6638_v18 = vld [vmem:[#allocation9 + $0x470] sm:$0xf0] }
 0x2b5   :  { %4148 = vmatpush.bf16.msrb.mxu0 %v6113_v58  ;;  %v7638_v58 = vld [vmem:[#allocation9 + $0x38c] sm:$0xf0]  ;;  %v2474_v7 = vmax.f32 %v2411_v52, 0.0  ;;  %v7664_v17 = vld [vmem:[#allocation9 + $0x464] sm:$0xf] }
 0x2b6   :  { %v6525_v56 = vor.u32 %v7638_v58, %v6524_v50  ;;  %v7718_v50 = vld [vmem:[#allocation9 + $0x60c] sm:$0xf0]  ;;  %v7084_v58 = vld [vmem:[#allocation9 + $0x7e0] sm:$0xf]  ;;  %v6641_v47 = vor.u32 %v7664_v17, %v6638_v18  ;;  %v7656_v9 = vld [vmem:[#allocation9 + $0x424] sm:$0xf] }
 0x2b7   :  { %4158 = vmatpush.bf16.msrb.mxu1 %v6305_v20  ;;  %v7630_v20 = vld [vmem:[#allocation9 + $0x34c] sm:$0xf0]  ;;  %v6606_v35 = vld [vmem:[#allocation9 + $0x430] sm:$0xf0] }
 0x2b8   :  { %4117 = vmatpush.bf16.msrb.mxu2 %v6925_v43  ;;  %4076 = vmatpush.bf16.msra.mxu3 %v6525_v56  ;;  %v6493_v24 = vor.u32 %v7630_v20, %v6492_v54  ;;  %v7778_v56 = vld [vmem:[#allocation9 + $0x7ec] sm:$0xf0]  ;;  %v7608_v54 = vld [vmem:[#allocation9 + $0x2a4] sm:$0xf]  ;;  %v6350_v18 = vld [vmem:[#allocation9 + $0x230] sm:$0xf0] }
 0x2b9   :  { %4149 = vmatpush.bf16.msrb.mxu0 %v6097_v1  ;;  %v2345_v1 = vperm.slane %v8285_v23, 2  ;;  %v7085_v28 = vor.u32 %v7778_v56, %v7084_v58  ;;  %v7004_v58 = vld [vmem:[#allocation9 + $0x740] sm:$0xf]  ;;  %v7758_v52 = vld [vmem:[#allocation9 + $0x74c] sm:$0xf0] }
 0x2bb   :  { %4159 = vmatpush.bf16.msrb.mxu1 %v6289_v4  ;;  %v2397_v19 = vadd.f32 %v2396_v55, %v2345_v1  ;;  %v2399_v32 = vadd.f32 %v2398_v30, %v2345_v1  ;;  %v6209_v4 = vor.u32 %v7556_v57, %v6206_v14  ;;  %v7668_v1 = vld [vmem:[#allocation9 + $0x484] sm:$0xf]  ;;  %v6622_v30 = vld [vmem:[#allocation9 + $0x450] sm:$0xf0]  ;;  %v7036_v14 = vld [vmem:[#allocation9 + $0x780] sm:$0xf] }
 0x2bc   :  { %4118 = vmatpush.bf16.msrb.mxu2 %v6909_v62  ;;  %4077 = vmatpush.bf16.msra.mxu3 %v6509_v6  ;;  %v6673_v62 = vor.u32 %v7672_v42, %v6670_v27  ;;  %v7612_v6 = vld [vmem:[#allocation9 + $0x2c4] sm:$0xf]  ;;  %v6609_v42 = vor.u32 %v7656_v9, %v6606_v35  ;;  %v6148_v9 = vld [vmem:[#allocation9 + $0x88] sm:$0xf]  ;;  %v7543_v35 = vld [vmem:[#allocation9 + $0x94] sm:$0xf0] }
 0x2bd   :  { %4150 = vmatpush.bf16.msrb.mxu0 %v6081_v13  ;;  %v2473_v63 = vmax.f32 %v2397_v19, 0.0  ;;  %v2481_v33 = vmax.f32 %v2399_v32, 0.0  ;;  %v2348_v32 = vperm.slane %v8285_v23, 5  ;;  %v7652_v27 = vld [vmem:[#allocation9 + $0x404] sm:$0xf] }
 0x2bf   :  { %4160 = vmatpush.bf16.msrb.mxu1 %v6273_v37  ;;  %v6860_v37 = vld [vmem:[#allocation9 + $0x620] sm:$0xf]  ;;  %v8305_v43 = vpack.c.bf16 %v2481_v33, %v2473_v63  ;;  %v7604_v63 = vld [vmem:[#allocation9 + $0x284] sm:$0xf] }
 0x2c0   :  { %4119 = vmatpush.bf16.msrb.mxu2 %v6893_v15  ;;  %4078 = vmatpush.bf16.msra.mxu3 %v6493_v24  ;;  %v6861_v22 = vor.u32 %v7722_v38, %v6860_v37  ;;  %v2413_v15 = vadd.f32 %v2412_v3, %v2346_v26  ;;  %v6414_v24 = vld [vmem:[#allocation9 + $0x2b0] sm:$0xf0]  ;;  %v6401_v33 = vor.u32 %v7604_v63, %v6398_v34  ;;  %v7600_v37 = vld [vmem:[#allocation9 + $0x264] sm:$0xf] }
 0x2c1   :  { %4067 = vmatmul.bf16.vlgmr.msra.gmra.mxu2 %v8305_v43 }
 0x2c2   :  { %v2482_v19 = vmax.f32 %v2413_v15, 0.0  ;;  %v7551_v15 = vld [vmem:[#allocation9 + $0xd4] sm:$0xf0] }
 0x2c3   :  { %4161 = vmatpush.bf16.msrb.mxu1 %v6257_v49 }
 0x2c4   :  { %v2424_v48 = vpop.f32.mrf.mxu0  ;;  %4120 = vmatpush.bf16.msrb.mxu2 %v6877_v29  ;;  %4079 = vmatpush.bf16.msra.mxu3 %v6477_v36  ;;  %v8308_v20 = vpack.c.bf16 %v2482_v19, %v2474_v7  ;;  %v7660_v29 = vld [vmem:[#allocation9 + $0x444] sm:$0xf]  ;;  %v7762_v36 = vld [vmem:[#allocation9 + $0x76c] sm:$0xf0]  ;;  %v6180_v7 = vld [vmem:[#allocation9 + $0xc8] sm:$0xf] }
 0x2c5   :  { %v2425_v0 = vadd.f32 %v2424_v48, %v2347_v46  ;;  %v6844_v48 = vld [vmem:[#allocation9 + $0x600] sm:$0xf]  ;;  %v6625_v25 = vor.u32 %v7660_v29, %v6622_v30  ;;  %v7021_v26 = vor.u32 %v7762_v36, %v7020_v16  ;;  %v6181_v19 = vor.u32 %v7551_v15, %v6180_v7  ;;  %v7750_v29 = vld [vmem:[#allocation9 + $0x70c] sm:$0xf0]  ;;  %v6782_v16 = vld [vmem:[#allocation9 + $0x590] sm:$0xf0] }
 0x2c6   :  { %v6845_v55 = vor.u32 %v7718_v50, %v6844_v48  ;;  %v6196_v48 = vld [vmem:[#allocation9 + $0xe8] sm:$0xf]  ;;  %v7644_v36 = vld [vmem:[#allocation9 + $0x3c4] sm:$0xf]  ;;  %v6510_v7 = vld [vmem:[#allocation9 + $0x370] sm:$0xf0] }
 0x2c7   :  { %4162 = vmatpush.bf16.msrb.mxu1 %v6241_v2  ;;  %v2475_v11 = vmax.f32 %v2425_v0, 0.0  ;;  %v6449_v0 = vor.u32 %v7616_v60, %v6446_v61  ;;  %v6654_v2 = vld [vmem:[#allocation9 + $0x490] sm:$0xf0] }
 0x2c8   :  { %4121 = vmatpush.bf16.msrb.mxu2 %v6861_v22  ;;  %v6590_v22 = vld [vmem:[#allocation9 + $0x410] sm:$0xf0] }
 0x2c9   :  { %v6830_v61 = vld [vmem:[#allocation9 + $0x5f0] sm:$0xf0] }
 0x2cb   :  { %4163 = vmatpush.bf16.msrb.mxu1 %v6225_v39  ;;  %v7052_v39 = vld [vmem:[#allocation9 + $0x7a0] sm:$0xf] }
 0x2cc   :  { %v2426_v13 = vpop.f32.mrf.mxu0  ;;  %4122 = vmatpush.bf16.msrb.mxu2 %v6845_v55  ;;  %v7596_v55 = vld [vmem:[#allocation9 + $0x244] sm:$0xf] }
 0x2cd   :  { %v2427_v40 = vadd.f32 %v2426_v13, %v2347_v46  ;;  %v7622_v46 = vld [vmem:[#allocation9 + $0x30c] sm:$0xf0]  ;;  %v6433_v13 = vor.u32 %v7612_v6, %v6430_v10  ;;  %v6814_v6 = vld [vmem:[#allocation9 + $0x5d0] sm:$0xf0]  ;;  %v6988_v10 = vld [vmem:[#allocation9 + $0x720] sm:$0xf] }
 0x2ce   :  { %v6461_v49 = vor.u32 %v7622_v46, %v6460_v44  ;;  %v7712_v46 = vld [vmem:[#allocation9 + $0x5e4] sm:$0xf] }
 0x2cf   :  { %v2483_v12 = vmax.f32 %v2427_v40, 0.0  ;;  %4164 = vmatpush.bf16.msrb.mxu1 %v6209_v4  ;;  %v7770_v40 = vld [vmem:[#allocation9 + $0x7ac] sm:$0xf0]  ;;  %v6833_v5 = vor.u32 %v7712_v46, %v6830_v61  ;;  %v7640_v46 = vld [vmem:[#allocation9 + $0x3a4] sm:$0xf] }
 0x2d0   :  { %4080 = vmatpush.bf16.msra.mxu3 %v6461_v49  ;;  %4171 = vmatpush.bf16.msra.mxu2 %v6449_v0  ;;  %v7053_v21 = vor.u32 %v7770_v40, %v7052_v39  ;;  %v7555_v49 = vld [vmem:[#allocation9 + $0xf4] sm:$0xf0]  ;;  %v6593_v0 = vor.u32 %v7652_v27, %v6590_v22  ;;  %v7704_v39 = vld [vmem:[#allocation9 + $0x5a4] sm:$0xf]  ;;  %v6798_v40 = vld [vmem:[#allocation9 + $0x5b0] sm:$0xf0] }
 0x2d1   :  { %v8301_v53 = vpack.c.bf16 %v2483_v12, %v2475_v11  ;;  %v6657_v11 = vor.u32 %v7668_v1, %v6654_v2  ;;  %v6417_v12 = vor.u32 %v7608_v54, %v6414_v24  ;;  %v6197_v3 = vor.u32 %v7555_v49, %v6196_v48  ;;  %v6164_v54 = vld [vmem:[#allocation9 + $0xa8] sm:$0xf]  ;;  %v7539_v22 = vld [vmem:[#allocation9 + $0x74] sm:$0xf0]  ;;  %v6542_v48 = vld [vmem:[#allocation9 + $0x3b0] sm:$0xf0] }
 0x2d2   :  { %v6817_v24 = vor.u32 %v7708_v59, %v6814_v6  ;;  %v6132_v27 = vld [vmem:[#allocation9 + $0x68] sm:$0xf]  ;;  %v6545_v49 = vor.u32 %v7640_v46, %v6542_v48  ;;  %v7636_v61 = vld [vmem:[#allocation9 + $0x384] sm:$0xf]  ;;  %v7531_v59 = vld [vmem:[#allocation9 + $0x34] sm:$0xf0] }
 0x2d3   :  { %4095 = vmatmul.bf16.vlgmr.msra.gmra.mxu0 %v8301_v53  ;;  %4081 = vmatmul.bf16.vlgmr.msra.gmra.mxu3 %v8308_v20  ;;  %v7632_v6 = vld [vmem:[#allocation9 + $0x364] sm:$0xf]  ;;  %v6462_v46 = vld [vmem:[#allocation9 + $0x310] sm:$0xf0]  ;;  %v6292_v48 = vld [vmem:[#allocation9 + $0x1a8] sm:$0xf] }
 0x2d4   :  { %4199 = vmatpush.bf16.msra.mxu0 %v6705_v31  ;;  %4129 = vmatpush.bf16.msrb.mxu3 %v7085_v28  ;;  %v7766_v31 = vld [vmem:[#allocation9 + $0x78c] sm:$0xf0]  ;;  %v6366_v28 = vld [vmem:[#allocation9 + $0x250] sm:$0xf0]  ;;  %v6513_v15 = vor.u32 %v7632_v6, %v6510_v7 }
 0x2d5   :  { %4172 = vmatpush.bf16.msra.mxu2 %v6433_v13  ;;  %v7037_v4 = vor.u32 %v7766_v31, %v7036_v14  ;;  %v6369_v1 = vor.u32 %v7596_v55, %v6366_v28  ;;  %v7592_v13 = vld [vmem:[#allocation9 + $0x224] sm:$0xf]  ;;  %v6334_v14 = vld [vmem:[#allocation9 + $0x210] sm:$0xf0]  ;;  %v6116_v55 = vld [vmem:[#allocation9 + $0x48] sm:$0xf] }
 0x2d6   :  { %v7648_v31 = vld [vmem:[#allocation9 + $0x3e4] sm:$0xf]  ;;  %v6926_v7 = vld [vmem:[#allocation9 + $0x6b0] sm:$0xf0] }
 0x2d8   :  { %4200 = vmatpush.bf16.msra.mxu0 %v6689_v41  ;;  %4130 = vmatpush.bf16.msrb.mxu3 %v7069_v45  ;;  %v6382_v41 = vld [vmem:[#allocation9 + $0x270] sm:$0xf0] }
 0x2d9   :  { %4173 = vmatpush.bf16.msra.mxu2 %v6417_v12  ;;  %v6385_v44 = vor.u32 %v7600_v37, %v6382_v41  ;;  %v6972_v12 = vld [vmem:[#allocation9 + $0x700] sm:$0xf]  ;;  %v6558_v37 = vld [vmem:[#allocation9 + $0x3d0] sm:$0xf0] }
 0x2da   :  { %v6973_v30 = vor.u32 %v7750_v29, %v6972_v12  ;;  %v6324_v12 = vld [vmem:[#allocation9 + $0x1e8] sm:$0xf]  ;;  %v7587_v29 = vld [vmem:[#allocation9 + $0x1f4] sm:$0xf0] }
 0x2dc   :  { %4201 = vmatpush.bf16.msra.mxu0 %v6673_v62  ;;  %4131 = vmatpush.bf16.msrb.mxu3 %v7053_v21  ;;  %v7005_v62 = vor.u32 %v7758_v52, %v7004_v58  ;;  %v6353_v21 = vor.u32 %v7592_v13, %v6350_v18  ;;  %v7692_v52 = vld [vmem:[#allocation9 + $0x544] sm:$0xf] }
 0x2dd   :  { %4174 = vmatpush.bf16.msra.mxu2 %v6401_v33  ;;  %v7700_v33 = vld [vmem:[#allocation9 + $0x584] sm:$0xf] }
 0x2de   :  { %v6785_v41 = vor.u32 %v7700_v33, %v6782_v16  ;;  %v7684_v13 = vld [vmem:[#allocation9 + $0x504] sm:$0xf] }
 0x2df   :  { %v7624_v33 = vld [vmem:[#allocation9 + $0x324] sm:$0xf] }
 0x2e0   :  { %4202 = vmatpush.bf16.msra.mxu0 %v6657_v11  ;;  %4132 = vmatpush.bf16.msrb.mxu3 %v7037_v4  ;;  %v7754_v11 = vld [vmem:[#allocation9 + $0x72c] sm:$0xf0] }
 0x2e1   :  { %4175 = vmatpush.bf16.msra.mxu2 %v6385_v44  ;;  %v6989_v17 = vor.u32 %v7754_v11, %v6988_v10  ;;  %v6766_v44 = vld [vmem:[#allocation9 + $0x570] sm:$0xf0]  ;;  %v2349_v10 = vperm.slane %v8285_v23, 6 }
 0x2e3   :  { %4151 = vmatmul.bf16.vlgmr.msrb.gmra.mxu0 %v8290_v8 }
 0x2e4   :  { %v2438_v57 = vpop.f32.mrf.mxu1  ;;  %4203 = vmatpush.bf16.msra.mxu0 %v6641_v47  ;;  %4133 = vmatpush.bf16.msrb.mxu3 %v7021_v26  ;;  %v7547_v47 = vld [vmem:[#allocation9 + $0xb4] sm:$0xf0]  ;;  %v6149_v26 = vor.u32 %v7543_v35, %v6148_v9  ;;  %v6478_v9 = vld [vmem:[#allocation9 + $0x330] sm:$0xf0]  ;;  %v7744_v35 = vld [vmem:[#allocation9 + $0x6e4] sm:$0xf] }
 0x2e5   :  { %v2439_v38 = vadd.f32 %v2438_v57, %v2348_v32  ;;  %4176 = vmatpush.bf16.msra.mxu2 %v6369_v1  ;;  %v7588_v57 = vld [vmem:[#allocation9 + $0x204] sm:$0xf]  ;;  %v6165_v4 = vor.u32 %v7547_v47, %v6164_v54  ;;  %v6708_v54 = vld [vmem:[#allocation9 + $0x4e8] sm:$0xf]  ;;  %v6494_v47 = vld [vmem:[#allocation9 + $0x350] sm:$0xf0]  ;;  %v6481_v16 = vor.u32 %v7624_v33, %v6478_v9 }
 0x2e6   :  { %v6337_v63 = vor.u32 %v7588_v57, %v6334_v14  ;;  %v6878_v33 = vld [vmem:[#allocation9 + $0x650] sm:$0xf0] }
 0x2e7   :  { %v2476_v56 = vmax.f32 %v2439_v38, 0.0  ;;  %v6561_v38 = vor.u32 %v7644_v36, %v6558_v37 }
 0x2e8   :  { %4204 = vmatpush.bf16.msra.mxu0 %v6625_v25  ;;  %4134 = vmatpush.bf16.msrb.mxu3 %v7005_v62  ;;  %v6801_v25 = vor.u32 %v7704_v39, %v6798_v40  ;;  %v6526_v62 = vld [vmem:[#allocation9 + $0x390] sm:$0xf0]  ;;  %v6084_v39 = vld [vmem:[#allocation9 + $0x8] sm:$0xf]  ;;  %v7527_v40 = vld [vmem:[#allocation9 + $0x14] sm:$0xf0] }
 0x2e9   :  { %4177 = vmatpush.bf16.msra.mxu2 %v6353_v21  ;;  %v6529_v28 = vor.u32 %v7636_v61, %v6526_v62  ;;  %v7683_v21 = vld [vmem:[#allocation9 + $0x4f4] sm:$0xf0]  ;;  %v6085_v57 = vor.u32 %v7527_v40, %v6084_v39  ;;  %v6942_v62 = vld [vmem:[#allocation9 + $0x6d0] sm:$0xf0] }
 0x2ea   :  { %v6709_v14 = vor.u32 %v7683_v21, %v6708_v54  ;;  %v6910_v40 = vld [vmem:[#allocation9 + $0x690] sm:$0xf0]  ;;  %v6628_v54 = vld [vmem:[#allocation9 + $0x448] sm:$0xf]  ;;  %v7663_v21 = vld [vmem:[#allocation9 + $0x454] sm:$0xf0] }
 0x2ec   :  { %v2440_v50 = vpop.f32.mrf.mxu1  ;;  %4205 = vmatpush.bf16.msra.mxu0 %v6609_v42  ;;  %4135 = vmatpush.bf16.msrb.mxu3 %v6989_v17  ;;  %v7696_v42 = vld [vmem:[#allocation9 + $0x564] sm:$0xf]  ;;  %v6718_v17 = vld [vmem:[#allocation9 + $0x510] sm:$0xf0] }
 0x2ed   :  { %v2441_v60 = vadd.f32 %v2440_v50, %v2348_v32  ;;  %v6574_v32 = vld [vmem:[#allocation9 + $0x3f0] sm:$0xf0]  ;;  %4178 = vmatpush.bf16.msra.mxu2 %v6337_v63  ;;  %v6133_v50 = vor.u32 %v7539_v22, %v6132_v27  ;;  %v6769_v58 = vor.u32 %v7696_v42, %v6766_v44  ;;  %v6721_v23 = vor.u32 %v7684_v13, %v6718_v17  ;;  %v7620_v44 = vld [vmem:[#allocation9 + $0x304] sm:$0xf]  ;;  %v7571_v13 = vld [vmem:[#allocation9 + $0x174] sm:$0xf0] }
 0x2ee   :  { %v6577_v34 = vor.u32 %v7648_v31, %v6574_v32  ;;  %v6325_v63 = vor.u32 %v7587_v29, %v6324_v12  ;;  %v6308_v32 = vld [vmem:[#allocation9 + $0x1c8] sm:$0xf]  ;;  %v6629_v29 = vor.u32 %v7663_v21, %v6628_v54 }
 0x2ef   :  { %v2484_v2 = vmax.f32 %v2441_v60, 0.0  ;;  %v6750_v60 = vld [vmem:[#allocation9 + $0x550] sm:$0xf0] }
 0x2f0   :  { %4206 = vmatpush.bf16.msra.mxu0 %v6593_v0  ;;  %4136 = vmatpush.bf16.msrb.mxu3 %v6973_v30  ;;  %v6753_v1 = vor.u32 %v7692_v52, %v6750_v60 }
 0x2f1   :  { %v8313_v45 = vpack.c.bf16 %v2484_v2, %v2476_v56  ;;  %v7535_v56 = vld [vmem:[#allocation9 + $0x54] sm:$0xf0]  ;;  %v7688_v2 = vld [vmem:[#allocation9 + $0x524] sm:$0xf] }
 0x2f2   :  { %v6117_v0 = vor.u32 %v7535_v56, %v6116_v55  ;;  %v7740_v56 = vld [vmem:[#allocation9 + $0x6c4] sm:$0xf] }
 0x2f3   :  { %4109 = vmatmul.bf16.vlgmr.msra.gmra.mxu1 %v8313_v45  ;;  %4207 = vmatmul.bf16.vlgmr.msra.gmra.mxu0 %v8301_v53 }
 0x2f4   :  { %4255 = vmatpush.bf16.msrb.mxu0 %v6197_v3  ;;  %4213 = vmatpush.bf16.msra.mxu1 %v6833_v5  ;;  %v6100_v3 = vld [vmem:[#allocation9 + $0x28] sm:$0xf]  ;;  %v6734_v5 = vld [vmem:[#allocation9 + $0x530] sm:$0xf0] }
 0x2f5   :  { %4185 = vmatpush.bf16.msra.mxu3 %v6577_v34  ;;  %v6101_v11 = vor.u32 %v7531_v59, %v6100_v3  ;;  %v7679_v34 = vld [vmem:[#allocation9 + $0x4d4] sm:$0xf0]  ;;  %v6945_v3 = vor.u32 %v7740_v56, %v6942_v62  ;;  %v7549_v56 = vld [vmem:[#allocation9 + $0xcc] sm:$0xf]  ;;  %v6820_v62 = vld [vmem:[#allocation9 + $0x5c8] sm:$0xf] }
 0x2f8   :  { %4256 = vmatpush.bf16.msrb.mxu0 %v6181_v19  ;;  %4214 = vmatpush.bf16.msra.mxu1 %v6817_v24  ;;  %v6737_v19 = vor.u32 %v7688_v2, %v6734_v5  ;;  %v7628_v24 = vld [vmem:[#allocation9 + $0x344] sm:$0xf]  ;;  %v7575_v2 = vld [vmem:[#allocation9 + $0x194] sm:$0xf0] }
 0x2f9   :  { %4186 = vmatpush.bf16.msra.mxu3 %v6561_v38  ;;  %v6497_v30 = vor.u32 %v7628_v24, %v6494_v47  ;;  %v6958_v38 = vld [vmem:[#allocation9 + $0x6f0] sm:$0xf0]  ;;  %v7736_v5 = vld [vmem:[#allocation9 + $0x6a4] sm:$0xf]  ;;  %v6244_v24 = vld [vmem:[#allocation9 + $0x148] sm:$0xf] }
 0x2fa   :  { %v6961_v52 = vor.u32 %v7744_v35, %v6958_v38  ;;  %v6929_v17 = vor.u32 %v7736_v5, %v6926_v7  ;;  %v7567_v47 = vld [vmem:[#allocation9 + $0x154] sm:$0xf0]  ;;  %v6212_v35 = vld [vmem:[#allocation9 + $0x108] sm:$0xf]  ;;  %v7776_v7 = vld [vmem:[#allocation9 + $0x7e4] sm:$0xf] }
 0x2fb   :  { %v7559_v38 = vld [vmem:[#allocation9 + $0x114] sm:$0xf0] }
 0x2fc   :  { %4257 = vmatpush.bf16.msrb.mxu0 %v6165_v4  ;;  %4215 = vmatpush.bf16.msra.mxu1 %v6801_v25  ;;  %v6692_v4 = vld [vmem:[#allocation9 + $0x4c8] sm:$0xf]  ;;  %v7583_v25 = vld [vmem:[#allocation9 + $0x1d4] sm:$0xf0] }
 0x2fd   :  { %4187 = vmatpush.bf16.msra.mxu3 %v6545_v49  ;;  %v6693_v37 = vor.u32 %v7679_v34, %v6692_v4  ;;  %v6309_v22 = vor.u32 %v7583_v25, %v6308_v32  ;;  %v7579_v49 = vld [vmem:[#allocation9 + $0x1b4] sm:$0xf0]  ;;  %v7724_v25 = vld [vmem:[#allocation9 + $0x644] sm:$0xf] }
 0x2fe   :  { %v6293_v61 = vor.u32 %v7579_v49, %v6292_v48  ;;  %v7563_v32 = vld [vmem:[#allocation9 + $0x134] sm:$0xf0]  ;;  %v6213_v49 = vor.u32 %v7559_v38, %v6212_v35  ;;  %v7768_v35 = vld [vmem:[#allocation9 + $0x7a4] sm:$0xf]  ;;  %v7054_v38 = vld [vmem:[#allocation9 + $0x7b0] sm:$0xf0] }
 0x300   :  { %4258 = vmatpush.bf16.msrb.mxu0 %v6149_v26  ;;  %4216 = vmatpush.bf16.msra.mxu1 %v6785_v41  ;;  %v6676_v26 = vld [vmem:[#allocation9 + $0x4a8] sm:$0xf]  ;;  %v7675_v41 = vld [vmem:[#allocation9 + $0x4b4] sm:$0xf0] }
 0x301   :  { %4188 = vmatpush.bf16.msra.mxu3 %v6529_v28  ;;  %v6677_v55 = vor.u32 %v7675_v41, %v6676_v26  ;;  %v6660_v28 = vld [vmem:[#allocation9 + $0x488] sm:$0xf]  ;;  %v7553_v26 = vld [vmem:[#allocation9 + $0xec] sm:$0xf]  ;;  %v6198_v41 = vld [vmem:[#allocation9 + $0xf8] sm:$0xf0] }
 0x303   :  { %4165 = vmatmul.bf16.vlgmr.msrb.gmra.mxu1 %v8296_v51 }
 0x304   :  { %4259 = vmatpush.bf16.msrb.mxu0 %v6133_v50  ;;  %4217 = vmatpush.bf16.msra.mxu1 %v6769_v58  ;;  %v6465_v50 = vor.u32 %v7620_v44, %v6462_v46  ;;  %v7837_v46 = vld [vmem:[#allocation7] sm:$0xff] }
 0x305   :  { %4189 = vmatpush.bf16.msra.mxu3 %v6513_v15  ;;  %v6644_v15 = vld [vmem:[#allocation9 + $0x468] sm:$0xf]  ;;  %v2350_v48 = vperm.slane %v7837_v46, 7 }
 0x308   :  { %4260 = vmatpush.bf16.msrb.mxu0 %v6117_v0  ;;  %4218 = vmatpush.bf16.msra.mxu1 %v6753_v1  ;;  %v7671_v0 = vld [vmem:[#allocation9 + $0x494] sm:$0xf0]  ;;  %v6276_v1 = vld [vmem:[#allocation9 + $0x188] sm:$0xf] }
 0x309   :  { %4190 = vmatpush.bf16.msra.mxu3 %v6497_v30  ;;  %v6661_v59 = vor.u32 %v7671_v0, %v6660_v28  ;;  %v6277_v6 = vor.u32 %v7575_v2, %v6276_v1  ;;  %v7728_v30 = vld [vmem:[#allocation9 + $0x664] sm:$0xf]  ;;  %v7711_v28 = vld [vmem:[#allocation9 + $0x5d4] sm:$0xf0] }
 0x30a   :  { %v2452_v18 = vpop.f32.mrf.mxu2 }
 0x30b   :  { %v2453_v31 = vadd.f32 %v2452_v18, %v2349_v10 }
 0x30c   :  { %4261 = vmatpush.bf16.msrb.mxu0 %v6101_v11  ;;  %4219 = vmatpush.bf16.msra.mxu1 %v6737_v19  ;;  %v6260_v11 = vld [vmem:[#allocation9 + $0x168] sm:$0xf]  ;;  %v7732_v19 = vld [vmem:[#allocation9 + $0x684] sm:$0xf] }
 0x30d   :  { %v2477_v42 = vmax.f32 %v2453_v31, 0.0  ;;  %4191 = vmatpush.bf16.msra.mxu3 %v6481_v16  ;;  %v6261_v39 = vor.u32 %v7571_v13, %v6260_v11  ;;  %v6913_v12 = vor.u32 %v7732_v19, %v6910_v40  ;;  %v7659_v31 = vld [vmem:[#allocation9 + $0x434] sm:$0xf0]  ;;  %v6596_v16 = vld [vmem:[#allocation9 + $0x408] sm:$0xf] }
 0x30e   :  { %v7086_v13 = vld [vmem:[#allocation9 + $0x7f0] sm:$0xf0]  ;;  %v6166_v40 = vld [vmem:[#allocation9 + $0xb8] sm:$0xf0] }
 0x310   :  { %4262 = vmatpush.bf16.msrb.mxu0 %v6085_v57  ;;  %4220 = vmatpush.bf16.msra.mxu1 %v6721_v23  ;;  %v6245_v57 = vor.u32 %v7567_v47, %v6244_v24  ;;  %v6894_v23 = vld [vmem:[#allocation9 + $0x670] sm:$0xf0]  ;;  %v7089_v47 = vor.u32 %v7776_v7, %v7086_v13  ;;  %v6740_v7 = vld [vmem:[#allocation9 + $0x528] sm:$0xf] }
 0x311   :  { %4192 = vmatpush.bf16.msra.mxu3 %v6465_v50  ;;  %v6897_v4 = vor.u32 %v7728_v30, %v6894_v23  ;;  %v6201_v50 = vor.u32 %v7553_v26, %v6198_v41  ;;  %v6436_v30 = vld [vmem:[#allocation9 + $0x2c8] sm:$0xf]  ;;  %v7699_v41 = vld [vmem:[#allocation9 + $0x574] sm:$0xf0] }
 0x312   :  { %v2454_v36 = vpop.f32.mrf.mxu2  ;;  %v6772_v26 = vld [vmem:[#allocation9 + $0x568] sm:$0xf] }
 0x313   :  { %v2455_v27 = vadd.f32 %v2454_v36, %v2349_v10  ;;  %4263 = vmatmul.bf16.vlgmr.msrb.gmra.mxu0 %v8290_v8  ;;  %4221 = vmatmul.bf16.vlgmr.msra.gmra.mxu1 %v8313_v45  ;;  %v7667_v10 = vld [vmem:[#allocation9 + $0x474] sm:$0xf0]  ;;  %v6773_v46 = vor.u32 %v7699_v41, %v6772_v26  ;;  %v7677_v41 = vld [vmem:[#allocation9 + $0x4cc] sm:$0xf] }
 0x314   :  { %4311 = vmatpush.bf16.msra.mxu0 %v6709_v14  ;;  %4269 = vmatpush.bf16.msrb.mxu1 %v6325_v63  ;;  %v6645_v18 = vor.u32 %v7667_v10, %v6644_v15  ;;  %v6612_v14 = vld [vmem:[#allocation9 + $0x428] sm:$0xf]  ;;  %v7655_v36 = vld [vmem:[#allocation9 + $0x414] sm:$0xf0] }
 0x315   :  { %v2485_v58 = vmax.f32 %v2455_v27, 0.0  ;;  %v6228_v63 = vld [vmem:[#allocation9 + $0x128] sm:$0xf]  ;;  %v6613_v34 = vor.u32 %v7659_v31, %v6612_v14  ;;  %v7715_v27 = vld [vmem:[#allocation9 + $0x5f4] sm:$0xf0]  ;;  %v6597_v44 = vor.u32 %v7655_v36, %v6596_v16 }
 0x316   :  { %v6229_v9 = vor.u32 %v7563_v32, %v6228_v63  ;;  %v6452_v15 = vld [vmem:[#allocation9 + $0x2e8] sm:$0xf]  ;;  %v7619_v10 = vld [vmem:[#allocation9 + $0x2f4] sm:$0xf0]  ;;  %v7070_v31 = vld [vmem:[#allocation9 + $0x7d0] sm:$0xf0] }
 0x317   :  { %v8321_v60 = vpack.c.bf16 %v2485_v58, %v2477_v42  ;;  %v6836_v42 = vld [vmem:[#allocation9 + $0x5e8] sm:$0xf]  ;;  %v7720_v58 = vld [vmem:[#allocation9 + $0x624] sm:$0xf]  ;;  %v6453_v24 = vor.u32 %v7619_v10, %v6452_v15  ;;  %v7703_v32 = vld [vmem:[#allocation9 + $0x594] sm:$0xf0] }
 0x318   :  { %4312 = vmatpush.bf16.msra.mxu0 %v6693_v37  ;;  %4270 = vmatpush.bf16.msrb.mxu1 %v6309_v22  ;;  %v6881_v22 = vor.u32 %v7724_v25, %v6878_v33  ;;  %v6788_v63 = vld [vmem:[#allocation9 + $0x588] sm:$0xf]  ;;  %v7611_v36 = vld [vmem:[#allocation9 + $0x2b4] sm:$0xf0]  ;;  %v7529_v10 = vld [vmem:[#allocation9 + $0x2c] sm:$0xf] }
 0x319   :  { %4123 = vmatmul.bf16.vlgmr.msrb.gmra.mxu2 %v8321_v60  ;;  %v6420_v16 = vld [vmem:[#allocation9 + $0x2a8] sm:$0xf]  ;;  %v7691_v15 = vld [vmem:[#allocation9 + $0x534] sm:$0xf0] }
 0x31a   :  { %4227 = vmatpush.bf16.msrb.mxu2 %v6961_v52  ;;  %v6862_v52 = vld [vmem:[#allocation9 + $0x630] sm:$0xf0] }
 0x31b   :  { %v6865_v0 = vor.u32 %v7720_v58, %v6862_v52  ;;  %v7038_v52 = vld [vmem:[#allocation9 + $0x790] sm:$0xf0] }
 0x31c   :  { %4313 = vmatpush.bf16.msra.mxu0 %v6677_v55  ;;  %4271 = vmatpush.bf16.msrb.mxu1 %v6293_v61  ;;  %v6837_v55 = vor.u32 %v7715_v27, %v6836_v42  ;;  %v6182_v61 = vld [vmem:[#allocation9 + $0xd8] sm:$0xf0]  ;;  %v7537_v42 = vld [vmem:[#allocation9 + $0x6c] sm:$0xf] }
 0x31d   :  { %v6185_v2 = vor.u32 %v7549_v56, %v6182_v61  ;;  %v6134_v27 = vld [vmem:[#allocation9 + $0x78] sm:$0xf0]  ;;  %v7695_v56 = vld [vmem:[#allocation9 + $0x554] sm:$0xf0]  ;;  %v7533_v61 = vld [vmem:[#allocation9 + $0x4c] sm:$0xf] }
 0x31e   :  { %4228 = vmatpush.bf16.msrb.mxu2 %v6945_v3  ;;  %v7716_v3 = vld [vmem:[#allocation9 + $0x604] sm:$0xf]  ;;  %v6137_v58 = vor.u32 %v7537_v42, %v6134_v27  ;;  %v6694_v42 = vld [vmem:[#allocation9 + $0x4d8] sm:$0xf0] }
 0x31f   :  { %v7748_v27 = vld [vmem:[#allocation9 + $0x704] sm:$0xf] }
 0x320   :  { %4314 = vmatpush.bf16.msra.mxu0 %v6661_v59  ;;  %4272 = vmatpush.bf16.msrb.mxu1 %v6277_v6  ;;  %v6846_v59 = vld [vmem:[#allocation9 + $0x610] sm:$0xf0]  ;;  %v6821_v6 = vor.u32 %v7711_v28, %v6820_v62  ;;  %v6118_v62 = vld [vmem:[#allocation9 + $0x58] sm:$0xf0] }
 0x321   :  { %v6849_v19 = vor.u32 %v7716_v3, %v6846_v59  ;;  %v6388_v3 = vld [vmem:[#allocation9 + $0x268] sm:$0xf]  ;;  %v7603_v59 = vld [vmem:[#allocation9 + $0x274] sm:$0xf0] }
 0x322   :  { %4229 = vmatpush.bf16.msrb.mxu2 %v6929_v17  ;;  %v6804_v17 = vld [vmem:[#allocation9 + $0x5a8] sm:$0xf]  ;;  %v6389_v13 = vor.u32 %v7603_v59, %v6388_v3 }
 0x324   :  { %4315 = vmatpush.bf16.msra.mxu0 %v6645_v18  ;;  %4273 = vmatpush.bf16.msrb.mxu1 %v6261_v39  ;;  %v7707_v18 = vld [vmem:[#allocation9 + $0x5b4] sm:$0xf0]  ;;  %v7545_v39 = vld [vmem:[#allocation9 + $0xac] sm:$0xf] }
 0x325   :  { %v6169_v14 = vor.u32 %v7545_v39, %v6166_v40  ;;  %v7006_v39 = vld [vmem:[#allocation9 + $0x750] sm:$0xf0]  ;;  %v6372_v40 = vld [vmem:[#allocation9 + $0x248] sm:$0xf] }
 0x326   :  { %4230 = vmatpush.bf16.msrb.mxu2 %v6913_v12  ;;  %v6805_v12 = vor.u32 %v7707_v18, %v6804_v17  ;;  %v7756_v17 = vld [vmem:[#allocation9 + $0x744] sm:$0xf] }
 0x328   :  { %4316 = vmatpush.bf16.msra.mxu0 %v6629_v29  ;;  %4274 = vmatpush.bf16.msrb.mxu1 %v6245_v57  ;;  %v7772_v29 = vld [vmem:[#allocation9 + $0x7c4] sm:$0xf]  ;;  %v7615_v57 = vld [vmem:[#allocation9 + $0x2d4] sm:$0xf0] }
 0x329   :  { %4179 = vmatmul.bf16.vlgmr.msra.gmra.mxu2 %v8305_v43  ;;  %v6437_v25 = vor.u32 %v7615_v57, %v6436_v30  ;;  %v7073_v33 = vor.u32 %v7772_v29, %v7070_v31  ;;  %v6086_v29 = vld [vmem:[#allocation9 + $0x18] sm:$0xf0]  ;;  %v7585_v30 = vld [vmem:[#allocation9 + $0x1ec] sm:$0xf] }
 0x32a   :  { %v2466_v37 = vpop.f32.mrf.mxu3  ;;  %4231 = vmatpush.bf16.msrb.mxu2 %v6897_v4  ;;  %v7541_v4 = vld [vmem:[#allocation9 + $0x8c] sm:$0xf]  ;;  %v6326_v57 = vld [vmem:[#allocation9 + $0x1f8] sm:$0xf0] }
 0x32b   :  { %v2467_v1 = vadd.f32 %v2466_v37, %v2350_v48  ;;  %v7681_v31 = vld [vmem:[#allocation9 + $0x4ec] sm:$0xf] }
 0x32c   :  { %4317 = vmatpush.bf16.msra.mxu0 %v6613_v34  ;;  %4275 = vmatpush.bf16.msrb.mxu1 %v6229_v9  ;;  %v6150_v34 = vld [vmem:[#allocation9 + $0x98] sm:$0xf0]  ;;  %v6789_v9 = vor.u32 %v7703_v32, %v6788_v63  ;;  %v7009_v32 = vor.u32 %v7756_v17, %v7006_v39 }
 0x32d   :  { %v2478_v54 = vmax.f32 %v2467_v1, 0.0  ;;  %v6153_v37 = vor.u32 %v7541_v4, %v6150_v34  ;;  %v6710_v63 = vld [vmem:[#allocation9 + $0x4f8] sm:$0xf0]  ;;  %v6356_v34 = vld [vmem:[#allocation9 + $0x228] sm:$0xf] }
 0x32e   :  { %4232 = vmatpush.bf16.msrb.mxu2 %v6881_v22  ;;  %v6421_v22 = vor.u32 %v7611_v36, %v6420_v16  ;;  %v6990_v16 = vld [vmem:[#allocation9 + $0x730] sm:$0xf0]  ;;  %v6713_v36 = vor.u32 %v7681_v31, %v6710_v63  ;;  %v6278_v17 = vld [vmem:[#allocation9 + $0x198] sm:$0xf0] }
 0x330   :  { %4318 = vmatpush.bf16.msra.mxu0 %v6597_v44  ;;  %4276 = vmatpush.bf16.msrb.mxu1 %v6213_v49  ;;  %v7057_v44 = vor.u32 %v7768_v35, %v7054_v38  ;;  %v6404_v49 = vld [vmem:[#allocation9 + $0x288] sm:$0xf]  ;;  %v7752_v35 = vld [vmem:[#allocation9 + $0x724] sm:$0xf]  ;;  %v6310_v38 = vld [vmem:[#allocation9 + $0x1d8] sm:$0xf0] }
 0x332   :  { %v2468_v5 = vpop.f32.mrf.mxu3  ;;  %4233 = vmatpush.bf16.msrb.mxu2 %v6865_v0 }
 0x333   :  { %v2469_v11 = vadd.f32 %v2468_v5, %v2350_v48  ;;  %4319 = vmatmul.bf16.vlgmr.msra.gmra.mxu0 %v8301_v53  ;;  %4277 = vmatmul.bf16.vlgmr.msrb.gmra.mxu1 %v8296_v51  ;;  %v7764_v48 = vld [vmem:[#allocation9 + $0x784] sm:$0xf]  ;;  %v6121_v5 = vor.u32 %v7533_v61, %v6118_v62  ;;  %v7577_v61 = vld [vmem:[#allocation9 + $0x1ac] sm:$0xf]  ;;  %v6294_v62 = vld [vmem:[#allocation9 + $0x1b8] sm:$0xf0] }
 0x334   :  { %4367 = vmatpush.bf16.msrb.mxu0 %v6201_v50  ;;  %4325 = vmatpush.bf16.msra.mxu1 %v6837_v55  ;;  %v7607_v50 = vld [vmem:[#allocation9 + $0x294] sm:$0xf0]  ;;  %v6756_v55 = vld [vmem:[#allocation9 + $0x548] sm:$0xf]  ;;  %v7041_v0 = vor.u32 %v7764_v48, %v7038_v52 }
 0x335   :  { %v2486_v21 = vmax.f32 %v2469_v11, 0.0  ;;  %v6405_v28 = vor.u32 %v7607_v50, %v6404_v49  ;;  %v6757_v1 = vor.u32 %v7695_v56, %v6756_v55  ;;  %v6102_v11 = vld [vmem:[#allocation9 + $0x38] sm:$0xf0]  ;;  %v7591_v48 = vld [vmem:[#allocation9 + $0x214] sm:$0xf0]  ;;  %v6697_v55 = vor.u32 %v7677_v41, %v6694_v42 }
 0x336   :  { %4234 = vmatpush.bf16.msrb.mxu2 %v6849_v19  ;;  %v6741_v19 = vor.u32 %v7691_v15, %v6740_v7  ;;  %v6580_v50 = vld [vmem:[#allocation9 + $0x3e8] sm:$0xf]  ;;  %v7747_v52 = vld [vmem:[#allocation9 + $0x6f4] sm:$0xf0] }
 0x337   :  { %v8327_v23 = vpack.c.bf16 %v2486_v21, %v2478_v54  ;;  %v7599_v54 = vld [vmem:[#allocation9 + $0x254] sm:$0xf0]  ;;  %v6105_v21 = vor.u32 %v7529_v10, %v6102_v11  ;;  %v6948_v7 = vld [vmem:[#allocation9 + $0x6c8] sm:$0xf] }
 0x338   :  { %4368 = vmatpush.bf16.msrb.mxu0 %v6185_v2  ;;  %4326 = vmatpush.bf16.msra.mxu1 %v6821_v6  ;;  %v7760_v2 = vld [vmem:[#allocation9 + $0x764] sm:$0xf]  ;;  %v7022_v6 = vld [vmem:[#allocation9 + $0x770] sm:$0xf0]  ;;  %v7651_v56 = vld [vmem:[#allocation9 + $0x3f4] sm:$0xf0] }
 0x339   :  { %4137 = vmatmul.bf16.vlgmr.msrb.gmra.mxu3 %v8327_v23  ;;  %4235 = vmatmul.bf16.vlgmr.msrb.gmra.mxu2 %v8321_v60  ;;  %v7025_v18 = vor.u32 %v7760_v2, %v7022_v6  ;;  %v6581_v59 = vor.u32 %v7651_v56, %v6580_v50  ;;  %v6564_v6 = vld [vmem:[#allocation9 + $0x3c8] sm:$0xf]  ;;  %v7743_v15 = vld [vmem:[#allocation9 + $0x6d4] sm:$0xf0]  ;;  %v7657_v50 = vld [vmem:[#allocation9 + $0x42c] sm:$0xf] }
 0x33a   :  { %4283 = vmatpush.bf16.msra.mxu2 %v6453_v24  ;;  %4241 = vmatpush.bf16.msrb.mxu3 %v7089_v47  ;;  %v6724_v24 = vld [vmem:[#allocation9 + $0x508] sm:$0xf]  ;;  %v7687_v47 = vld [vmem:[#allocation9 + $0x514] sm:$0xf0]  ;;  %v6949_v39 = vor.u32 %v7743_v15, %v6948_v7  ;;  %v6838_v7 = vld [vmem:[#allocation9 + $0x5f8] sm:$0xf0] }
 0x33b   :  { %v6725_v4 = vor.u32 %v7687_v47, %v6724_v24  ;;  %v7647_v11 = vld [vmem:[#allocation9 + $0x3d4] sm:$0xf0]  ;;  %v6516_v42 = vld [vmem:[#allocation9 + $0x368] sm:$0xf] }
 0x33c   :  { %4327 = vmatpush.bf16.msra.mxu1 %v6805_v12  ;;  %4369 = vmatpush.bf16.msrb.mxu0 %v6169_v14  ;;  %v7525_v12 = vld [vmem:[#allocation9 + $0xc] sm:$0xf]  ;;  %v6373_v14 = vor.u32 %v7599_v54, %v6372_v40  ;;  %v6548_v54 = vld [vmem:[#allocation9 + $0x3a8] sm:$0xf]  ;;  %v7739_v24 = vld [vmem:[#allocation9 + $0x6b4] sm:$0xf0] }
 0x33e   :  { %4284 = vmatpush.bf16.msra.mxu2 %v6437_v25  ;;  %4242 = vmatpush.bf16.msrb.mxu3 %v7073_v33  ;;  %v7595_v25 = vld [vmem:[#allocation9 + $0x234] sm:$0xf0]  ;;  %v6089_v33 = vor.u32 %v7525_v12, %v6086_v29  ;;  %v7569_v29 = vld [vmem:[#allocation9 + $0x16c] sm:$0xf] }
 0x33f   :  { %v6357_v26 = vor.u32 %v7595_v25, %v6356_v34  ;;  %v7643_v12 = vld [vmem:[#allocation9 + $0x3b4] sm:$0xf0]  ;;  %v6916_v34 = vld [vmem:[#allocation9 + $0x688] sm:$0xf] }
 0x340   :  { %4328 = vmatpush.bf16.msra.mxu1 %v6789_v9  ;;  %4370 = vmatpush.bf16.msrb.mxu0 %v6153_v37  ;;  %v6329_v9 = vor.u32 %v7585_v30, %v6326_v57  ;;  %v7581_v37 = vld [vmem:[#allocation9 + $0x1cc] sm:$0xf]  ;;  %v6262_v30 = vld [vmem:[#allocation9 + $0x178] sm:$0xf0]  ;;  %v6549_v63 = vor.u32 %v7643_v12, %v6548_v54  ;;  %v7735_v25 = vld [vmem:[#allocation9 + $0x694] sm:$0xf0] }
 0x341   :  { %v6313_v49 = vor.u32 %v7581_v37, %v6310_v38  ;;  %v7665_v57 = vld [vmem:[#allocation9 + $0x46c] sm:$0xf]  ;;  %v6630_v37 = vld [vmem:[#allocation9 + $0x458] sm:$0xf0]  ;;  %v6917_v38 = vor.u32 %v7735_v25, %v6916_v34  ;;  %v7623_v12 = vld [vmem:[#allocation9 + $0x314] sm:$0xf0] }
 0x342   :  { %4285 = vmatpush.bf16.msra.mxu2 %v6421_v22  ;;  %4243 = vmatpush.bf16.msrb.mxu3 %v7057_v44  ;;  %v6993_v22 = vor.u32 %v7752_v35, %v6990_v16  ;;  %v6974_v44 = vld [vmem:[#allocation9 + $0x710] sm:$0xf0]  ;;  %v7565_v35 = vld [vmem:[#allocation9 + $0x14c] sm:$0xf]  ;;  %v6246_v16 = vld [vmem:[#allocation9 + $0x158] sm:$0xf0] }
 0x343   :  { %v6977_v2 = vor.u32 %v7748_v27, %v6974_v44  ;;  %v6249_v41 = vor.u32 %v7565_v35, %v6246_v16  ;;  %v6900_v27 = vld [vmem:[#allocation9 + $0x668] sm:$0xf]  ;;  %v6822_v54 = vld [vmem:[#allocation9 + $0x5d8] sm:$0xf0] }
 0x344   :  { %4329 = vmatpush.bf16.msra.mxu1 %v6773_v46  ;;  %4371 = vmatpush.bf16.msrb.mxu0 %v6137_v58  ;;  %v6340_v46 = vld [vmem:[#allocation9 + $0x208] sm:$0xf]  ;;  %v6806_v34 = vld [vmem:[#allocation9 + $0x5b8] sm:$0xf0] }
 0x345   :  { %v6964_v58 = vld [vmem:[#allocation9 + $0x6e8] sm:$0xf] }
 0x346   :  { %4286 = vmatpush.bf16.msra.mxu2 %v6405_v28  ;;  %4244 = vmatpush.bf16.msrb.mxu3 %v7041_v0  ;;  %v6341_v28 = vor.u32 %v7591_v48, %v6340_v46  ;;  %v7673_v0 = vld [vmem:[#allocation9 + $0x4ac] sm:$0xf]  ;;  %v6965_v3 = vor.u32 %v7747_v52, %v6964_v58  ;;  %v7635_v46 = vld [vmem:[#allocation9 + $0x374] sm:$0xf0]  ;;  %v6614_v58 = vld [vmem:[#allocation9 + $0x438] sm:$0xf0] }
 0x347   :  { %v7561_v48 = vld [vmem:[#allocation9 + $0x12c] sm:$0xf]  ;;  %v6517_v56 = vor.u32 %v7635_v46, %v6516_v42  ;;  %v6790_v42 = vld [vmem:[#allocation9 + $0x598] sm:$0xf0] }
 0x348   :  { %4330 = vmatpush.bf16.msra.mxu1 %v6757_v1  ;;  %4372 = vmatpush.bf16.msrb.mxu0 %v6121_v5  ;;  %v6678_v1 = vld [vmem:[#allocation9 + $0x4b8] sm:$0xf0]  ;;  %v6297_v5 = vor.u32 %v7577_v61, %v6294_v62  ;;  %v7631_v62 = vld [vmem:[#allocation9 + $0x354] sm:$0xf0] }
 0x349   :  { %4193 = vmatmul.bf16.vlgmr.msra.gmra.mxu3 %v8308_v20  ;;  %v6681_v10 = vor.u32 %v7673_v0, %v6678_v1  ;;  %v7727_v0 = vld [vmem:[#allocation9 + $0x654] sm:$0xf0]  ;;  %v6617_v1 = vor.u32 %v7657_v50, %v6614_v58  ;;  %v6422_v46 = vld [vmem:[#allocation9 + $0x2b8] sm:$0xf0] }
 0x34a   :  { %4287 = vmatpush.bf16.msra.mxu2 %v6389_v13  ;;  %4245 = vmatpush.bf16.msrb.mxu3 %v7025_v18  ;;  %v7573_v13 = vld [vmem:[#allocation9 + $0x18c] sm:$0xf]  ;;  %v6774_v50 = vld [vmem:[#allocation9 + $0x578] sm:$0xf0] }
 0x34b   :  { %v7669_v18 = vld [vmem:[#allocation9 + $0x48c] sm:$0xf]  ;;  %v6281_v40 = vor.u32 %v7573_v13, %v6278_v17  ;;  %v6868_v13 = vld [vmem:[#allocation9 + $0x628] sm:$0xf]  ;;  %v7723_v17 = vld [vmem:[#allocation9 + $0x634] sm:$0xf0] }
 0x34c   :  { %4331 = vmatpush.bf16.msra.mxu1 %v6741_v19  ;;  %4373 = vmatpush.bf16.msrb.mxu0 %v6105_v21  ;;  %v6662_v19 = vld [vmem:[#allocation9 + $0x498] sm:$0xf0]  ;;  %v6932_v21 = vld [vmem:[#allocation9 + $0x6a8] sm:$0xf] }
 0x34d   :  { %v6665_v47 = vor.u32 %v7669_v18, %v6662_v19  ;;  %v6933_v31 = vor.u32 %v7739_v24, %v6932_v21  ;;  %v6869_v21 = vor.u32 %v7723_v17, %v6868_v13  ;;  %v6468_v24 = vld [vmem:[#allocation9 + $0x308] sm:$0xf] }
 0x34e   :  { %4288 = vmatpush.bf16.msra.mxu2 %v6373_v14  ;;  %4246 = vmatpush.bf16.msrb.mxu3 %v7009_v32  ;;  %v6646_v14 = vld [vmem:[#allocation9 + $0x478] sm:$0xf0]  ;;  %v6265_v32 = vor.u32 %v7569_v29, %v6262_v30  ;;  %v6852_v29 = vld [vmem:[#allocation9 + $0x608] sm:$0xf]  ;;  %v7719_v30 = vld [vmem:[#allocation9 + $0x614] sm:$0xf0] }
 0x34f   :  { %v6853_v25 = vor.u32 %v7719_v30, %v6852_v29  ;;  %v7593_v29 = vld [vmem:[#allocation9 + $0x22c] sm:$0xf]  ;;  %v6358_v30 = vld [vmem:[#allocation9 + $0x238] sm:$0xf0] }
 0x350   :  { %4332 = vmatpush.bf16.msra.mxu1 %v6725_v4  ;;  %4374 = vmatpush.bf16.msrb.mxu0 %v6089_v33  ;;  %v6532_v4 = vld [vmem:[#allocation9 + $0x388] sm:$0xf]  ;;  %v6649_v33 = vor.u32 %v7665_v57, %v6646_v14 }
 0x351   :  { %v7092_v14 = vld [vmem:[#allocation9 + $0x7e8] sm:$0xf] }
 0x352   :  { %4289 = vmatpush.bf16.msra.mxu2 %v6357_v26  ;;  %4247 = vmatpush.bf16.msrb.mxu3 %v6993_v22  ;;  %v7731_v22 = vld [vmem:[#allocation9 + $0x674] sm:$0xf0] }
 0x353   :  { %4333 = vmatmul.bf16.vlgmr.msra.gmra.mxu1 %v8313_v45  ;;  %4375 = vmatmul.bf16.vlgmr.msrb.gmra.mxu0 %v8290_v8  ;;  %v6565_v8 = vor.u32 %v7647_v11, %v6564_v6  ;;  %v6901_v52 = vor.u32 %v7731_v22, %v6900_v27  ;;  %v7713_v6 = vld [vmem:[#allocation9 + $0x5ec] sm:$0xf] }
 0x354   :  { %4381 = vmatpush.bf16.msrb.mxu1 %v6329_v9  ;;  %4423 = vmatpush.bf16.msra.mxu0 %v6713_v36  ;;  %v7639_v9 = vld [vmem:[#allocation9 + $0x394] sm:$0xf0]  ;;  %v7661_v36 = vld [vmem:[#allocation9 + $0x44c] sm:$0xf]  ;;  %v6841_v19 = vor.u32 %v7713_v6, %v6838_v7  ;;  %v6390_v7 = vld [vmem:[#allocation9 + $0x278] sm:$0xf0] }
 0x355   :  { %v6533_v26 = vor.u32 %v7639_v9, %v6532_v4  ;;  %v6633_v44 = vor.u32 %v7661_v36, %v6630_v37  ;;  %v7705_v4 = vld [vmem:[#allocation9 + $0x5ac] sm:$0xf]  ;;  %v7076_v36 = vld [vmem:[#allocation9 + $0x7c8] sm:$0xf] }
 0x356   :  { %4290 = vmatpush.bf16.msra.mxu2 %v6341_v28  ;;  %4248 = vmatpush.bf16.msrb.mxu3 %v6977_v2  ;;  %v6884_v28 = vld [vmem:[#allocation9 + $0x648] sm:$0xf]  ;;  %v7557_v2 = vld [vmem:[#allocation9 + $0x10c] sm:$0xf]  ;;  %v6809_v16 = vor.u32 %v7705_v4, %v6806_v34  ;;  %v6342_v34 = vld [vmem:[#allocation9 + $0x218] sm:$0xf0] }
 0x357   :  { %v6885_v15 = vor.u32 %v7727_v0, %v6884_v28  ;;  %v7613_v37 = vld [vmem:[#allocation9 + $0x2cc] sm:$0xf]  ;;  %v7767_v28 = vld [vmem:[#allocation9 + $0x794] sm:$0xf0] }
 0x358   :  { %4382 = vmatpush.bf16.msrb.mxu1 %v6313_v49  ;;  %4424 = vmatpush.bf16.msra.mxu0 %v6697_v55  ;;  %v6230_v49 = vld [vmem:[#allocation9 + $0x138] sm:$0xf0]  ;;  %v6500_v55 = vld [vmem:[#allocation9 + $0x348] sm:$0xf]  ;;  %v7693_v0 = vld [vmem:[#allocation9 + $0x54c] sm:$0xf] }
 0x359   :  { %4291 = vmatmul.bf16.vlgmr.msra.gmra.mxu2 %v8305_v43  ;;  %4249 = vmatmul.bf16.vlgmr.msrb.gmra.mxu3 %v8327_v23  ;;  %v6233_v61 = vor.u32 %v7561_v48, %v6230_v49  ;;  %v7771_v48 = vld [vmem:[#allocation9 + $0x7b4] sm:$0xf0]  ;;  %v7697_v49 = vld [vmem:[#allocation9 + $0x56c] sm:$0xf] }
 0x35a   :  { %4339 = vmatpush.bf16.msrb.mxu2 %v6965_v3  ;;  %4297 = vmatpush.bf16.msra.mxu3 %v6581_v59  ;;  %v6214_v3 = vld [vmem:[#allocation9 + $0x118] sm:$0xf0]  ;;  %v7653_v59 = vld [vmem:[#allocation9 + $0x40c] sm:$0xf] }
 0x35b   :  { %v6217_v11 = vor.u32 %v7557_v2, %v6214_v3  ;;  %v7601_v6 = vld [vmem:[#allocation9 + $0x26c] sm:$0xf] }
 0x35c   :  { %4383 = vmatpush.bf16.msrb.mxu1 %v6297_v5  ;;  %4425 = vmatpush.bf16.msra.mxu0 %v6681_v10  ;;  %v6598_v5 = vld [vmem:[#allocation9 + $0x418] sm:$0xf0]  ;;  %v6501_v10 = vor.u32 %v7631_v62, %v6500_v55  ;;  %v6777_v55 = vor.u32 %v7697_v49, %v6774_v50  ;;  %v6393_v13 = vor.u32 %v7601_v6, %v6390_v7  ;;  %v7589_v4 = vld [vmem:[#allocation9 + $0x20c] sm:$0xf]  ;;  %v8343_v49 = vpop.f32.mrf.mxu0 }
 0x35d   :  { %v6601_v18 = vor.u32 %v7653_v59, %v6598_v5  ;;  %v6406_v62 = vld [vmem:[#allocation9 + $0x298] sm:$0xf0]  ;;  %v7028_v5 = vld [vmem:[#allocation9 + $0x768] sm:$0xf]  ;;  %v7725_v6 = vld [vmem:[#allocation9 + $0x64c] sm:$0xf] }
 0x35e   :  { %4340 = vmatpush.bf16.msrb.mxu2 %v6949_v39  ;;  %4298 = vmatpush.bf16.msra.mxu3 %v6565_v8  ;;  %v6484_v39 = vld [vmem:[#allocation9 + $0x328] sm:$0xf]  ;;  %v7627_v8 = vld [vmem:[#allocation9 + $0x334] sm:$0xf0]  ;;  %v6886_v7 = vld [vmem:[#allocation9 + $0x658] sm:$0xf0] }
 0x360   :  { %4384 = vmatpush.bf16.msrb.mxu1 %v6281_v40  ;;  %4426 = vmatpush.bf16.msra.mxu0 %v6665_v47  ;;  %v7709_v40 = vld [vmem:[#allocation9 + $0x5cc] sm:$0xf]  ;;  %v6485_v47 = vor.u32 %v7627_v8, %v6484_v39  ;;  %v6374_v8 = vld [vmem:[#allocation9 + $0x258] sm:$0xf0] }
 0x361   :  { %v6825_v57 = vor.u32 %v7709_v40, %v6822_v54  ;;  %v7597_v39 = vld [vmem:[#allocation9 + $0x24c] sm:$0xf]  ;;  %v7759_v40 = vld [vmem:[#allocation9 + $0x754] sm:$0xf0] }
 0x362   :  { %4341 = vmatpush.bf16.msrb.mxu2 %v6933_v31  ;;  %4299 = vmatpush.bf16.msra.mxu3 %v6549_v63  ;;  %v7617_v31 = vld [vmem:[#allocation9 + $0x2ec] sm:$0xf]  ;;  %v6454_v63 = vld [vmem:[#allocation9 + $0x2f8] sm:$0xf0] }
 0x363   :  { %v6457_v9 = vor.u32 %v7617_v31, %v6454_v63  ;;  %v7685_v54 = vld [vmem:[#allocation9 + $0x50c] sm:$0xf]  ;;  %v6361_v31 = vor.u32 %v7593_v29, %v6358_v30  ;;  %v6470_v30 = vld [vmem:[#allocation9 + $0x318] sm:$0xf0] }
 0x364   :  { %4385 = vmatpush.bf16.msrb.mxu1 %v6265_v32  ;;  %4427 = vmatpush.bf16.msra.mxu0 %v6649_v33  ;;  %v7779_v32 = vld [vmem:[#allocation9 + $0x7f4] sm:$0xf0]  ;;  %v6469_v33 = vor.u32 %v7623_v12, %v6468_v24  ;;  %v6377_v24 = vor.u32 %v7597_v39, %v6374_v8  ;;  %v6870_v39 = vld [vmem:[#allocation9 + $0x638] sm:$0xf0]  ;;  %v7625_v8 = vld [vmem:[#allocation9 + $0x32c] sm:$0xf] }
 0x365   :  { %v7093_v35 = vor.u32 %v7779_v32, %v7092_v14  ;;  %v7755_v14 = vld [vmem:[#allocation9 + $0x734] sm:$0xf0]  ;;  %v6980_v32 = vld [vmem:[#allocation9 + $0x708] sm:$0xf]  ;;  %v7621_v29 = vld [vmem:[#allocation9 + $0x30c] sm:$0xf] }
 0x366   :  { %4342 = vmatpush.bf16.msrb.mxu2 %v6917_v38  ;;  %4300 = vmatpush.bf16.msra.mxu3 %v6533_v26  ;;  %v6438_v38 = vld [vmem:[#allocation9 + $0x2d8] sm:$0xf0]  ;;  %v7775_v26 = vld [vmem:[#allocation9 + $0x7d4] sm:$0xf0] }
 0x367   :  { %v6441_v27 = vor.u32 %v7613_v37, %v6438_v38 }
 0x368   :  { %4386 = vmatpush.bf16.msrb.mxu1 %v6249_v41  ;;  %4428 = vmatpush.bf16.msra.mxu0 %v6633_v44  ;;  %v7701_v41 = vld [vmem:[#allocation9 + $0x58c] sm:$0xf] }
 0x369   :  { %v6793_v22 = vor.u32 %v7701_v41, %v6790_v42  ;;  %v7609_v44 = vld [vmem:[#allocation9 + $0x2ac] sm:$0xf]  ;;  %v6950_v42 = vld [vmem:[#allocation9 + $0x6d8] sm:$0xf0] }
 0x36a   :  { %4343 = vmatpush.bf16.msrb.mxu2 %v6901_v52  ;;  %4301 = vmatpush.bf16.msra.mxu3 %v6517_v56  ;;  %v6425_v58 = vor.u32 %v7609_v44, %v6422_v46  ;;  %v7044_v56 = vld [vmem:[#allocation9 + $0x788] sm:$0xf]  ;;  %v7741_v41 = vld [vmem:[#allocation9 + $0x6cc] sm:$0xf]  ;;  %v6934_v46 = vld [vmem:[#allocation9 + $0x6b8] sm:$0xf0] }
 0x36b   :  { %v7045_v3 = vor.u32 %v7767_v28, %v7044_v56  ;;  %v7737_v44 = vld [vmem:[#allocation9 + $0x6ac] sm:$0xf] }
 0x36c   :  { %4387 = vmatpush.bf16.msrb.mxu1 %v6233_v61  ;;  %4429 = vmatpush.bf16.msra.mxu0 %v6617_v1  ;;  %v7605_v61 = vld [vmem:[#allocation9 + $0x28c] sm:$0xf]  ;;  %v6758_v1 = vld [vmem:[#allocation9 + $0x558] sm:$0xf0]  ;;  %v6937_v50 = vor.u32 %v7737_v44, %v6934_v46 }
 0x36d   :  { %v6409_v2 = vor.u32 %v7605_v61, %v6406_v62  ;;  %v6761_v59 = vor.u32 %v7693_v0, %v6758_v1  ;;  %v7637_v56 = vld [vmem:[#allocation9 + $0x38c] sm:$0xf]  ;;  %v6534_v61 = vld [vmem:[#allocation9 + $0x398] sm:$0xf0]  ;;  %v4054_v1 = vpop.f32.mrf.mxu1 }
 0x36e   :  { %4344 = vmatpush.bf16.msrb.mxu2 %v6885_v15  ;;  %4302 = vmatpush.bf16.msra.mxu3 %v6501_v10  ;;  %v7763_v15 = vld [vmem:[#allocation9 + $0x774] sm:$0xf0]  ;;  %v7689_v10 = vld [vmem:[#allocation9 + $0x52c] sm:$0xf]  ;;  %v6537_v28 = vor.u32 %v7637_v56, %v6534_v61  ;;  %v7014_v56 = vld [vmem:[#allocation9 + $0x758] sm:$0xf0] }
 0x36f   :  { %v7029_v17 = vor.u32 %v7763_v15, %v7028_v5  ;;  %v7729_v0 = vld [vmem:[#allocation9 + $0x66c] sm:$0xf]  ;;  %v4042_v15 = vpop.f32.mrf.mxu0 }
 0x370   :  { %4388 = vmatpush.bf16.msrb.mxu1 %v6217_v11  ;;  %4430 = vmatpush.bf16.msra.mxu0 %v6601_v18  ;;  %v6742_v11 = vld [vmem:[#allocation9 + $0x538] sm:$0xf0] }
 0x371   :  { %v6745_v18 = vor.u32 %v7689_v10, %v6742_v11  ;;  %v4068_v10 = vpop.f32.mrf.mxu2  ;;  %v7629_v11 = vld [vmem:[#allocation9 + $0x34c] sm:$0xf] }
 0x372   :  { %4345 = vmatpush.bf16.msrb.mxu2 %v6869_v21  ;;  %4303 = vmatpush.bf16.msra.mxu3 %v6485_v47  ;;  %v6726_v21 = vld [vmem:[#allocation9 + $0x518] sm:$0xf0] }
 0x373   :  { %4389 = vmatmul.bf16.vlgmr.msrb.gmra.mxu1 %v8296_v51  ;;  %4431 = vmatmul.bf16.vlgmr.msra.gmra.mxu0 %v8301_v53  ;;  %v7077_v51 = vor.u32 %v7775_v26, %v7076_v36  ;;  %v7060_v53 = vld [vmem:[#allocation9 + $0x7a8] sm:$0xf]  ;;  %v6729_v12 = vor.u32 %v7685_v54, %v6726_v21  ;;  %v6345_v36 = vor.u32 %v7589_v4, %v6342_v34  ;;  %v4082_v34 = vpop.f32.mrf.mxu3 }
 0x374   :  { %4437 = vmatpush.bf16.msra.mxu1 %v6841_v19  ;;  %v7061_v52 = vor.u32 %v7771_v48, %v7060_v53  ;;  %v7012_v19 = vld [vmem:[#allocation9 + $0x748] sm:$0xf]  ;;  %v6550_v48 = vld [vmem:[#allocation9 + $0x3b8] sm:$0xf0]  ;;  %v6473_v4 = vor.u32 %v7621_v29, %v6470_v30 }
 0x375   :  { %v7013_v47 = vor.u32 %v7759_v40, %v7012_v19  ;;  %v7721_v19 = vld [vmem:[#allocation9 + $0x62c] sm:$0xf]  ;;  %v6486_v40 = vld [vmem:[#allocation9 + $0x338] sm:$0xf0]  ;;  %v4056_v54 = vpop.f32.mrf.mxu1 }
 0x376   :  { %4346 = vmatpush.bf16.msrb.mxu2 %v6853_v25  ;;  %4304 = vmatpush.bf16.msra.mxu3 %v6469_v33  ;;  %v7751_v25 = vld [vmem:[#allocation9 + $0x714] sm:$0xf0]  ;;  %v7745_v33 = vld [vmem:[#allocation9 + $0x6ec] sm:$0xf]  ;;  %v6873_v21 = vor.u32 %v7721_v19, %v6870_v39 }
 0x377   :  { %v6981_v37 = vor.u32 %v7751_v25, %v6980_v32 }
 0x378   :  { %4438 = vmatpush.bf16.msra.mxu1 %v6825_v57  ;;  %v6996_v57 = vld [vmem:[#allocation9 + $0x728] sm:$0xf] }
 0x379   :  { %4347 = vmatmul.bf16.vlgmr.msrb.gmra.mxu2 %v8321_v60  ;;  %4305 = vmatmul.bf16.vlgmr.msra.gmra.mxu3 %v8308_v20  ;;  %v6997_v63 = vor.u32 %v7755_v14, %v6996_v57  ;;  %v7777_v57 = vld [vmem:[#allocation9 + $0x7ec] sm:$0xf]  ;;  %v7094_v14 = vld [vmem:[#allocation9 + $0x7f8] sm:$0xf0] }
 0x37a   :  { %4395 = vmatpush.bf16.msra.mxu2 %v6457_v9  ;;  %4353 = vmatpush.bf16.msrb.mxu3 %v7093_v35  ;;  %v6966_v9 = vld [vmem:[#allocation9 + $0x6f8] sm:$0xf0]  ;;  %v7649_v35 = vld [vmem:[#allocation9 + $0x3ec] sm:$0xf]  ;;  %v7097_v25 = vor.u32 %v7777_v57, %v7094_v14 }
 0x37b   :  { %v6969_v38 = vor.u32 %v7745_v33, %v6966_v9  ;;  %v7773_v33 = vld [vmem:[#allocation9 + $0x7cc] sm:$0xf]  ;;  %v7078_v9 = vld [vmem:[#allocation9 + $0x7d8] sm:$0xf0] }
 0x37c   :  { %4439 = vmatpush.bf16.msra.mxu1 %v6809_v16  ;;  %v6582_v16 = vld [vmem:[#allocation9 + $0x3f8] sm:$0xf0] }
 0x37d   :  { %v6585_v26 = vor.u32 %v7649_v35, %v6582_v16  ;;  %v4110_v35 = vpop.f32.mrf.mxu1  ;;  %v7081_v16 = vor.u32 %v7773_v33, %v7078_v9 }
 0x37e   :  { %4396 = vmatpush.bf16.msra.mxu2 %v6441_v27  ;;  %4354 = vmatpush.bf16.msrb.mxu3 %v7077_v51  ;;  %v7645_v27 = vld [vmem:[#allocation9 + $0x3cc] sm:$0xf]  ;;  %v6566_v51 = vld [vmem:[#allocation9 + $0x3d8] sm:$0xf0] }
 0x37f   :  { %v6569_v53 = vor.u32 %v7645_v27, %v6566_v51  ;;  %v7765_v51 = vld [vmem:[#allocation9 + $0x78c] sm:$0xf] }
 0x380   :  { %4440 = vmatpush.bf16.msra.mxu1 %v6793_v22  ;;  %v6953_v22 = vor.u32 %v7741_v41, %v6950_v42  ;;  %v4057_v41 = vadd.f32 %v4056_v54, %v4042_v15 }
 0x382   :  { %4397 = vmatpush.bf16.msra.mxu2 %v6425_v58  ;;  %4355 = vmatpush.bf16.msrb.mxu3 %v7061_v52  ;;  %v7733_v52 = vld [vmem:[#allocation9 + $0x68c] sm:$0xf] }
 0x384   :  { %4441 = vmatpush.bf16.msra.mxu1 %v6777_v55  ;;  %v6918_v55 = vld [vmem:[#allocation9 + $0x698] sm:$0xf0] }
 0x385   :  { %v6921_v62 = vor.u32 %v7733_v52, %v6918_v55 }
 0x386   :  { %4398 = vmatpush.bf16.msra.mxu2 %v6409_v2  ;;  %4356 = vmatpush.bf16.msrb.mxu3 %v7045_v3  ;;  %v7633_v2 = vld [vmem:[#allocation9 + $0x36c] sm:$0xf]  ;;  %v6518_v3 = vld [vmem:[#allocation9 + $0x378] sm:$0xf0] }
 0x387   :  { %v6521_v5 = vor.u32 %v7633_v2, %v6518_v3  ;;  %v6998_v2 = vld [vmem:[#allocation9 + $0x738] sm:$0xf0] }
 0x388   :  { %4442 = vmatpush.bf16.msra.mxu1 %v6761_v59 }
 0x38a   :  { %4399 = vmatpush.bf16.msra.mxu2 %v6393_v13  ;;  %4357 = vmatpush.bf16.msrb.mxu3 %v7029_v17  ;;  %v6502_v13 = vld [vmem:[#allocation9 + $0x358] sm:$0xf0]  ;;  %v6889_v17 = vor.u32 %v7725_v6, %v6886_v7 }
 0x38c   :  { %4443 = vmatpush.bf16.msra.mxu1 %v6745_v18  ;;  %v6505_v18 = vor.u32 %v7629_v11, %v6502_v13  ;;  %v6982_v11 = vld [vmem:[#allocation9 + $0x718] sm:$0xf0] }
 0x38e   :  { %4400 = vmatpush.bf16.msra.mxu2 %v6377_v24  ;;  %4358 = vmatpush.bf16.msrb.mxu3 %v7013_v47  ;;  %v6489_v24 = vor.u32 %v7625_v8, %v6486_v40  ;;  %v7717_v47 = vld [vmem:[#allocation9 + $0x60c] sm:$0xf] }
 0x390   :  { %4444 = vmatpush.bf16.msra.mxu1 %v6729_v12  ;;  %v6854_v12 = vld [vmem:[#allocation9 + $0x618] sm:$0xf0] }
 0x391   :  { %v6857_v32 = vor.u32 %v7717_v47, %v6854_v12 }
 0x392   :  { %4401 = vmatpush.bf16.msra.mxu2 %v6361_v31  ;;  %4359 = vmatpush.bf16.msrb.mxu3 %v6997_v63  ;;  %v4096_v31 = vpop.f32.mrf.mxu0  ;;  %v4070_v63 = vpop.f32.mrf.mxu2 }
 0x393   :  { %4445 = vmatmul.bf16.vlgmr.msra.gmra.mxu1 %v8313_v45  ;;  %v7641_v45 = vld [vmem:[#allocation9 + $0x3ac] sm:$0xf]  ;;  %v4071_v46 = vadd.f32 %v4070_v63, %v4057_v41 }
 0x394   :  { %v6553_v58 = vor.u32 %v7641_v45, %v6550_v48  ;;  %v7761_v48 = vld [vmem:[#allocation9 + $0x76c] sm:$0xf] }
 0x396   :  { %4402 = vmatpush.bf16.msra.mxu2 %v6345_v36  ;;  %4360 = vmatpush.bf16.msrb.mxu3 %v6981_v37  ;;  %v7769_v36 = vld [vmem:[#allocation9 + $0x7ac] sm:$0xf]  ;;  %v7062_v37 = vld [vmem:[#allocation9 + $0x7b8] sm:$0xf0] }
 0x397   :  { %v7065_v27 = vor.u32 %v7769_v36, %v7062_v37 }
 0x399   :  { %4403 = vmatmul.bf16.vlgmr.msra.gmra.mxu2 %v8305_v43  ;;  %4361 = vmatmul.bf16.vlgmr.msrb.gmra.mxu3 %v8327_v23  ;;  %v6902_v43 = vld [vmem:[#allocation9 + $0x678] sm:$0xf0] }
 0x39a   :  { %4451 = vmatpush.bf16.msrb.mxu2 %v6969_v38  ;;  %4409 = vmatpush.bf16.msra.mxu3 %v6585_v26  ;;  %v6905_v59 = vor.u32 %v7729_v0, %v6902_v43  ;;  %v4055_v26 = vadd.f32 %v4054_v1, %v8343_v49  ;;  %v4098_v42 = vpop.f32.mrf.mxu0  ;;  %v7757_v49 = vld [vmem:[#allocation9 + $0x74c] sm:$0xf] }
 0x39b   :  { %v7017_v43 = vor.u32 %v7757_v49, %v7014_v56  ;;  %v7753_v1 = vld [vmem:[#allocation9 + $0x72c] sm:$0xf] }
 0x39c   :  { %v4124_v38 = vpop.f32.mrf.mxu2  ;;  %v4069_v44 = vadd.f32 %v4068_v10, %v4055_v26  ;;  %v7001_v6 = vor.u32 %v7753_v1, %v6998_v2  ;;  %v7749_v10 = vld [vmem:[#allocation9 + $0x70c] sm:$0xf] }
 0x39d   :  { %v6985_v8 = vor.u32 %v7749_v10, %v6982_v11 }
 0x39e   :  { %4452 = vmatpush.bf16.msrb.mxu2 %v6953_v22  ;;  %4410 = vmatpush.bf16.msra.mxu3 %v6569_v53  ;;  %v7046_v22 = vld [vmem:[#allocation9 + $0x798] sm:$0xf0]  ;;  %v4084_v53 = vpop.f32.mrf.mxu3 }
 0x39f   :  { %v7049_v45 = vor.u32 %v7765_v51, %v7046_v22  ;;  %v4085_v52 = vadd.f32 %v4084_v53, %v4071_v46 }
 0x3a1   :  { %v4099_v0 = vadd.f32 %v4098_v42, %v4085_v52 }
 0x3a2   :  { %4453 = vmatpush.bf16.msrb.mxu2 %v6937_v50  ;;  %4411 = vmatpush.bf16.msra.mxu3 %v6553_v58  ;;  %v4112_v50 = vpop.f32.mrf.mxu1  ;;  %v4083_v58 = vadd.f32 %v4082_v34, %v4069_v44  ;;  %v4152_v61 = vpop.f32.mrf.mxu0 }
 0x3a4   :  { %v4126_v55 = vpop.f32.mrf.mxu2 }
 0x3a6   :  { %4454 = vmatpush.bf16.msrb.mxu2 %v6921_v62  ;;  %4412 = vmatpush.bf16.msra.mxu3 %v6537_v28  ;;  %v4097_v28 = vadd.f32 %v4096_v31, %v4083_v58 }
 0x3a8   :  { %v4111_v3 = vadd.f32 %v4110_v35, %v4097_v28 }
 0x3aa   :  { %4455 = vmatpush.bf16.msrb.mxu2 %v6905_v59  ;;  %4413 = vmatpush.bf16.msra.mxu3 %v6521_v5  ;;  %v4113_v59 = vadd.f32 %v4112_v50, %v4099_v0  ;;  %v4166_v5 = vpop.f32.mrf.mxu1  ;;  %v4125_v7 = vadd.f32 %v4124_v38, %v4111_v3  ;;  %v4154_v39 = vpop.f32.mrf.mxu0 }
 0x3ab   :  { %v4167_v29 = vadd.f32 %v4166_v5, %v4152_v61 }
 0x3ac   :  { %v4127_v15 = vadd.f32 %v4126_v55, %v4113_v59  ;;  %v4180_v13 = vpop.f32.mrf.mxu2 }
 0x3ad   :  { %v4181_v31 = vadd.f32 %v4180_v13, %v4167_v29 }
 0x3ae   :  { %4456 = vmatpush.bf16.msrb.mxu2 %v6889_v17  ;;  %4414 = vmatpush.bf16.msra.mxu3 %v6505_v18 }
 0x3b2   :  { %4457 = vmatpush.bf16.msrb.mxu2 %v6873_v21  ;;  %4415 = vmatpush.bf16.msra.mxu3 %v6489_v24  ;;  %v4168_v54 = vpop.f32.mrf.mxu1  ;;  %v8348_v24 = vld [vmem:[#allocation2] sm:$0xff]  ;;  %v4208_v12 = vpop.f32.mrf.mxu0 }
 0x3b3   :  { %v4169_v30 = vadd.f32 %v4168_v54, %v4154_v39 }
 0x3b4   :  { %v4182_v47 = vpop.f32.mrf.mxu2 }
 0x3b5   :  { %v4183_v63 = vadd.f32 %v4182_v47, %v4169_v30 }
 0x3b6   :  { %4458 = vmatpush.bf16.msrb.mxu2 %v6857_v32  ;;  %4416 = vmatpush.bf16.msra.mxu3 %v6473_v4 }
 0x3b9   :  { %4459 = vmatmul.bf16.vlgmr.msrb.gmra.mxu2 %v8321_v60  ;;  %4417 = vmatmul.bf16.vlgmr.msra.gmra.mxu3 %v8308_v20  ;;  %v7030_v60 = vld [vmem:[#allocation9 + $0x778] sm:$0xf0] }
 0x3ba   :  { %4465 = vmatpush.bf16.msrb.mxu3 %v7097_v25  ;;  %v7033_v20 = vor.u32 %v7761_v48, %v7030_v60  ;;  %v4222_v57 = vpop.f32.mrf.mxu1  ;;  %v4210_v25 = vpop.f32.mrf.mxu0 }
 0x3bc   :  { %v4138_v62 = vpop.f32.mrf.mxu3  ;;  %v4236_v34 = vpop.f32.mrf.mxu2 }
 0x3bd   :  { %v4139_v18 = vadd.f32 %v4138_v62, %v4125_v7 }
 0x3be   :  { %4466 = vmatpush.bf16.msrb.mxu3 %v7081_v16 }
 0x3c2   :  { %4467 = vmatpush.bf16.msrb.mxu3 %v7065_v27  ;;  %v4224_v16 = vpop.f32.mrf.mxu1  ;;  %v4264_v22 = vpop.f32.mrf.mxu0 }
 0x3c4   :  { %v4140_v17 = vpop.f32.mrf.mxu3  ;;  %v4238_v38 = vpop.f32.mrf.mxu2 }
 0x3c5   :  { %v4141_v19 = vadd.f32 %v4140_v17, %v4127_v15 }
 0x3c6   :  { %4468 = vmatpush.bf16.msrb.mxu3 %v7049_v45 }
 0x3c7   :  { %v4479_v40 = vpack.c.bf16 %v4141_v19, %v4139_v18 }
 0x3c9   :  { %4500 = vmatpush.bf16.msrb.mxu0 %v4479_v40 }
 0x3ca   :  { %4469 = vmatpush.bf16.msrb.mxu3 %v7033_v20  ;;  %v4278_v53 = vpop.f32.mrf.mxu1  ;;  %v4266_v46 = vpop.f32.mrf.mxu0 }
 0x3cb   :  { %v4279_v58 = vadd.f32 %v4278_v53, %v4264_v22 }
 0x3cc   :  { %v4194_v21 = vpop.f32.mrf.mxu3  ;;  %7098 = vmatmul.msk.bf16.vlgmr.msrb.gmra.mxu0 %vm277_vm2, %v8348_v24 }
 0x3cd   :  { %v4195_v32 = vadd.f32 %v4194_v21, %v4181_v31 }
 0x3ce   :  { %4470 = vmatpush.bf16.msrb.mxu3 %v7017_v43 }
 0x3cf   :  { %v4209_v33 = vadd.f32 %v4208_v12, %v4195_v32 }
 0x3d1   :  { %v4223_v36 = vadd.f32 %v4222_v57, %v4209_v33 }
 0x3d2   :  { %4471 = vmatpush.bf16.msrb.mxu3 %v7001_v6  ;;  %v4280_v48 = vpop.f32.mrf.mxu1  ;;  %v4320_v60 = vpop.f32.mrf.mxu0 }
 0x3d3   :  { %v4281_v52 = vadd.f32 %v4280_v48, %v4266_v46 }
 0x3d4   :  { %v4196_v14 = vpop.f32.mrf.mxu3 }
 0x3d5   :  { %v4197_v4 = vadd.f32 %v4196_v14, %v4183_v63 }
 0x3d6   :  { %4472 = vmatpush.bf16.msrb.mxu3 %v6985_v8 }
 0x3d7   :  { %v4211_v9 = vadd.f32 %v4210_v25, %v4197_v4 }
 0x3d9   :  { %4473 = vmatmul.bf16.vlgmr.msrb.gmra.mxu3 %v8327_v23  ;;  %v4225_v37 = vadd.f32 %v4224_v16, %v4211_v9  ;;  %v4237_v23 = vadd.f32 %v4236_v34, %v4223_v36 }
 0x3da   :  { %v4334_v55 = vpop.f32.mrf.mxu1  ;;  %v4322_v0 = vpop.f32.mrf.mxu0 }
 0x3db   :  { %v4239_v26 = vadd.f32 %v4238_v38, %v4225_v37 }
 0x3dc   :  { %v4250_v35 = vpop.f32.mrf.mxu3  ;;  %v4292_v44 = vpop.f32.mrf.mxu2 }
 0x3dd   :  { %v4251_v42 = vadd.f32 %v4250_v35, %v4237_v23  ;;  %v4293_v49 = vadd.f32 %v4292_v44, %v4279_v58 }
 0x3e2   :  { %v4336_v3 = vpop.f32.mrf.mxu1  ;;  %v4376_v18 = vpop.f32.mrf.mxu0 }
 0x3e4   :  { %v4252_v41 = vpop.f32.mrf.mxu3  ;;  %v4294_v50 = vpop.f32.mrf.mxu2 }
 0x3e5   :  { %v4253_v27 = vadd.f32 %v4252_v41, %v4239_v26  ;;  %v4295_v56 = vadd.f32 %v4294_v50, %v4281_v52 }
 0x3e7   :  { %v4480_v51 = vpack.c.bf16 %v4253_v27, %v4251_v42 }
 0x3e9   :  { %4514 = vmatpush.bf16.msrb.mxu1 %v4480_v51  ;;  %v8359_v51 = vld [vmem:[#allocation10] sm:$0xf] }
 0x3ea   :  { %v4378_v8 = vpop.f32.mrf.mxu0  ;;  %v4487_v53 = vperm.slane %v8359_v51, 2 }
 0x3ec   :  { %7099 = vmatmul.msk.bf16.vlgmr.msrb.gmra.mxu1 %vm277_vm2, %v8348_v24 }
 0x3f0   :  { %v4390_v19 = vpop.f32.mrf.mxu1 }
 0x3f1   :  { %v4391_v12 = vadd.f32 %v4390_v19, %v4376_v18  ;;  %v7785_v18 = vld [vmem:[#allocation12 + $0x28] sm:$0xff] }
 0x3f2   :  { %v4432_v21 = vpop.f32.mrf.mxu0  ;;  %v7793_v19 = vld [vmem:[#allocation12 + $0x68] sm:$0xff] }
 0x3f8   :  { %v4392_v54 = vpop.f32.mrf.mxu1 }
 0x3f9   :  { %v4393_v29 = vadd.f32 %v4392_v54, %v4378_v8  ;;  %v7784_v8 = vld [vmem:[#allocation12 + $0x20] sm:$0xff] }
 0x3fa   :  { %v4434_v34 = vpop.f32.mrf.mxu0 }
 0x3fc   :  { %v4306_v45 = vpop.f32.mrf.mxu3  ;;  %v4348_v28 = vpop.f32.mrf.mxu2 }
 0x3fd   :  { %v4307_v61 = vadd.f32 %v4306_v45, %v4293_v49 }
 0x3ff   :  { %v4321_v43 = vadd.f32 %v4320_v60, %v4307_v61 }
 0x401   :  { %v4335_v59 = vadd.f32 %v4334_v55, %v4321_v43  ;;  %v4485_v55 = vperm.slane %v8359_v51, 0 }
 0x403   :  { %v4349_v7 = vadd.f32 %v4348_v28, %v4335_v59 }
 0x404   :  { %v4308_v20 = vpop.f32.mrf.mxu3  ;;  %v4350_v6 = vpop.f32.mrf.mxu2 }
 0x405   :  { %v4309_v62 = vadd.f32 %v4308_v20, %v4295_v56  ;;  %v4486_v20 = vperm.slane %v8359_v51, 1 }
 0x407   :  { %v4323_v1 = vadd.f32 %v4322_v0, %v4309_v62 }
 0x409   :  { %v4337_v5 = vadd.f32 %v4336_v3, %v4323_v1  ;;  %v4561_v3 = vld [vmem:[%s8383_s2] sm:$0x1] }
 0x40b   :  { %v4351_v15 = vadd.f32 %v4350_v6, %v4337_v5  ;;  %v7803_v6 = vld [vmem:[#allocation12 + $0xb8] sm:$0xff] }
 0x410   :  { %v4446_v30 = vpop.f32.mrf.mxu1 }
 0x418   :  { %v4448_v35 = vpop.f32.mrf.mxu1 }
 0x41c   :  { %v4362_v2 = vpop.f32.mrf.mxu3  ;;  %v4404_v39 = vpop.f32.mrf.mxu2 }
 0x41d   :  { %v4363_v11 = vadd.f32 %v4362_v2, %v4349_v7  ;;  %v4405_v14 = vadd.f32 %v4404_v39, %v4391_v12  ;;  %v7787_v7 = vld [vmem:[#allocation12 + $0x38] sm:$0xff]  ;;  %v7800_v39 = vld [vmem:[#allocation12 + $0xa0] sm:$0xff] }
 0x41e   :  { %v7791_v12 = vld [vmem:[#allocation12 + $0x58] sm:$0xff] }
 0x424   :  { %v4364_v10 = vpop.f32.mrf.mxu3  ;;  %v4406_v47 = vpop.f32.mrf.mxu2 }
 0x425   :  { %v4365_v13 = vadd.f32 %v4364_v10, %v4351_v15  ;;  %v4407_v31 = vadd.f32 %v4406_v47, %v4393_v29  ;;  %v7795_v15 = vld [vmem:[#allocation12 + $0x78] sm:$0xff]  ;;  %v7802_v10 = vld [vmem:[#allocation12 + $0xb0] sm:$0xff]  ;;  %v4488_v29 = vperm.slane %v8359_v51, 3 }
 0x426   :  { %v7783_v47 = vld [vmem:[#allocation12 + $0x18] sm:$0xff] }
 0x427   :  { %v4481_v17 = vpack.c.bf16 %v4365_v13, %v4363_v11  ;;  %v7786_v11 = vld [vmem:[#allocation12 + $0x30] sm:$0xff] }
 0x428   :  { %v7794_v13 = vld [vmem:[#allocation12 + $0x70] sm:$0xff] }
 0x429   :  { %4528 = vmatpush.bf16.msra.mxu2 %v4481_v17  ;;  %v7801_v17 = vld [vmem:[#allocation12 + $0xa8] sm:$0xff] }
 0x42c   :  { %7100 = vmatmul.msk.bf16.vlgmr.msra.gmra.mxu2 %vm277_vm2, %v8348_v24 }
 0x43c   :  { %v4418_v40 = vpop.f32.mrf.mxu3  ;;  %v4460_v4 = vpop.f32.mrf.mxu2 }
 0x43d   :  { %v4419_v63 = vadd.f32 %v4418_v40, %v4405_v14  ;;  %v7792_v40 = vld [vmem:[#allocation12 + $0x60] sm:$0xff]  ;;  %v7790_v14 = vld [vmem:[#allocation12 + $0x50] sm:$0xff] }
 0x43f   :  { %v4433_v25 = vadd.f32 %v4432_v21, %v4419_v63  ;;  %v7799_v21 = vld [vmem:[#allocation12 + $0x98] sm:$0xff] }
 0x441   :  { %v4447_v16 = vadd.f32 %v4446_v30, %v4433_v25  ;;  %v7798_v30 = vld [vmem:[#allocation12 + $0x90] sm:$0xff] }
 0x443   :  { %v4461_v38 = vadd.f32 %v4460_v4, %v4447_v16  ;;  %v7781_v4 = vld [vmem:[#allocation12 + $0x8] sm:$0xff]  ;;  %v7810_v16 = vld [vmem:[#allocation12 + $0xf0] sm:$0xff] }
 0x444   :  { %v4420_v57 = vpop.f32.mrf.mxu3  ;;  %v4462_v37 = vpop.f32.mrf.mxu2 }
 0x445   :  { %v4421_v32 = vadd.f32 %v4420_v57, %v4407_v31  ;;  %v7782_v57 = vld [vmem:[#allocation12 + $0x10] sm:$0xff] }
 0x447   :  { %v4435_v33 = vadd.f32 %v4434_v34, %v4421_v32  ;;  %v7797_v32 = vld [vmem:[#allocation12 + $0x88] sm:$0xff] }
 0x449   :  { %v4449_v36 = vadd.f32 %v4448_v35, %v4435_v33  ;;  %v4502_v58 = vpop.f32.mrf.mxu0 }
 0x44a   :  { %v4503_v49 = vadd.f32 %v4502_v58, %v4485_v55 }
 0x44b   :  { %v4463_v23 = vadd.f32 %v4462_v37, %v4449_v36  ;;  %v7809_v36 = vld [vmem:[#allocation12 + $0xe8] sm:$0xff]  ;;  %v7808_v37 = vld [vmem:[#allocation12 + $0xe0] sm:$0xff] }
 0x44c   :  { %v4549_v62 = vmax.f32 %v4503_v49, 0.0  ;;  %v7817_v49 = vld [vmem:[#allocation13 + $0x28] sm:$0xff] }
 0x451   :  { %v4504_v56 = vpop.f32.mrf.mxu0 }
 0x452   :  { %v4505_v0 = vadd.f32 %v4504_v56, %v4485_v55  ;;  %v7819_v55 = vld [vmem:[#allocation13 + $0x38] sm:$0xff] }
 0x453   :  { %v7815_v56 = vld [vmem:[#allocation13 + $0x18] sm:$0xff] }
 0x454   :  { %v4553_v1 = vmax.f32 %v4505_v0, 0.0  ;;  %v7814_v0 = vld [vmem:[#allocation13 + $0x10] sm:$0xff] }
 0x456   :  { %v4557_v59 = vpack.c.bf16 %v4553_v1, %v4549_v62 }
 0x458   :  { %4572 = vmatpush.bf16.msra.mxu0 %v4557_v59 }
 0x45b   :  { %7102 = vmatmul.msk.bf16.vlgmr.msra.gmra.mxu0 %vm277_vm2, %v4561_v3 }
 0x45c   :  { %v4474_v9 = vpop.f32.mrf.mxu3  ;;  %4881 = vmatpush.bf16.msrb.mxu0 %v7787_v7  ;;  %v7812_v7 = vld [vmem:[#allocation13] sm:$0xff] }
 0x45d   :  { %v4475_v41 = vadd.f32 %v4474_v9, %v4461_v38  ;;  %v7811_v9 = vld [vmem:[#allocation12 + $0xf8] sm:$0xff] }
 0x45e   :  { %v7807_v38 = vld [vmem:[#allocation12 + $0xd8] sm:$0xff] }
 0x460   :  { %4882 = vmatpush.bf16.msrb.mxu0 %v7786_v11 }
 0x464   :  { %v4476_v26 = vpop.f32.mrf.mxu3  ;;  %4883 = vmatpush.bf16.msrb.mxu0 %v7785_v18 }
 0x465   :  { %v4477_v42 = vadd.f32 %v4476_v26, %v4463_v23  ;;  %v7806_v23 = vld [vmem:[#allocation12 + $0xd0] sm:$0xff]  ;;  %v7805_v26 = vld [vmem:[#allocation12 + $0xc8] sm:$0xff] }
 0x467   :  { %v4482_v27 = vpack.c.bf16 %v4477_v42, %v4475_v41  ;;  %v7789_v41 = vld [vmem:[#allocation12 + $0x48] sm:$0xff]  ;;  %v7796_v42 = vld [vmem:[#allocation12 + $0x80] sm:$0xff] }
 0x468   :  { %4884 = vmatpush.bf16.msrb.mxu0 %v7784_v8 }
 0x469   :  { %4542 = vmatpush.bf16.msra.mxu3 %v4482_v27  ;;  %v4516_v52 = vpop.f32.mrf.mxu1 }
 0x46c   :  { %7101 = vmatmul.msk.bf16.vlgmr.msra.gmra.mxu3 %vm277_vm2, %v8348_v24  ;;  %v4517_v24 = vadd.f32 %v4516_v52, %v4486_v20  ;;  %4885 = vmatpush.bf16.msrb.mxu0 %v7783_v47 }
 0x46e   :  { %v4550_v28 = vmax.f32 %v4517_v24, 0.0  ;;  %v7816_v24 = vld [vmem:[#allocation13 + $0x20] sm:$0xff] }
 0x470   :  { %4886 = vmatpush.bf16.msrb.mxu0 %v7782_v57 }
 0x471   :  { %v4518_v61 = vpop.f32.mrf.mxu1 }
 0x472   :  { %v4519_v43 = vadd.f32 %v4518_v61, %v4486_v20  ;;  %v7818_v20 = vld [vmem:[#allocation13 + $0x30] sm:$0xff] }
 0x474   :  { %v4554_v2 = vmax.f32 %v4519_v43, 0.0  ;;  %4887 = vmatpush.bf16.msrb.mxu0 %v7781_v4 }
 0x476   :  { %v4558_v5 = vpack.c.bf16 %v4554_v2, %v4550_v28 }
 0x478   :  { %4585 = vmatpush.bf16.msra.mxu1 %v4558_v5  ;;  %v7813_v5 = vld [vmem:[#allocation13 + $0x8] sm:$0xff] }
 0x47b   :  { %7103 = vmatmul.msk.bf16.vlgmr.msra.gmra.mxu1 %vm277_vm2, %v4561_v3 }
 0x47c   :  { %4894 = vmatpush.bf16.msrb.mxu1 %v7795_v15  ;;  %v7834_v15 = vld [vmem:[%s8391_s10] ss:$0 sm:$0xff] }
 0x480   :  { %4895 = vmatpush.bf16.msrb.mxu1 %v7794_v13 }
 0x484   :  { %4896 = vmatpush.bf16.msrb.mxu1 %v7793_v19 }
 0x488   :  { %4897 = vmatpush.bf16.msrb.mxu1 %v7792_v40  ;;  %v7835_v40 = vld [vmem:[%s8393_s12] ss:$0 sm:$0xff] }
 0x48c   :  { %4898 = vmatpush.bf16.msrb.mxu1 %v7791_v12 }
 0x490   :  { %4899 = vmatpush.bf16.msrb.mxu1 %v7790_v14 }
 0x494   :  { %4900 = vmatpush.bf16.msrb.mxu1 %v7789_v41 }
 0x4af   :  { %v4530_v22 = vpop.f32.mrf.mxu2 }
 0x4b0   :  { %v4531_v44 = vadd.f32 %v4530_v22, %v4487_v53  ;;  %v7780_v22 = vld [vmem:[#allocation12] sm:$0xff] }
 0x4b1   :  { %4888 = vmatpush.bf16.msrb.mxu0 %v7780_v22 }
 0x4b2   :  { %v4551_v45 = vmax.f32 %v4531_v44, 0.0 }
 0x4b5   :  { %5003 = vmatpush.bf16.msra.mxu0 %v7819_v55 }
 0x4b7   :  { %v4532_v46 = vpop.f32.mrf.mxu2 }
 0x4b8   :  { %v4533_v48 = vadd.f32 %v4532_v46, %v4487_v53  ;;  %v7788_v46 = vld [vmem:[#allocation12 + $0x40] sm:$0xff] }
 0x4b9   :  { %4901 = vmatpush.bf16.msrb.mxu1 %v7788_v46  ;;  %5004 = vmatpush.bf16.msra.mxu0 %v7818_v20 }
 0x4ba   :  { %v4555_v60 = vmax.f32 %v4533_v48, 0.0 }
 0x4bc   :  { %v4559_v50 = vpack.c.bf16 %v4555_v60, %v4551_v45 }
 0x4bd   :  { %5005 = vmatpush.bf16.msra.mxu0 %v7817_v49 }
 0x4be   :  { %4598 = vmatpush.bf16.msrb.mxu2 %v4559_v50  ;;  %v7804_v50 = vld [vmem:[#allocation12 + $0xc0] sm:$0xff] }
 0x4c1   :  { %7104 = vmatmul.msk.bf16.vlgmr.msrb.gmra.mxu2 %vm277_vm2, %v4561_v3  ;;  %5006 = vmatpush.bf16.msra.mxu0 %v7816_v24 }
 0x4c2   :  { %4907 = vmatpush.bf16.msra.mxu2 %v7803_v6 }
 0x4c5   :  { %5007 = vmatpush.bf16.msra.mxu0 %v7815_v56 }
 0x4c6   :  { %4908 = vmatpush.bf16.msra.mxu2 %v7802_v10 }
 0x4c9   :  { %5008 = vmatpush.bf16.msra.mxu0 %v7814_v0 }
 0x4ca   :  { %4909 = vmatpush.bf16.msra.mxu2 %v7801_v17 }
 0x4cd   :  { %5009 = vmatpush.bf16.msra.mxu0 %v7813_v5 }
 0x4ce   :  { %4910 = vmatpush.bf16.msra.mxu2 %v7800_v39 }
 0x4d1   :  { %5010 = vmatpush.bf16.msra.mxu0 %v7812_v7 }
 0x4d2   :  { %4911 = vmatpush.bf16.msra.mxu2 %v7799_v21 }
 0x4d6   :  { %4912 = vmatpush.bf16.msra.mxu2 %v7798_v30 }
 0x4d8   :  { %v4574_v27 = vpop.f32.mrf.mxu0 }
 0x4d9   :  { %v4617_v44 = vpack.c.bf16 %v4574_v27, %v4574_v27 }
 0x4da   :  { %4913 = vmatpush.bf16.msra.mxu2 %v7797_v32 }
 0x4db   :  { %4889 = vmatmul.bf16.vlgmr.msrb.gmra.mxu0 %v4617_v44 }
 0x4de   :  { %4914 = vmatpush.bf16.msra.mxu2 %v7796_v42 }
 0x4e0   :  { %v4576_v60 = vpop.f32.mrf.mxu0 }
 0x4ef   :  { %v4544_v54 = vpop.f32.mrf.mxu3 }
 0x4f0   :  { %v4545_v31 = vadd.f32 %v4544_v54, %v4488_v29 }
 0x4f2   :  { %v4552_v25 = vmax.f32 %v4545_v31, 0.0 }
 0x4f7   :  { %v4546_v63 = vpop.f32.mrf.mxu3 }
 0x4f8   :  { %v4547_v34 = vadd.f32 %v4546_v63, %v4488_v29  ;;  %v4587_v45 = vpop.f32.mrf.mxu1 }
 0x4f9   :  { %v4618_v48 = vpack.c.bf16 %v4587_v45, %v4587_v45 }
 0x4fa   :  { %v4556_v33 = vmax.f32 %v4547_v34, 0.0 }
 0x4fb   :  { %4902 = vmatmul.bf16.vlgmr.msrb.gmra.mxu1 %v4618_v48 }
 0x4fc   :  { %v4560_v35 = vpack.c.bf16 %v4556_v33, %v4552_v25 }
 0x4fe   :  { %4611 = vmatpush.bf16.msrb.mxu3 %v4560_v35 }
 0x500   :  { %v4589_v52 = vpop.f32.mrf.mxu1 }
 0x501   :  { %7105 = vmatmul.msk.bf16.vlgmr.msrb.gmra.mxu3 %vm277_vm2, %v4561_v3 }
 0x502   :  { %4920 = vmatpush.bf16.msra.mxu3 %v7811_v9 }
 0x506   :  { %4921 = vmatpush.bf16.msra.mxu3 %v7810_v16 }
 0x50a   :  { %4922 = vmatpush.bf16.msra.mxu3 %v7809_v36 }
 0x50e   :  { %4923 = vmatpush.bf16.msra.mxu3 %v7808_v37 }
 0x512   :  { %4924 = vmatpush.bf16.msra.mxu3 %v7807_v38 }
 0x516   :  { %4925 = vmatpush.bf16.msra.mxu3 %v7806_v23 }
 0x51a   :  { %4926 = vmatpush.bf16.msra.mxu3 %v7805_v26 }
 0x51e   :  { %4927 = vmatpush.bf16.msra.mxu3 %v7804_v50 }
 0x544   :  { %v4600_v51 = vpop.f32.mrf.mxu2 }
 0x545   :  { %v4619_v53 = vpack.c.bf16 %v4600_v51, %v4600_v51 }
 0x547   :  { %4915 = vmatmul.bf16.vlgmr.msra.gmra.mxu2 %v4619_v53 }
 0x54c   :  { %v4602_v58 = vpop.f32.mrf.mxu2 }
 0x558   :  { %v4890_v43 = vpop.f32.mrf.mxu0 }
 0x559   :  { %v4891_v10 = vadd.f32 %v7834_v15, %v4890_v43 }
 0x560   :  { %v4892_v3 = vpop.f32.mrf.mxu0 }
 0x578   :  { %v4903_v1 = vpop.f32.mrf.mxu1 }
 0x579   :  { %v4904_v11 = vadd.f32 %v4903_v1, %v4891_v10 }
 0x580   :  { %v4905_v59 = vpop.f32.mrf.mxu1 }
 0x584   :  { %v4613_v61 = vpop.f32.mrf.mxu3 }
 0x585   :  { %v4620_v62 = vpack.c.bf16 %v4613_v61, %v4613_v61 }
 0x587   :  { %4928 = vmatmul.bf16.vlgmr.msra.gmra.mxu3 %v4620_v62 }
 0x58c   :  { %v4615_v28 = vpop.f32.mrf.mxu3 }
 0x5ca   :  { %v4916_v2 = vpop.f32.mrf.mxu2 }
 0x5cb   :  { %v4917_v13 = vadd.f32 %v4916_v2, %v4904_v11 }
 0x5d2   :  { %v4918_v6 = vpop.f32.mrf.mxu2 }
 0x60a   :  { %v4929_v17 = vpop.f32.mrf.mxu3 }
 0x60b   :  { %v4930_v18 = vadd.f32 %v4929_v17, %v4917_v13 }
 0x60d   :  { %v4933_v19 = vmax.f32 %v4930_v18, 0.0 }
 0x60f   :  { %v4934_v39 = vpack.c.bf16 %v4933_v19, %v4933_v19 }
 0x611   :  { %5011 = vmatmul.bf16.vlgmr.msra.gmra.mxu0 %v4934_v39 }
 0x612   :  { %v4931_v8 = vpop.f32.mrf.mxu3 }
 0x68e   :  { %v5012_v54 = vpop.f32.mrf.mxu0 }
 0x68f   :  { %v5013_v21 = vadd.f32 %v7835_v40, %v5012_v54 }
 0x691   :  { %5016 = vst [vmem:[%s8394_s13] sm:$0x3] %v5013_v21 }
 0x696   :  { %v5014_v47 = vpop.f32.mrf.mxu0 }
 0x697   :  { %5021 = vsyncpa [#allocation3], 1 }
 0x698   :  { %5022 = vsyncpa [#allocation5], 1 }
 0x699   :  { %5023 = vsyncpa [#allocation8], 1 }
 0x69a   :  { %5024 = vsyncpa [#allocation11], 1 }
 0x69b   :  { %5025 = vsyncpa [#allocation14], 1 }

</bundles_post_ra>
